<compile_context>
chip_gen: v5e
topology: v5e:2x2
jax: 0.10.0
libtpu: 0.0.40
codegen_flags: <defaults>
</compile_context>

<pallas_src>
import jax
import jax.numpy as jnp
from jax import lax
from jax.experimental import pallas as pl
from jax.experimental.pallas import tpu as pltpu


def _round_up(v, m):
    return ((v + m - 1) // m) * m


def bottleneck_kernel(x_ref, w1_ref, b1_ref, w2_ref, b2_ref, w3_ref, b3_ref,
                      out_ref, h1pad_ref):
    """One (TH x W) output row-tile of the fused bottleneck block."""
    H, W, Cin_p = x_ref.shape[1], x_ref.shape[2], x_ref.shape[3]
    TH = out_ref.shape[1]
    Cmid_p = w1_ref.shape[1]
    Cout_p = w3_ref.shape[1]

    i = pl.program_id(1)
    row0 = pl.multiple_of(i * TH, TH)

    # ---- per-image phase (row-tile axis is sequential on each core) --------
    # conv1 (1x1, BN scale folded) + bias + ReLU over the WHOLE image, stored
    # into a zero-bordered bf16 scratch.  The zero border supplies the 3x3
    # 'SAME' padding and the halo rows, so no per-tile recompute / masking.
    @pl.when(i == 0)
    def _():
        h1pad_ref[...] = jnp.zeros_like(h1pad_ref)
        x2d = x_ref[0].reshape(H * W, Cin_p)                       # bf16
        h1 = jnp.dot(x2d, w1_ref[...], preferred_element_type=jnp.float32)
        h1 = jnp.maximum(h1 + b1_ref[...], 0.0)
        h1pad_ref[1:H + 1, 1:W + 1, :] = (
            h1.reshape(H, W, Cmid_p).astype(jnp.bfloat16))

    # ---- conv2 (3x3) as ONE matmul with K = 9*Cmid_p (bf16 im2col views) ---
    views = []
    for dy in range(3):
        for dx in range(3):
            views.append(h1pad_ref[pl.ds(row0 + dy, TH), pl.ds(dx, W), :])
    patch = jnp.concatenate(views, axis=-1)            # (TH, W, 9*Cmid_p) bf16
    patch2d = patch.reshape(TH * W, 9 * Cmid_p)
    h2 = jnp.dot(patch2d, w2_ref[...], preferred_element_type=jnp.float32)
    h2 = jnp.maximum(h2 + b2_ref[...], 0.0)            # (TH*W, Cmid_p) f32

    # ---- conv3 (1x1) + bias + residual (reuse resident x tile) + ReLU ------
    h3 = jnp.dot(h2.astype(jnp.bfloat16), w3_ref[...],
                 preferred_element_type=jnp.float32) + b3_ref[...]
    x_mid = x_ref[0, pl.ds(row0, TH), :, :].reshape(TH * W, Cin_p)
    out = jnp.maximum(h3 + x_mid.astype(jnp.float32), 0.0)
    out_ref[...] = out.reshape(1, TH, W, Cout_p).astype(out_ref.dtype)


def prepare_params(raw_params):
    """One-time prep: fold BN scale into conv weights, pad channels to 128
    lanes, reshape the 3x3 weight for the single K=9*Cmid matmul, cast the MXU
    operands to bf16 (biases stay f32)."""
    w1, s1, b1, w2, s2, b2, w3, s3, b3 = raw_params
    Cin, Cmid = w1.shape
    Cout = w3.shape[1]
    Cin_p = _round_up(Cin, 128)
    Cmid_p = _round_up(Cmid, 128)
    Cout_p = _round_up(Cout, 128)

    w1f = w1 * s1.reshape(1, Cmid)
    w2f = w2 * s2.reshape(1, 1, 1, Cmid)
    w3f = w3 * s3.reshape(1, Cout)

    w1p = jnp.zeros((Cin_p, Cmid_p), jnp.float32).at[:Cin, :Cmid].set(w1f)
    w2p = jnp.zeros((3, 3, Cmid_p, Cmid_p), jnp.float32).at[:, :, :Cmid, :Cmid].set(w2f)
    w3p = jnp.zeros((Cmid_p, Cout_p), jnp.float32).at[:Cmid, :Cout].set(w3f)
    b1p = jnp.zeros((1, Cmid_p), jnp.float32).at[0, :Cmid].set(b1.reshape(-1))
    b2p = jnp.zeros((1, Cmid_p), jnp.float32).at[0, :Cmid].set(b2.reshape(-1))
    b3p = jnp.zeros((1, Cout_p), jnp.float32).at[0, :Cout].set(b3.reshape(-1))

    w2p = w2p.reshape(9 * Cmid_p, Cmid_p)              # K order: (dy, dx, cin)
    kparams = (w1p.astype(jnp.bfloat16), b1p,
               w2p.astype(jnp.bfloat16), b2p,
               w3p.astype(jnp.bfloat16), b3p)
    dims = (Cin, Cmid, Cout, Cin_p, Cmid_p, Cout_p)
    return kparams, dims


def _pick_tile_h(H, W, max_rows=4096):
    """Whole image when it fits comfortably; otherwise the largest divisor of
    H keeping M = TH*W <= max_rows (fills a 256-wide MXU at M >= 512)."""
    if H * W <= max_rows:
        return H
    for d in range(H - 1, 0, -1):
        if H % d == 0 and d * W <= max_rows:
            return d
    return H


def bottleneck_pallas(x_nhwc, kparams, dims, *, tile_h=None):
    """NHWC in / NHWC out (bf16).  transpose(out, (0,3,1,2)) recovers NCHW."""
    w1, b1, w2, b2, w3, b3 = kparams
    Cin, Cmid, Cout, Cin_p, Cmid_p, Cout_p = dims
    N, H, W, C = x_nhwc.shape
    assert C == Cin and Cin == Cout, "downsample=None needs in_ch == 4*out_ch"
    assert Cin_p == Cout_p

    TH = tile_h if tile_h is not None else _pick_tile_h(H, W)
    if H % TH != 0:
        TH = H
    nH = H // TH
    Wp2 = _round_up(W + 2, 8)     # sublane-aligned scratch width

    x = x_nhwc.astype(jnp.bfloat16)
    if Cin_p != Cin:              # no-op at real ResNet channel counts
        x = jnp.pad(x, ((0, 0), (0, 0), (0, 0), (0, Cin_p - Cin)))

    # VMEM budget: double-buffered x/out blocks + weights + padded h1 scratch
    # + live intermediates (f32 conv1, bf16 im2col patch, f32 h2/h3/out) +
    # slack for Mosaic internals.
    est = (2 * H * W * Cin_p * 2                        # x block (2 bufs, bf16)
           + 2 * TH * W * Cout_p * 2                    # out block (2 bufs, bf16)
           + 2 * ((w1.size + w2.size + w3.size) * 2
                  + (b1.size + b2.size + b3.size) * 4)  # weights/biases
           + (H + 2) * Wp2 * Cmid_p * 2                 # bf16 h1 scratch
           + H * W * Cmid_p * 4                         # f32 conv1 intermediate
           + TH * W * 9 * Cmid_p * 2                    # bf16 im2col patch
           + TH * W * Cmid_p * 4                        # f32 h2
           + 2 * TH * W * Cout_p * 4                    # f32 h3 / out temporaries
           + (2 << 20))
    try:
        cap = int(pltpu.get_tpu_info().vmem_capacity_bytes) * 3 // 4
    except Exception:
        cap = 48 * 2**20          # v7x-safe fallback (64 MiB physical per TC)
    vmem_limit = int(min(cap, max(32 * 2**20, int(est * 1.25))))

    flops = 2 * N * H * W * (Cin_p * Cmid_p + 9 * Cmid_p * Cmid_p
                             + Cmid_p * Cout_p)
    bytes_accessed = (x.size * 2 + N * H * W * Cout_p * 2
                      + (w1.size + w2.size + w3.size) * 2
                      + (b1.size + b2.size + b3.size) * 4)

    grid_spec = pltpu.PrefetchScalarGridSpec(
        num_scalar_prefetch=0,
        grid=(N, nH),
        in_specs=[
            # whole image resident across the row-tile axis (fetched once per n)
            pl.BlockSpec((1, H, W, Cin_p), lambda n, i: (n, 0, 0, 0)),
            # grid-invariant weights/biases (small vs. budget)
            pl.BlockSpec((Cin_p, Cmid_p), lambda n, i: (0, 0)),
            pl.BlockSpec((1, Cmid_p), lambda n, i: (0, 0)),
            pl.BlockSpec((9 * Cmid_p, Cmid_p), lambda n, i: (0, 0)),
            pl.BlockSpec((1, Cmid_p), lambda n, i: (0, 0)),
            pl.BlockSpec((Cmid_p, Cout_p), lambda n, i: (0, 0)),
            pl.BlockSpec((1, Cout_p), lambda n, i: (0, 0)),
        ],
        out_specs=pl.BlockSpec((1, TH, W, Cout_p), lambda n, i: (n, i, 0, 0)),
        scratch_shapes=[pltpu.VMEM((H + 2, Wp2, Cmid_p), jnp.bfloat16)],
    )

    out_p = pl.pallas_call(
        bottleneck_kernel,
        out_shape=jax.ShapeDtypeStruct((N, H, W, Cout_p), jnp.bfloat16),
        grid_spec=grid_spec,
        compiler_params=pltpu.CompilerParams(
            # Row-tile axis must stay sequential ("arbitrary"): the
            # pl.when(i==0) whole-image conv1 fills the scratch that later
            # row tiles of the same image read.
            dimension_semantics=("parallel", "arbitrary"),
            vmem_limit_bytes=vmem_limit),
        cost_estimate=pl.CostEstimate(flops=flops, transcendentals=0,
                                      bytes_accessed=bytes_accessed),
    )(x, w1, b1, w2, b2, w3, b3)

    return out_p[..., :Cout] if Cout_p != Cout else out_p


def make_params(key, in_channels, out_channels):
    """Deterministic synthetic parameters; BN (inference) folded to scale/bias."""
    expansion = 4
    Cmid = out_channels
    Cout = out_channels * expansion
    ks = jax.random.split(key, 16)
    eps = 1e-5

    def fold_bn(kg, kb, km, kv, c):
        gamma = 1.0 + 0.1 * jax.random.normal(kg, (c,), jnp.float32)
        beta = 0.1 * jax.random.normal(kb, (c,), jnp.float32)
        mean = 0.1 * jax.random.normal(km, (c,), jnp.float32)
        var = jnp.abs(jax.random.normal(kv, (c,), jnp.float32)) + 0.5
        scale = gamma / jnp.sqrt(var + eps)
        bias = beta - mean * scale
        return scale.reshape(1, c), bias.reshape(1, c)

    w1 = 0.1 * jax.random.normal(ks[0], (in_channels, Cmid), jnp.float32)
    w2 = 0.1 * jax.random.normal(ks[1], (3, 3, Cmid, Cmid), jnp.float32)
    w3 = 0.1 * jax.random.normal(ks[2], (Cmid, Cout), jnp.float32)
    s1, b1 = fold_bn(ks[3], ks[4], ks[5], ks[6], Cmid)
    s2, b2 = fold_bn(ks[7], ks[8], ks[9], ks[10], Cmid)
    s3, b3 = fold_bn(ks[11], ks[12], ks[13], ks[14], Cout)
    return (w1, s1, b1, w2, s2, b2, w3, s3, b3)


def bottleneck_reference(x_nhwc, kparams, dims):
    """Pure-JAX reference using the same folded/padded bf16 weights and the
    same bf16-operand / f32-accumulation convention as the kernel."""
    w1, b1, w2, b2, w3, b3 = kparams
    Cin, Cmid, Cout, Cin_p, Cmid_p, Cout_p = dims
    x = x_nhwc.astype(jnp.bfloat16)
    if Cin_p != Cin:
        x = jnp.pad(x, ((0, 0), (0, 0), (0, 0), (0, Cin_p - Cin)))
    dn = ('NHWC', 'HWIO', 'NHWC')

    h = lax.conv_general_dilated(x, w1.reshape(1, 1, Cin_p, Cmid_p), (1, 1),
                                 'SAME', dimension_numbers=dn,
                                 preferred_element_type=jnp.float32)
    h = jnp.maximum(h + b1.reshape(1, 1, 1, Cmid_p), 0.0)
    h = lax.conv_general_dilated(h.astype(jnp.bfloat16),
                                 w2.reshape(3, 3, Cmid_p, Cmid_p), (1, 1),
                                 'SAME', dimension_numbers=dn,
                                 preferred_element_type=jnp.float32)
    h = jnp.maximum(h + b2.reshape(1, 1, 1, Cmid_p), 0.0)
    h = lax.conv_general_dilated(h.astype(jnp.bfloat16),
                                 w3.reshape(1, 1, Cmid_p, Cout_p), (1, 1),
                                 'SAME', dimension_numbers=dn,
                                 preferred_element_type=jnp.float32)
    h = h + b3.reshape(1, 1, 1, Cout_p)
    out = jnp.maximum(h + x.astype(jnp.float32), 0.0)
    return out[..., :Cout] if Cout_p != Cout else out


if __name__ == "__main__":
    key = jax.random.PRNGKey(0)
    k_x, k_p = jax.random.split(key)

    # Bottleneck(in_channels=32, out_channels=8): expansion*8 == 32 so the
    # residual add is valid with downsample=None.  Input shaped NCHW like the
    # PyTorch module; converted once to the kernel's NHWC layout.
    N, Cin, H, W = 2, 32, 16, 16
    out_channels = 8

    x_nchw = jax.random.normal(k_x, (N, Cin, H, W), jnp.float32)
    raw = make_params(k_p, Cin, out_channels)
    kparams, dims = prepare_params(raw)

    x_nhwc = jnp.transpose(x_nchw, (0, 2, 3, 1))   # one-time layout change

    out = jax.block_until_ready(bottleneck_pallas(x_nhwc, kparams, dims))
    ref = jax.block_until_ready(bottleneck_reference(x_nhwc, kparams, dims))

    assert out.shape == (N, H, W, Cin)
    err = float(jnp.max(jnp.abs(out.astype(jnp.float32) - ref)))
    assert err < 7.5e-2, err   # bf16 output rounding + summation-order slack
    print("KERNEL_OK")
</pallas_src>

<mosaic_0001>
module attributes {stable_mosaic.version = 11 : i64} {
  func.func @bottleneck_kernel(%arg0: i32, %arg1: i32, %arg2: memref<1x16x16x128xbf16, #tpu.memory_space<vmem>>, %arg3: memref<128x128xbf16, #tpu.memory_space<vmem>>, %arg4: memref<1x128xf32, #tpu.memory_space<vmem>>, %arg5: memref<1152x128xbf16, #tpu.memory_space<vmem>>, %arg6: memref<1x128xf32, #tpu.memory_space<vmem>>, %arg7: memref<128x128xbf16, #tpu.memory_space<vmem>>, %arg8: memref<1x128xf32, #tpu.memory_space<vmem>>, %arg9: memref<1x16x16x128xbf16, #tpu.memory_space<vmem>>, %arg10: memref<18x24x128xbf16, #tpu.memory_space<vmem>>) attributes {dimension_semantics = [#tpu.dimension_semantics<parallel>, #tpu.dimension_semantics<arbitrary>], iteration_bounds = array<i64: 2, 1>, scalar_prefetch = 0 : i64, scratch_operands = 1 : i64, tpu.core_type = #tpu.core_type<tc>, window_params = [{transform_indices = @transform_0, window_bounds = array<i64: 1, 16, 16, 128>}, {pipeline_mode = #tpu.pipeline_mode<synchronous>, transform_indices = @transform_1, window_bounds = array<i64: 128, 128>}, {pipeline_mode = #tpu.pipeline_mode<synchronous>, transform_indices = @transform_2, window_bounds = array<i64: 1, 128>}, {pipeline_mode = #tpu.pipeline_mode<synchronous>, transform_indices = @transform_3, window_bounds = array<i64: 1152, 128>}, {pipeline_mode = #tpu.pipeline_mode<synchronous>, transform_indices = @transform_4, window_bounds = array<i64: 1, 128>}, {pipeline_mode = #tpu.pipeline_mode<synchronous>, transform_indices = @transform_5, window_bounds = array<i64: 128, 128>}, {pipeline_mode = #tpu.pipeline_mode<synchronous>, transform_indices = @transform_6, window_bounds = array<i64: 1, 128>}, {transform_indices = @transform_7, window_bounds = array<i64: 1, 16, 16, 128>}]} {
    %c16_i32 = arith.constant 16 : i32
    %0 = arith.muli %arg1, %c16_i32 : i32
    %1 = tpu.assume_multiple %0, 16 : i32
    %c0_i32 = arith.constant 0 : i32
    %2 = arith.cmpi eq, %arg1, %c0_i32 : i32
    %3 = arith.extui %2 : i1 to i32
    %c0_i32_0 = arith.constant 0 : i32
    %4 = arith.cmpi ne, %3, %c0_i32_0 : i32
    scf.if %4 {
      %cst_41 = arith.constant 0.000000e+00 : bf16
      %58 = vector.broadcast %cst_41 : bf16 to vector<18x24x128xbf16>
      %c0_42 = arith.constant 0 : index
      %c0_43 = arith.constant 0 : index
      %c0_44 = arith.constant 0 : index
      %59 = vector.load %arg10[%c0_42, %c0_43, %c0_44] : memref<18x24x128xbf16, #tpu.memory_space<vmem>>, vector<18x24x128xbf16>
      tpu.vector_store %arg10[%c0_42, %c0_43, %c0_44], %58 {strides = array<i32>} : memref<18x24x128xbf16, #tpu.memory_space<vmem>>, vector<18x24x128xbf16>,
      %c0_45 = arith.constant 0 : index
      %c0_46 = arith.constant 0 : index
      %c0_47 = arith.constant 0 : index
      %c0_48 = arith.constant 0 : index
      %60 = vector.load %arg2[%c0_45, %c0_46, %c0_47, %c0_48] : memref<1x16x16x128xbf16, #tpu.memory_space<vmem>>, vector<1x16x16x128xbf16>
      %61 = vector.shape_cast %60 : vector<1x16x16x128xbf16> to vector<16x16x128xbf16>
      %62 = vector.shape_cast %61 : vector<16x16x128xbf16> to vector<256x128xbf16>
      %c0_49 = arith.constant 0 : index
      %c0_50 = arith.constant 0 : index
      %63 = vector.load %arg3[%c0_49, %c0_50] : memref<128x128xbf16, #tpu.memory_space<vmem>>, vector<128x128xbf16>
      %cst_51 = arith.constant dense<0.000000e+00> : vector<256x128xf32>
      %64 = tpu.matmul %62, %63, %cst_51 {dimension_numbers = #tpu.dot_dimension_numbers<[1], [0], [0], [1], [0, 0, 1, 1], [], []>} : vector<256x128xbf16>, vector<128x128xbf16>, vector<256x128xf32> -> vector<256x128xf32>
      %c0_52 = arith.constant 0 : index
      %c0_53 = arith.constant 0 : index
      %65 = vector.load %arg4[%c0_52, %c0_53] : memref<1x128xf32, #tpu.memory_space<vmem>>, vector<1x128xf32>
      %66 = vector.broadcast %65 : vector<1x128xf32> to vector<256x128xf32>
      %67 = arith.addf %64, %66 : vector<256x128xf32>
      %cst_54 = arith.constant 0.000000e+00 : f32
      %68 = vector.broadcast %cst_54 : f32 to vector<256x128xf32>
      %69 = arith.maximumf %67, %68 : vector<256x128xf32>
      %70 = vector.shape_cast %69 : vector<256x128xf32> to vector<16x16x128xf32>
      %71 = arith.truncf %70 : vector<16x16x128xf32> to vector<16x16x128xbf16>
      %c1_55 = arith.constant 1 : index
      %c1_56 = arith.constant 1 : index
      %c0_57 = arith.constant 0 : index
      %72 = vector.load %arg10[%c1_55, %c1_56, %c0_57] : memref<18x24x128xbf16, #tpu.memory_space<vmem>>, vector<16x16x128xbf16>
      tpu.vector_store %arg10[%c1_55, %c1_56, %c0_57], %71 {strides = array<i32>} : memref<18x24x128xbf16, #tpu.memory_space<vmem>>, vector<16x16x128xbf16>,
    } else {
    }
    %c0_i32_1 = arith.constant 0 : i32
    %5 = arith.addi %1, %c0_i32_1 : i32
    %6 = arith.index_cast %5 : i32 to index
    %c0 = arith.constant 0 : index
    %c0_2 = arith.constant 0 : index
    %7 = vector.load %arg10[%6, %c0, %c0_2] : memref<18x24x128xbf16, #tpu.memory_space<vmem>>, vector<16x16x128xbf16>
    %c0_i32_3 = arith.constant 0 : i32
    %8 = arith.addi %1, %c0_i32_3 : i32
    %9 = arith.index_cast %8 : i32 to index
    %c1 = arith.constant 1 : index
    %c0_4 = arith.constant 0 : index
    %10 = vector.load %arg10[%9, %c1, %c0_4] : memref<18x24x128xbf16, #tpu.memory_space<vmem>>, vector<16x16x128xbf16>
    %c0_i32_5 = arith.constant 0 : i32
    %11 = arith.addi %1, %c0_i32_5 : i32
    %12 = arith.index_cast %11 : i32 to index
    %c2 = arith.constant 2 : index
    %c0_6 = arith.constant 0 : index
    %13 = vector.load %arg10[%12, %c2, %c0_6] : memref<18x24x128xbf16, #tpu.memory_space<vmem>>, vector<16x16x128xbf16>
    %c1_i32 = arith.constant 1 : i32
    %14 = arith.addi %1, %c1_i32 : i32
    %15 = arith.index_cast %14 : i32 to index
    %c0_7 = arith.constant 0 : index
    %c0_8 = arith.constant 0 : index
    %16 = vector.load %arg10[%15, %c0_7, %c0_8] : memref<18x24x128xbf16, #tpu.memory_space<vmem>>, vector<16x16x128xbf16>
    %c1_i32_9 = arith.constant 1 : i32
    %17 = arith.addi %1, %c1_i32_9 : i32
    %18 = arith.index_cast %17 : i32 to index
    %c1_10 = arith.constant 1 : index
    %c0_11 = arith.constant 0 : index
    %19 = vector.load %arg10[%18, %c1_10, %c0_11] : memref<18x24x128xbf16, #tpu.memory_space<vmem>>, vector<16x16x128xbf16>
    %c1_i32_12 = arith.constant 1 : i32
    %20 = arith.addi %1, %c1_i32_12 : i32
    %21 = arith.index_cast %20 : i32 to index
    %c2_13 = arith.constant 2 : index
    %c0_14 = arith.constant 0 : index
    %22 = vector.load %arg10[%21, %c2_13, %c0_14] : memref<18x24x128xbf16, #tpu.memory_space<vmem>>, vector<16x16x128xbf16>
    %c2_i32 = arith.constant 2 : i32
    %23 = arith.addi %1, %c2_i32 : i32
    %24 = arith.index_cast %23 : i32 to index
    %c0_15 = arith.constant 0 : index
    %c0_16 = arith.constant 0 : index
    %25 = vector.load %arg10[%24, %c0_15, %c0_16] : memref<18x24x128xbf16, #tpu.memory_space<vmem>>, vector<16x16x128xbf16>
    %c2_i32_17 = arith.constant 2 : i32
    %26 = arith.addi %1, %c2_i32_17 : i32
    %27 = arith.index_cast %26 : i32 to index
    %c1_18 = arith.constant 1 : index
    %c0_19 = arith.constant 0 : index
    %28 = vector.load %arg10[%27, %c1_18, %c0_19] : memref<18x24x128xbf16, #tpu.memory_space<vmem>>, vector<16x16x128xbf16>
    %c2_i32_20 = arith.constant 2 : i32
    %29 = arith.addi %1, %c2_i32_20 : i32
    %30 = arith.index_cast %29 : i32 to index
    %c2_21 = arith.constant 2 : index
    %c0_22 = arith.constant 0 : index
    %31 = vector.load %arg10[%30, %c2_21, %c0_22] : memref<18x24x128xbf16, #tpu.memory_space<vmem>>, vector<16x16x128xbf16>
    %32 = tpu.concatenate %7, %10, %13, %16, %19, %22, %25, %28, %31 in 2 : vector<16x16x128xbf16>, vector<16x16x128xbf16>, vector<16x16x128xbf16>, vector<16x16x128xbf16>, vector<16x16x128xbf16>, vector<16x16x128xbf16>, vector<16x16x128xbf16>, vector<16x16x128xbf16>, vector<16x16x128xbf16> -> vector<16x16x1152xbf16>
    %33 = vector.shape_cast %32 : vector<16x16x1152xbf16> to vector<256x1152xbf16>
    %c0_23 = arith.constant 0 : index
    %c0_24 = arith.constant 0 : index
    %34 = vector.load %arg5[%c0_23, %c0_24] : memref<1152x128xbf16, #tpu.memory_space<vmem>>, vector<1152x128xbf16>
    %cst = arith.constant dense<0.000000e+00> : vector<256x128xf32>
    %35 = tpu.matmul %33, %34, %cst {dimension_numbers = #tpu.dot_dimension_numbers<[1], [0], [0], [1], [0, 0, 1, 1], [], []>} : vector<256x1152xbf16>, vector<1152x128xbf16>, vector<256x128xf32> -> vector<256x128xf32>
    %c0_25 = arith.constant 0 : index
    %c0_26 = arith.constant 0 : index
    %36 = vector.load %arg6[%c0_25, %c0_26] : memref<1x128xf32, #tpu.memory_space<vmem>>, vector<1x128xf32>
    %37 = vector.broadcast %36 : vector<1x128xf32> to vector<256x128xf32>
    %38 = arith.addf %35, %37 : vector<256x128xf32>
    %cst_27 = arith.constant 0.000000e+00 : f32
    %39 = vector.broadcast %cst_27 : f32 to vector<256x128xf32>
    %40 = arith.maximumf %38, %39 : vector<256x128xf32>
    %41 = arith.truncf %40 : vector<256x128xf32> to vector<256x128xbf16>
    %c0_28 = arith.constant 0 : index
    %c0_29 = arith.constant 0 : index
    %42 = vector.load %arg7[%c0_28, %c0_29] : memref<128x128xbf16, #tpu.memory_space<vmem>>, vector<128x128xbf16>
    %cst_30 = arith.constant dense<0.000000e+00> : vector<256x128xf32>
    %43 = tpu.matmul %41, %42, %cst_30 {dimension_numbers = #tpu.dot_dimension_numbers<[1], [0], [0], [1], [0, 0, 1, 1], [], []>} : vector<256x128xbf16>, vector<128x128xbf16>, vector<256x128xf32> -> vector<256x128xf32>
    %c0_31 = arith.constant 0 : index
    %c0_32 = arith.constant 0 : index
    %44 = vector.load %arg8[%c0_31, %c0_32] : memref<1x128xf32, #tpu.memory_space<vmem>>, vector<1x128xf32>
    %45 = vector.broadcast %44 : vector<1x128xf32> to vector<256x128xf32>
    %46 = arith.addf %43, %45 : vector<256x128xf32>
    %c0_33 = arith.constant 0 : index
    %47 = arith.index_cast %1 : i32 to index
    %c0_34 = arith.constant 0 : index
    %c0_35 = arith.constant 0 : index
    %48 = vector.load %arg2[%c0_33, %47, %c0_34, %c0_35] : memref<1x16x16x128xbf16, #tpu.memory_space<vmem>>, vector<1x16x16x128xbf16>
    %49 = vector.shape_cast %48 : vector<1x16x16x128xbf16> to vector<16x16x128xbf16>
    %50 = vector.shape_cast %49 : vector<16x16x128xbf16> to vector<256x128xbf16>
    %51 = arith.extf %50 : vector<256x128xbf16> to vector<256x128xf32>
    %52 = arith.addf %46, %51 : vector<256x128xf32>
    %cst_36 = arith.constant 0.000000e+00 : f32
    %53 = vector.broadcast %cst_36 : f32 to vector<256x128xf32>
    %54 = arith.maximumf %52, %53 : vector<256x128xf32>
    %55 = vector.shape_cast %54 : vector<256x128xf32> to vector<1x16x16x128xf32>
    %56 = arith.truncf %55 : vector<1x16x16x128xf32> to vector<1x16x16x128xbf16>
    %c0_37 = arith.constant 0 : index
    %c0_38 = arith.constant 0 : index
    %c0_39 = arith.constant 0 : index
    %c0_40 = arith.constant 0 : index
    %57 = vector.load %arg9[%c0_37, %c0_38, %c0_39, %c0_40] : memref<1x16x16x128xbf16, #tpu.memory_space<vmem>>, vector<1x16x16x128xbf16>
    tpu.vector_store %arg9[%c0_37, %c0_38, %c0_39, %c0_40], %56 {strides = array<i32>} : memref<1x16x16x128xbf16, #tpu.memory_space<vmem>>, vector<1x16x16x128xbf16>,
    return
  }
  func.func @transform_0(%arg0: i32, %arg1: i32) -> (i32, i32, i32, i32) {
    %c0_i32 = arith.constant 0 : i32
    %c0_i32_0 = arith.constant 0 : i32
    %c0_i32_1 = arith.constant 0 : i32
    %c0_i32_2 = arith.constant 0 : i32
    return %arg0, %c0_i32, %c0_i32_0, %c0_i32_1 : i32, i32, i32, i32
  }
  func.func @transform_1(%arg0: i32, %arg1: i32) -> (i32, i32) {
    %c0_i32 = arith.constant 0 : i32
    %c0_i32_0 = arith.constant 0 : i32
    %c0_i32_1 = arith.constant 0 : i32
    return %c0_i32, %c0_i32_0 : i32, i32
  }
  func.func @transform_2(%arg0: i32, %arg1: i32) -> (i32, i32) {
    %c0_i32 = arith.constant 0 : i32
    %c0_i32_0 = arith.constant 0 : i32
    %c0_i32_1 = arith.constant 0 : i32
    return %c0_i32, %c0_i32_0 : i32, i32
  }
  func.func @transform_3(%arg0: i32, %arg1: i32) -> (i32, i32) {
    %c0_i32 = arith.constant 0 : i32
    %c0_i32_0 = arith.constant 0 : i32
    %c0_i32_1 = arith.constant 0 : i32
    return %c0_i32, %c0_i32_0 : i32, i32
  }
  func.func @transform_4(%arg0: i32, %arg1: i32) -> (i32, i32) {
    %c0_i32 = arith.constant 0 : i32
    %c0_i32_0 = arith.constant 0 : i32
    %c0_i32_1 = arith.constant 0 : i32
    return %c0_i32, %c0_i32_0 : i32, i32
  }
  func.func @transform_5(%arg0: i32, %arg1: i32) -> (i32, i32) {
    %c0_i32 = arith.constant 0 : i32
    %c0_i32_0 = arith.constant 0 : i32
    %c0_i32_1 = arith.constant 0 : i32
    return %c0_i32, %c0_i32_0 : i32, i32
  }
  func.func @transform_6(%arg0: i32, %arg1: i32) -> (i32, i32) {
    %c0_i32 = arith.constant 0 : i32
    %c0_i32_0 = arith.constant 0 : i32
    %c0_i32_1 = arith.constant 0 : i32
    return %c0_i32, %c0_i32_0 : i32, i32
  }
  func.func @transform_7(%arg0: i32, %arg1: i32) -> (i32, i32, i32, i32) {
    %c0_i32 = arith.constant 0 : i32
    %c0_i32_0 = arith.constant 0 : i32
    %c0_i32_1 = arith.constant 0 : i32
    return %arg0, %arg1, %c0_i32, %c0_i32_0 : i32, i32, i32, i32
  }
}

</mosaic_0001>

<bundles_post_ra>
// kernel: tpu_custom_call.1
= control target key start
LH: loop header
LB: loop body
LE: loop exit
PB: predicated region body
PF: predicated region fallthrough
CT: control target
= control target key end

     0   :  { %s7899_s0 = inlined_call_operand.hbm [shape: bf16[2,16,16,128], index: 0, kind: input, shape index: {}]   ;;  %s7900_s1 = inlined_call_operand.hbm [shape: bf16[128,128], index: 1, kind: input, shape index: {}]   ;;  %s7901_s2 = inlined_call_operand.vmem [shape: f32[1,128], index: 2, kind: input, shape index: {}]   ;;  %s7902_s3 = inlined_call_operand.hbm [shape: bf16[1152,128], index: 3, kind: input, shape index: {}]   ;;  %s7903_s4 = inlined_call_operand.vmem [shape: f32[1,128], index: 4, kind: input, shape index: {}]   ;;  %s7904_s5 = inlined_call_operand.hbm [shape: bf16[128,128], index: 5, kind: input, shape index: {}]   ;;  %s7905_s6 = inlined_call_operand.vmem [shape: f32[1,128], index: 6, kind: input, shape index: {}]   ;;  %s7906_s7 = inlined_call_operand.hbm [shape: bf16[2,16,16,128], index: 7, kind: output, shape index: {}]  }
   0x1   :  { %7922 = sst [smem:[#allocation104_spill]] %s7900_s1 }
   0x2   :  { %7923 = sst [smem:[#allocation105_spill]] %s7902_s3 }
   0x3   :  { %7924 = sst [smem:[#allocation106_spill]] %s7904_s5 }
   0x4   :  { %12 = vsyncpa [#allocation4], 0 }
   0x5   :  { %14 = vsyncpa [#allocation4 + $0x1], 0 }
   0x6   :  { %15 = vsyncpa [#allocation7], 0 }
   0x7   :  { %16 = vsyncpa [#allocation10], 0 }
   0x8   :  { %17 = vsyncpa [#allocation5], 0 }
   0x9   :  { %19 = vsyncpa [#allocation5 + $0x1], 0  ;;  %s6231_s24 = smov 0   ;;  %s6233_s25 = smov 0  }
   0xa   :  { %s6235_s26 = smov 0   ;;  %s6237_s27 = smov 0  }
   0xb   :  { %s6239_s28 = smov 0   ;;  %s6241_s29 = smov 0  }
   0xc LB: > { %7925 = sst [smem:[#allocation16_spill]] %s6181_s29  ;;  %s4736_s30 = sadd.s32 4294967295, %s6181_s29   ;;  %s6181_s29 = sphi %s6241_s29, %s25_s29   ;;  %s6177_s28 = sphi %s6239_s28, %s8194_s28   ;;  %s6173_s27 = sphi %s6237_s27, %s8193_s27   ;;  %s6169_s26 = sphi %s6235_s26, %s8192_s26   ;;  %s6165_s25 = sphi %s6233_s25, %s8191_s25   ;;  %s6161_s24 = sphi %s6231_s24, %s8190_s24  }
   0xd   : > { %s4737_s8 = sadd.s32 4294967294, %s6181_s29   ;;  %p57_p0 = scmp.ne.s32.totalorder %s6165_s25, %s6161_s24 }
   0xe   : > { %p6265_p1 = scmp.eq.s32.totalorder %s4736_s30, 0  ;;  %p6269_p2 = scmp.eq.s32.totalorder %s4736_s30, 1 }
   0xf   : > { %p215_p3 = scmp.eq.s32.totalorder %s4737_s8, 1  ;;  %p4738_p5 = scmp.ge.s32.totalorder %s6181_s29, 1 }
  0x10   : > { %p6275_p4 = por %p6265_p1, %p57_p0  ;;  %p222_p7 = scmp.lt.s32.totalorder %s6181_s29, 3 }
  0x11   : > { %p6280_p6 = por %p215_p3, %p57_p0  ;;  %s7930_s1 = sld [smem:[#allocation104_spill]] }
  0x12   : > { %p6288_p8 = pnand %p4738_p5, %p222_p7  ;;  %s6183_s17 = smov [#allocation6]  }
  0x13   : > { %s235_s18 = sshll.u32 %s6183_s17, 4  ;;  %p4742_p11 = scmp.ge.s32.totalorder %s6181_s29, 2  ;;  %s236_s18 = int_to_ptr.vmem [resolvable:$true] %s235_s18 }
  0x14   : > { %p5812_p9 = pneg %p6288_p8  ;;  %s7933_s3 = sld [smem:[#allocation105_spill]] }
  0x15   : > { %s7907_s23 = smov 64   ;;  %s7908_s30 = smov 4  }
  0x16   : > { %p6296_p10 = pnand %p5812_p9, %p6265_p1  ;;  %s6186_s8 = smov [#allocation8]  }
  0x17   : > { %s233_s15 = sshll.u32 %s7930_s1, 4  ;;  %s252_s13 = sshll.u32 %s6186_s8, 4  ;;  %s234_s15 = int_to_ptr.hbm [resolvable:$true] %s233_s15  ;;  %s253_s13 = int_to_ptr.vmem [resolvable:$true] %s252_s13 }
  0x18   : > { %5815 = dma.hbm_to_vmem [thread:$0]  (!%p6296_p10), %s234_s15, 1024, %s236_s18, [#allocation7], %s7907_s23, %s7907_s23, %s7908_s30  }
  0x19   : > { %s7934_s5 = sld [smem:[#allocation106_spill]]  ;;  %s6187_s21 = smov [#allocation9]  }
  0x1a   : > { %s250_s22 = sshll.u32 %s7933_s3, 4  ;;  %s269_s1 = sshll.u32 %s6187_s21, 4  ;;  %s251_s22 = int_to_ptr.hbm [resolvable:$true] %s250_s22  ;;  %s270_s1 = int_to_ptr.vmem [resolvable:$true] %s269_s1 }
  0x1b   : > { %5818 = dma.hbm_to_vmem [thread:$0]  (!%p6296_p10), %s251_s22, 9216, %s253_s13, [#allocation7], %s7907_s23, %s7907_s23, %s7908_s30  }
  0x1c   : > { %s37_s15 = sadd.s32 1, %s6177_s28  ;;  %s44_s18 = sadd.s32 1, %s6169_s26 }
  0x1d   : > { %p39_p12 = scmp.ge.s32.totalorder %s37_s15, 2  ;;  %p51_p13 = scmp.ne.s32.totalorder %s6169_s26, %s6165_s25 }
  0x1e   : > { %p52_p0 = scmp.eq.s32.totalorder %s6181_s29, 0  ;;  %p5833_p7 = scmp.lt.s32.totalorder %s6181_s29, 2 }
  0x1f   : > { %s267_s20 = sshll.u32 %s7934_s5, 4  ;;  %s8196_s15 = smov (%p39_p12, %s37_s15), 0  ;;  %s268_s20 = int_to_ptr.hbm [resolvable:$true] %s267_s20 }
  0x20   : > { %5821 = dma.hbm_to_vmem [thread:$0]  (!%p6296_p10), %s268_s20, 1024, %s270_s1, [#allocation10], %s7907_s23, %s7907_s23, %s7908_s30  }
  0x21   : > { %7935 = sst [smem:[#allocation17_spill]] %s8196_s15  ;;  %p6329_p3 = por %p52_p0, %p51_p13 }
  0x22   : > { %p6335_p5 = por %p6269_p2, %p51_p13  ;;  %s41_s8 = ssub.s32 %s6177_s28, %s8196_s15 }
  0x23   : > { %p42_p9 = scmp.eq.s32.totalorder %s41_s8, 0  ;;  %s286_s1 = sand.u32 1, %s6169_s26  }
  0x24   : > { %s4743_s13 = sshll.u32 %s286_s1, 7  ;;  %s5301_s17 = sshll.u32 %s6177_s28, 7 }
  0x25   : > { %s6344_s14 = scalar_select %p42_p9, %s6169_s26, %s44_s18  }
  0x26   : > { %s295_s23 = scalar_lea.hbm %s7899_s0, %s5301_s17  ;;  %s290_s30 = scalar_lea.vmem [#allocation3], %s4743_s13 }
  0x27   : > { %s298_s3 = sshll.u32 %s290_s30, 4  ;;  %s296_s10 = sshll.u32 %s295_s23, 4  ;;  %s299_s3 = int_to_ptr.vmem [resolvable:$true] %s298_s3  ;;  %s297_s10 = int_to_ptr.hbm [resolvable:$true] %s296_s10 }
  0x28   : > { %p5823_p2 = pnand %p5833_p7, %p6329_p3  ;;  %s287_s5 = scalar_lea.sflag [#allocation4], %s286_s1 }
  0x29   : > { %s7938_s15 = smov 4   ;;  %s7939_s29 = smov 64  }
  0x2a   : > { %5825 = dma.hbm_to_vmem [thread:$0]  (!%p5823_p2), %s297_s10, 2048, %s299_s3, %s287_s5, %s7939_s29, %s7939_s29, %s7938_s15  }
  0x2b   : > { %310 = sbr.rel (%p6288_p8) target bundleno = 1346 (0x542), region = 48 }
  0x30   : > { %s6358_s18 = sand.u32 1, %s6165_s25  }
  0x31   : > { %s4747_s23 = sshll.u32 %s6358_s18, 7  ;;  %s313_s30 = scalar_lea.sflag [#allocation4], %s6358_s18 }
  0x32   : > { %s6364_s22 = scalar_lea.vmem [#allocation3], %s4747_s23 }
  0x33   : > { %6135 = dma.done.wait (%p6275_p4), %s313_s30, 2048  }
  0x34   : > { %6137 = vsyncadd (%p6275_p4), %s313_s30, 4294965248 }
  0x35   : > { %6139 = dma.done.wait (%p6265_p1), [#allocation7], 10240  }
  0x36   : > { %6141 = vsyncadd (%p6265_p1), [#allocation7], 4294957056 }
  0x37   : > { %6143 = dma.done.wait (%p6265_p1), [#allocation10], 1024  }
  0x38   : > { %6145 = vsyncadd (%p6265_p1), [#allocation10], 4294966272  ;;  %v5325_v0 = vld [vmem:[#allocation6 + $0x38] sm:$0xff]  ;;  %v5324_v1 = vld [vmem:[#allocation6 + $0x30] sm:$0xff]  ;;  %v6188_v17 = vmov 0   ;;  %vm1097_vm1 = vcmask 1043456  }
  0x39   : > { %620 = vmatpush.bf16.msra.mxu0 %v5325_v0  ;;  %5772 = vmatpush.bf16.msra.mxu3 %v5325_v0  ;;  %v5323_v2 = vld [vmem:[#allocation6 + $0x28] sm:$0xff]  ;;  %v5322_v3 = vld [vmem:[#allocation6 + $0x20] sm:$0xff]  ;;  %v5321_v4 = vld [vmem:[#allocation6 + $0x18] sm:$0xff]  ;;  %373 = vst [vmem:[#allocation2 + $0xc] sm:$0xf] %v6188_v17  ;;  %vm1104_vm6 = vcmask 1040384  }
  0x3a   : > { %v5320_v5 = vld [vmem:[#allocation6 + $0x10] sm:$0xff]  ;;  %v5319_v6 = vld [vmem:[#allocation6 + $0x8] sm:$0xff]  ;;  %v5318_v7 = vld [vmem:[#allocation6] sm:$0xff]  ;;  %370 = vst [vmem:[#allocation2] sm:$0xf] %v6188_v17  ;;  %vm1818_vm9 = vcmask 1046528  }
  0x3b   : > { %v5302_v8 = vld [vmem:[%s6364_s22] sm:$0xff]  ;;  %v5303_v9 = vld [vmem:[%s6364_s22 + $0x8] sm:$0xff]  ;;  %v5304_v10 = vld [vmem:[%s6364_s22 + $0x10] sm:$0xff]  ;;  %371 = vst [vmem:[#allocation2 + $0x4] sm:$0xf] %v6188_v17  ;;  %s7756_s21 = scalar_lea.vmem [#allocation11], %s4747_s23 }
  0x3c   : > { %v5305_v11 = vld [vmem:[%s6364_s22 + $0x18] sm:$0xff]  ;;  %v5306_v12 = vld [vmem:[%s6364_s22 + $0x20] sm:$0xff]  ;;  %v5307_v13 = vld [vmem:[%s6364_s22 + $0x28] sm:$0xff]  ;;  %372 = vst [vmem:[#allocation2 + $0x8] sm:$0xf] %v6188_v17  ;;  %s5406_s10 = sshll.u32 %s6173_s27, 7 }
  0x3d   : > { %621 = vmatpush.bf16.msra.mxu0 %v5324_v1  ;;  %5773 = vmatpush.bf16.msra.mxu3 %v5324_v1  ;;  %v5333_v14 = vld [vmem:[#allocation8 + $0x38] sm:$0xff]  ;;  %v5332_v15 = vld [vmem:[#allocation8 + $0x30] sm:$0xff]  ;;  %v5331_v19 = vld [vmem:[#allocation8 + $0x28] sm:$0xff]  ;;  %374 = vst [vmem:[#allocation2 + $0x10] sm:$0xf] %v6188_v17  ;;  %s4607_s3 = scalar_lea.hbm %s7906_s7, %s5406_s10  ;;  %s4608_s5 = sshll.u32 %s7756_s21, 4  ;;  %s4609_s5 = int_to_ptr.vmem [resolvable:$true] %s4608_s5 }
  0x3e   : > { %3391 = vmatpush.bf16.msra.mxu1 %v5333_v14  ;;  %v6384_v16 = vld [vmem:[#allocation8 + $0x78] sm:$0xff]  ;;  %v6388_v18 = vld [vmem:[#allocation8 + $0x70] sm:$0xff]  ;;  %375 = vst [vmem:[#allocation2 + $0x14] sm:$0xf] %v6188_v17  ;;  %v5330_v20 = vld [vmem:[#allocation8 + $0x20] sm:$0xff]  ;;  %s4610_s29 = sshll.u32 %s4607_s3, 4  ;;  %s4611_s29 = int_to_ptr.hbm [resolvable:$true] %s4610_s29 }
  0x3f   : > { %3480 = vmatpush.bf16.msra.mxu2 %v6384_v16  ;;  %376 = vst [vmem:[#allocation2 + $0x18] sm:$0xf] %v6188_v17  ;;  %v5308_v21 = vld [vmem:[%s6364_s22 + $0x30] sm:$0xff]  ;;  %v6404_v22 = vld [vmem:[#allocation8 + $0x68] sm:$0xff]  ;;  %v5329_v23 = vld [vmem:[#allocation8 + $0x18] sm:$0xff]  ;;  %s4593_s27 = scalar_lea.sflag [#allocation5], %s6358_s18 }
  0x40   : > { %377 = vst [vmem:[#allocation2 + $0x1c] sm:$0xf] %v6188_v17  ;;  %v6411_v24 = vld [vmem:[#allocation8 + $0x60] sm:$0xff]  ;;  %v5328_v25 = vld [vmem:[#allocation8 + $0x10] sm:$0xff]  ;;  %v6419_v26 = vld [vmem:[#allocation8 + $0x58] sm:$0xff]  ;;  %s6102_s15 = scalar_lea.hbm %s7906_s7, 256 }
  0x41   : > { %622 = vmatpush.bf16.msra.mxu0 %v5323_v2  ;;  %5774 = vmatpush.bf16.msra.mxu3 %v5323_v2  ;;  %378 = vst [vmem:[#allocation2 + $0x20] sm:$0xf] %v6188_v17  ;;  %v5327_v27 = vld [vmem:[#allocation8 + $0x8] sm:$0xff]  ;;  %v6425_v28 = vld [vmem:[#allocation8 + $0x50] sm:$0xff]  ;;  %v5309_v29 = vld [vmem:[%s6364_s22 + $0x38] sm:$0xff] }
  0x42   : > { %3392 = vmatpush.bf16.msra.mxu1 %v5332_v15  ;;  %379 = vst [vmem:[#allocation2 + $0x24] sm:$0xf] %v6188_v17  ;;  %v5326_v30 = vld [vmem:[#allocation8] sm:$0xff]  ;;  %v6433_v32 = vld [vmem:[#allocation8 + $0x48] sm:$0xff]  ;;  %vm1561_vm0 = vsmask.f32 7424 }
  0x43   : > { %3481 = vmatpush.bf16.msra.mxu2 %v6388_v18  ;;  %380 = vst [vmem:[#allocation2 + $0x28] sm:$0xf] %v6188_v17  ;;  %v1249_v31 = vld [vmem:[#allocation2 + $0x8] sm:$0x1]  ;;  %v5408_v34 = vld [vmem:[#allocation2] sm:$0xff]   ;;  %v6442_v39 = vld [vmem:[#allocation8 + $0x40] sm:$0xff] }
  0x44   : > { %381 = vst [vmem:[#allocation2 + $0x2c] sm:$0xf] %v6188_v17  ;;  %v1529_v33 = vunpack.c.l.b16 %v1249_v31  ;;  %v1565_v35 = vshll.u32 %v5408_v34, 16  ;;  %v1563_v37 = vshrl.u32 %v5408_v34, 16  ;;  %v6457_v44 = vld [vmem:[%s7901_s2] ss:$0 sm:$0xff] }
  0x45   : > { %623 = vmatpush.bf16.msra.mxu0 %v5322_v3  ;;  %5775 = vmatpush.bf16.msra.mxu3 %v5322_v3  ;;  %382 = vst [vmem:[#allocation2 + $0x30] sm:$0xf] %v6188_v17  ;;  %v5310_v45 = vld [vmem:[%s6364_s22 + $0x40] sm:$0xff]  ;;  %v5357_v49 = vld [vmem:[#allocation8 + $0xf8] sm:$0xff]  ;;  %vm1098_vm2 = vsmask.f32 7938 }
  0x46   : > { %3393 = vmatpush.bf16.msra.mxu1 %v5331_v19  ;;  %383 = vst [vmem:[#allocation2 + $0x34] sm:$0xf] %v6188_v17  ;;  %v6438_v36 = vpack.c.b16 %v1529_v33, %v1529_v33  ;;  %v1567_v38 = vrot.slane %v1565_v35, 1  ;;  %v5356_v52 = vld [vmem:[#allocation8 + $0xf0] sm:$0xff]  ;;  %vm6475_vm3 = vmand %vm1097_vm1, %vm1098_vm2  ;;  %v5314_v59 = vld [vmem:[%s6364_s22 + $0x60] sm:$0xff] }
  0x47   : > { %384 = vst [vmem:[#allocation2 + $0x38] sm:$0xf] %v6188_v17  ;;  %3482 = vmatpush.bf16.msra.mxu2 %v6404_v22  ;;  %v1100_v58 = vld [vmem:[#allocation2 + $0xc] sm:$0xf]  ;;  %v5355_v62 = vld [vmem:[#allocation8 + $0xe8] sm:$0xff]  ;;  %v5354_v3 = vld [vmem:[#allocation8 + $0xe0] sm:$0xff] }
  0x48   : > { %385 = vst [vmem:[#allocation2 + $0x3c] sm:$0xf] %v6188_v17  ;;  %v1570_v40 = vshll.u32 %v6438_v36, 16  ;;  %v1568_v41 = vor.u32 %v1567_v38, %v1563_v37  ;;  %vm773_vm4 = vsmask.f32 256  ;;  %v5311_v2 = vld [vmem:[%s6364_s22 + $0x48] sm:$0xff] }
  0x49   : > { %624 = vmatpush.bf16.msra.mxu0 %v5321_v4  ;;  %5776 = vmatpush.bf16.msra.mxu3 %v5321_v4  ;;  %386 = vst [vmem:[#allocation2 + $0x40] sm:$0xf] %v6188_v17  ;;  %vm774_vm5 = vsmask.f32 4368  ;;  %vm6491_vm8 = vmand %vm1104_vm6, %vm773_vm4 }
  0x4a   : > { %3394 = vmatpush.bf16.msra.mxu1 %v5330_v20  ;;  %387 = vst [vmem:[#allocation2 + $0x44] sm:$0xf] %v6188_v17  ;;  %v1572_v42 = vrot.slane %v1570_v40, 1  ;;  %vm6485_vm7 = vmor %vm773_vm4, %vm774_vm5 }
  0x4b   : > { %388 = vst [vmem:[#allocation2 + $0x48] sm:$0xf] %v6188_v17  ;;  %3483 = vmatpush.bf16.msra.mxu2 %v6411_v24 }
  0x4c   : > { %389 = vst [vmem:[#allocation2 + $0x4c] sm:$0xf] %v6188_v17  ;;  %v1573_v43 = vsel %vm1561_vm0, %v1568_v41, %v1572_v42 }
  0x4d   : > { %625 = vmatpush.bf16.msra.mxu0 %v5320_v5  ;;  %5777 = vmatpush.bf16.msra.mxu3 %v5320_v5  ;;  %390 = vst [vmem:[#allocation2 + $0x50] sm:$0xf] %v6188_v17 }
  0x4e   : > { %3395 = vmatpush.bf16.msra.mxu1 %v5329_v23  ;;  %391 = vst [vmem:[#allocation2 + $0x54] sm:$0xf] %v6188_v17 }
  0x4f   : > { %392 = vst [vmem:[#allocation2 + $0x58] sm:$0xf] %v6188_v17  ;;  %3484 = vmatpush.bf16.msra.mxu2 %v6419_v26 }
  0x50   : > { %393 = vst [vmem:[#allocation2 + $0x5c] sm:$0xf] %v6188_v17 }
  0x51   : > { %626 = vmatpush.bf16.msra.mxu0 %v5319_v6  ;;  %5778 = vmatpush.bf16.msra.mxu3 %v5319_v6  ;;  %394 = vst [vmem:[#allocation2 + $0x60] sm:$0xf] %v6188_v17 }
  0x52   : > { %3396 = vmatpush.bf16.msra.mxu1 %v5328_v25  ;;  %395 = vst [vmem:[#allocation2 + $0x64] sm:$0xf] %v6188_v17 }
  0x53   : > { %396 = vst [vmem:[#allocation2 + $0x68] sm:$0xf] %v6188_v17  ;;  %3485 = vmatpush.bf16.msra.mxu2 %v6425_v28 }
  0x54   : > { %397 = vst [vmem:[#allocation2 + $0x6c] sm:$0xf] %v6188_v17 }
  0x55   : > { %627 = vmatpush.bf16.msra.mxu0 %v5318_v7  ;;  %5779 = vmatpush.bf16.msra.mxu3 %v5318_v7  ;;  %398 = vst [vmem:[#allocation2 + $0x70] sm:$0xf] %v6188_v17 }
  0x56   : > { %3397 = vmatpush.bf16.msra.mxu1 %v5327_v27  ;;  %399 = vst [vmem:[#allocation2 + $0x74] sm:$0xf] %v6188_v17 }
  0x57   : > { %400 = vst [vmem:[#allocation2 + $0x78] sm:$0xf] %v6188_v17  ;;  %3486 = vmatpush.bf16.msra.mxu2 %v6433_v32 }
  0x58   : > { %628 = vmatmul.bf16.vlgmr.msra.gmra.mxu0 %v5302_v8  ;;  %401 = vst [vmem:[#allocation2 + $0x7c] sm:$0xf] %v6188_v17  ;;  %688 = vmatmul.bf16.vlgmr.msra.gmra.mxu3 %v5314_v59 }
  0x59   : > { %5780 = vmatpush.bf16.msrb.mxu3 %v5333_v14  ;;  %402 = vst [vmem:[#allocation2 + $0x80] sm:$0xf] %v6188_v17  ;;  %3658 = vmatpush.bf16.msrb.mxu0 %v5357_v49 }
  0x5a   : > { %3398 = vmatpush.bf16.msra.mxu1 %v5326_v30  ;;  %403 = vst [vmem:[#allocation2 + $0x84] sm:$0xf] %v6188_v17 }
  0x5b   : > { %404 = vst [vmem:[#allocation2 + $0x88] sm:$0xf] %v6188_v17  ;;  %3487 = vmatpush.bf16.msra.mxu2 %v6442_v39 }
  0x5c   : > { %405 = vst [vmem:[#allocation2 + $0x8c] sm:$0xf] %v6188_v17 }
  0x5d   : > { %5781 = vmatpush.bf16.msrb.mxu3 %v5332_v15  ;;  %3399 = vmatmul.bf16.vlgmr.msra.gmra.mxu1 %v5408_v34  ;;  %406 = vst [vmem:[#allocation2 + $0x90] sm:$0xf] %v6188_v17  ;;  %v5353_v15 = vld [vmem:[#allocation8 + $0xd8] sm:$0xff]  ;;  %v5351_v34 = vld [vmem:[#allocation8 + $0xc8] sm:$0xff] }
  0x5e   : > { %407 = vst [vmem:[#allocation2 + $0x94] sm:$0xf] %v6188_v17  ;;  %3488 = vmatmul.bf16.vlgmr.msra.gmra.mxu2 %v1573_v43  ;;  %3659 = vmatpush.bf16.msrb.mxu0 %v5356_v52  ;;  %v5350_v43 = vld [vmem:[#allocation8 + $0xc0] sm:$0xff] }
  0x5f   : > { %408 = vst [vmem:[#allocation2 + $0x98] sm:$0xf] %v6188_v17 }
  0x60   : > { %409 = vst [vmem:[#allocation2 + $0x9c] sm:$0xf] %v6188_v17 }
  0x61   : > { %5782 = vmatpush.bf16.msrb.mxu3 %v5331_v19  ;;  %410 = vst [vmem:[#allocation2 + $0xa0] sm:$0xf] %v6188_v17 }
  0x62   : > { %411 = vst [vmem:[#allocation2 + $0xa4] sm:$0xf] %v6188_v17  ;;  %3660 = vmatpush.bf16.msrb.mxu0 %v5355_v62 }
  0x63   : > { %412 = vst [vmem:[#allocation2 + $0xa8] sm:$0xf] %v6188_v17 }
  0x64   : > { %413 = vst [vmem:[#allocation2 + $0xac] sm:$0xf] %v6188_v17 }
  0x65   : > { %5783 = vmatpush.bf16.msrb.mxu3 %v5330_v20  ;;  %414 = vst [vmem:[#allocation2 + $0xb0] sm:$0xf] %v6188_v17  ;;  %v5352_v20 = vld [vmem:[#allocation8 + $0xd0] sm:$0xff] }
  0x66   : > { %415 = vst [vmem:[#allocation2 + $0xb4] sm:$0xf] %v6188_v17  ;;  %3661 = vmatpush.bf16.msrb.mxu0 %v5354_v3 }
  0x67   : > { %416 = vst [vmem:[#allocation2 + $0xb8] sm:$0xf] %v6188_v17 }
  0x68   : > { %633 = vmatmul.bf16.gmra.mxu0 %v5303_v9  ;;  %417 = vst [vmem:[#allocation2 + $0xbc] sm:$0xf] %v6188_v17 }
  0x69   : > { %5784 = vmatpush.bf16.msrb.mxu3 %v5329_v23  ;;  %418 = vst [vmem:[#allocation2 + $0xc0] sm:$0xf] %v6188_v17 }
  0x6a   : > { %419 = vst [vmem:[#allocation2 + $0xc4] sm:$0xf] %v6188_v17  ;;  %3662 = vmatpush.bf16.msrb.mxu0 %v5353_v15 }
  0x6b   : > { %420 = vst [vmem:[#allocation2 + $0xc8] sm:$0xf] %v6188_v17 }
  0x6c   : > { %421 = vst [vmem:[#allocation2 + $0xcc] sm:$0xf] %v6188_v17 }
  0x6d   : > { %5785 = vmatpush.bf16.msrb.mxu3 %v5328_v25  ;;  %422 = vst [vmem:[#allocation2 + $0xd0] sm:$0xf] %v6188_v17 }
  0x6e   : > { %423 = vst [vmem:[#allocation2 + $0xd4] sm:$0xf] %v6188_v17  ;;  %3663 = vmatpush.bf16.msrb.mxu0 %v5352_v20  ;;  %v5313_v20 = vld [vmem:[%s6364_s22 + $0x58] sm:$0xff] }
  0x71   : > { %5786 = vmatpush.bf16.msrb.mxu3 %v5327_v27 }
  0x72   : > { %3664 = vmatpush.bf16.msrb.mxu0 %v5351_v34 }
  0x75   : > { %5787 = vmatpush.bf16.msrb.mxu3 %v5326_v30  ;;  %v5315_v30 = vld [vmem:[%s6364_s22 + $0x68] sm:$0xff] }
  0x76   : > { %693 = vmatmul.bf16.gmra.mxu3 %v5315_v30  ;;  %3665 = vmatpush.bf16.msrb.mxu0 %v5350_v43 }
  0x78   : > { %638 = vmatmul.bf16.gmra.mxu0 %v5304_v10  ;;  %v1106_v10 = vld [vmem:[#allocation2 + $0x14] sm:$0x1] }
  0x79   : > { %5788 = vmatpush.bf16.msra.mxu3 %v6384_v16 }
  0x7d   : > { %5789 = vmatpush.bf16.msra.mxu3 %v6388_v18 }
  0x81   : > { %5790 = vmatpush.bf16.msra.mxu3 %v6404_v22 }
  0x85   : > { %5791 = vmatpush.bf16.msra.mxu3 %v6411_v24  ;;  %v5312_v24 = vld [vmem:[%s6364_s22 + $0x50] sm:$0xff] }
  0x88   : > { %643 = vmatmul.bf16.gmra.mxu0 %v5305_v11 }
  0x89   : > { %5792 = vmatpush.bf16.msra.mxu3 %v6419_v26 }
  0x8d   : > { %5793 = vmatpush.bf16.msra.mxu3 %v6425_v28 }
  0x91   : > { %5794 = vmatpush.bf16.msra.mxu3 %v6433_v32  ;;  %v1116_v32 = vld [vmem:[#allocation2 + $0x24] sm:$0xf] }
  0x95   : > { %5795 = vmatpush.bf16.msra.mxu3 %v6442_v39 }
  0x98   : > { %648 = vmatmul.bf16.gmra.mxu0 %v5306_v12 }
  0xa8   : > { %653 = vmatmul.bf16.gmra.mxu0 %v5307_v13 }
  0xb8   : > { %658 = vmatmul.bf16.gmra.mxu0 %v5308_v21 }
  0xc8   : > { %663 = vmatmul.bf16.gmra.mxu0 %v5309_v29  ;;  %v1109_v29 = vld [vmem:[#allocation2 + $0x18] sm:$0xf] }
  0xd5   : > { %v629_v46 = vpop.f32.mrf.mxu0 }
  0xd6   : > { %v630_v47 = vadd.f32 %v6457_v44, %v629_v46 }
  0xd8   : > { %v709_v48 = vmax.f32 %v630_v47, 0.0  ;;  %668 = vmatmul.bf16.gmra.mxu0 %v5310_v45 }
  0xda   : > { %v741_v50 = vpack.c.bf16 %v709_v48, %v709_v48 }
  0xdc   : > { %v777_v51 = vshrl.u32 %v741_v50, 16  ;;  %v780_v55 = vshll.u32 %v741_v50, 16 }
  0xdd   : > { %v631_v53 = vpop.f32.mrf.mxu0 }
  0xde   : > { %v779_v54 = vrot.slane %v777_v51, 7  ;;  %v632_v56 = vadd.f32 %v6457_v44, %v631_v53  ;;  %v1113_v51 = vld [vmem:[#allocation2 + $0x20] sm:$0x1] }
  0xe0   : > { %v782_v60 = vor.u32 %v780_v55, %v779_v54  ;;  %v710_v61 = vmax.f32 %v632_v56, 0.0  ;;  %v783_v11 = vrot.slane %v779_v54, 4 }
  0xe2   : > { %v1101_v63 = vsel %vm6475_vm3, %v782_v60, %v1100_v58  ;;  %v742_v0 = vpack.c.bf16 %v710_v61, %v710_v61 }
  0xe3   : > { %1102 = vst [vmem:[#allocation2 + $0xc] sm:$0xf] %v1101_v63 }
  0xe4   : > { %v785_v1 = vshrl.u32 %v742_v0, 16  ;;  %v788_v7 = vshll.u32 %v742_v0, 16 }
  0xe5   : > { %v634_v4 = vpop.f32.mrf.mxu0 }
  0xe6   : > { %v787_v6 = vrot.slane %v785_v1, 7  ;;  %v635_v8 = vadd.f32 %v6457_v44, %v634_v4 }
  0xe8   : > { %v790_v12 = vor.u32 %v788_v7, %v787_v6  ;;  %v792_v13 = vrot.slane %v787_v6, 4  ;;  %v711_v14 = vmax.f32 %v635_v8, 0.0  ;;  %673 = vmatmul.bf16.gmra.mxu0 %v5311_v2 }
  0xea   : > { %v791_v16 = vsel %vm6485_vm7, %v783_v11, %v790_v12  ;;  %v1107_v17 = vsel %vm6491_vm8, %v792_v13, %v1106_v10  ;;  %v743_v19 = vpack.c.bf16 %v711_v14, %v711_v14  ;;  %v5906_v56 = vld [vmem:[#allocation2 + $0xc] sm:$0xe] }
  0xeb   : > { %1103 = vst [vmem:[#allocation2 + $0x10] sm:$0xf] %v791_v16  ;;  %v5316_v13 = vld [vmem:[%s6364_s22 + $0x70] sm:$0xff] }
  0xec   : > { %1108 = vst [vmem:[#allocation2 + $0x14] sm:$0x1] %v1107_v17  ;;  %v794_v18 = vshrl.u32 %v743_v19, 16  ;;  %v797_v25 = vshll.u32 %v743_v19, 16  ;;  %698 = vmatmul.bf16.gmra.mxu3 %v5316_v13 }
  0xed   : > { %v636_v21 = vpop.f32.mrf.mxu0 }
  0xee   : > { %v796_v23 = vrot.slane %v794_v18, 7  ;;  %v637_v27 = vadd.f32 %v6457_v44, %v636_v21 }
  0xf0   : > { %v799_v31 = vor.u32 %v797_v25, %v796_v23  ;;  %v712_v33 = vmax.f32 %v637_v27, 0.0  ;;  %v800_v50 = vrot.slane %v796_v23, 4 }
  0xf2   : > { %v1110_v22 = vsel %vm6475_vm3, %v799_v31, %v1109_v29  ;;  %v744_v35 = vpack.c.bf16 %v712_v33, %v712_v33  ;;  %v1219_v37 = vld [vmem:[#allocation2 + $0xc] sm:$0xff]  }
  0xf3   : > { %v5905_v38 = vld [vmem:[#allocation2 + $0xc] sm:$0xf0]  ;;  %1111 = vst [vmem:[#allocation2 + $0x18] sm:$0xf] %v1110_v22  ;;  %v1250_v40 = vld [vmem:[#allocation2 + $0x14] sm:$0x1]  ;;  %3404 = vmatmul.bf16.gmra.mxu1 %v1219_v37 }
  0xf4   : > { %v802_v41 = vshrl.u32 %v744_v35, 16  ;;  %v1530_v42 = vunpack.c.l.b16 %v1250_v40  ;;  %v805_v47 = vshll.u32 %v744_v35, 16  ;;  %v1577_v52 = vshll.u32 %v1219_v37, 16  ;;  %v1120_v33 = vld [vmem:[#allocation2 + $0x2c] sm:$0x1] }
  0xf5   : > { %v639_v45 = vpop.f32.mrf.mxu0  ;;  %v1575_v58 = vshrl.u32 %v1219_v37, 16  ;;  %v5907_v3 = vor.u32 %v5906_v56, %v5905_v38 }
  0xf6   : > { %v804_v46 = vrot.slane %v802_v41, 7  ;;  %v640_v48 = vadd.f32 %v6457_v44, %v639_v45  ;;  %v1546_v49 = vpack.c.b16 %v1530_v42, %v1530_v42  ;;  %v1579_v59 = vrot.slane %v1577_v52, 1  ;;  %v6542_v52 = vld [vmem:[#allocation2 + $0xc] sm:$0xff]  }
  0xf7   : > { %v1822_v8 = vrot.slane %v5907_v3, 1 }
  0xf8   : > { %v807_v26 = vor.u32 %v805_v47, %v804_v46  ;;  %v809_v53 = vrot.slane %v804_v46, 4  ;;  %v713_v54 = vmax.f32 %v640_v48, 0.0  ;;  %678 = vmatmul.bf16.gmra.mxu0 %v5312_v24  ;;  %v1582_v55 = vshll.u32 %v1546_v49, 16 }
  0xf9   : > { %v1580_v28 = vor.u32 %v1579_v59, %v1575_v58  ;;  %v1823_v10 = vrot.slane %v1546_v49, 1 }
  0xfa   : > { %v808_v60 = vsel %vm6485_vm7, %v800_v50, %v807_v26  ;;  %v1114_v61 = vsel %vm6491_vm8, %v809_v53, %v1113_v51  ;;  %v745_v62 = vpack.c.bf16 %v713_v54, %v713_v54  ;;  %v1584_v63 = vrot.slane %v1582_v55, 1  ;;  %v6544_v26 = vld [vmem:[#allocation2 + $0xc] sm:$0xf0] }
  0xfb   : > { %1112 = vst [vmem:[#allocation2 + $0x1c] sm:$0xf] %v808_v60  ;;  %v6519_v14 = vsel %vm1818_vm9, %v1822_v8, %v1823_v10  ;;  %v1123_v53 = vld [vmem:[#allocation2 + $0x30] sm:$0xf] }
  0xfc   : > { %1115 = vst [vmem:[#allocation2 + $0x20] sm:$0x1] %v1114_v61  ;;  %v811_v0 = vshrl.u32 %v745_v62, 16  ;;  %v1585_v2 = vsel %vm1561_vm0, %v1580_v28, %v1584_v63  ;;  %v814_v6 = vshll.u32 %v745_v62, 16 }
  0xfd   : > { %v641_v1 = vpop.f32.mrf.mxu0  ;;  %3493 = vmatmul.bf16.gmra.mxu2 %v1585_v2 }
  0xfe   : > { %v813_v4 = vrot.slane %v811_v0, 7  ;;  %v642_v7 = vadd.f32 %v6457_v44, %v641_v1 }
 0x100   : > { %v816_v11 = vor.u32 %v814_v6, %v813_v4  ;;  %v714_v12 = vmax.f32 %v642_v7, 0.0  ;;  %v817_v31 = vrot.slane %v813_v4, 4  ;;  %v1127_v6 = vld [vmem:[#allocation2 + $0x38] sm:$0x1] }
 0x102   : > { %v1117_v15 = vsel %vm6475_vm3, %v816_v11, %v1116_v32  ;;  %v746_v16 = vpack.c.bf16 %v714_v12, %v714_v12  ;;  %v6523_v17 = vld [vmem:[#allocation2 + $0x18] sm:$0xff]  }
 0x103   : > { %1118 = vst [vmem:[#allocation2 + $0x24] sm:$0xf] %v1117_v15  ;;  %v1589_v19 = vshll.u32 %v6523_v17, 16  ;;  %v1251_v39 = vld [vmem:[#allocation2 + $0x20] sm:$0x1]  ;;  %3409 = vmatmul.bf16.gmra.mxu1 %v6523_v17  ;;  %v1587_v40 = vshrl.u32 %v6523_v17, 16 }
 0x104   : > { %v819_v18 = vshrl.u32 %v746_v16, 16  ;;  %v1531_v21 = vunpack.c.l.b16 %v1251_v39  ;;  %v822_v27 = vshll.u32 %v746_v16, 16 }
 0x105   : > { %v644_v23 = vpop.f32.mrf.mxu0  ;;  %v1591_v34 = vrot.slane %v1589_v19, 1 }
 0x106   : > { %v821_v25 = vrot.slane %v819_v18, 7  ;;  %v645_v29 = vadd.f32 %v6457_v44, %v644_v23  ;;  %v6528_v30 = vpack.c.b16 %v1531_v21, %v1531_v21 }
 0x107   : > { %v6537_v45 = vor.u32 %v1591_v34, %v1587_v40 }
 0x108   : > { %v824_v22 = vor.u32 %v822_v27, %v821_v25  ;;  %v826_v35 = vrot.slane %v821_v25, 4  ;;  %v715_v37 = vmax.f32 %v645_v29, 0.0  ;;  %683 = vmatmul.bf16.gmra.mxu0 %v5313_v20  ;;  %v1594_v38 = vshll.u32 %v6528_v30, 16 }
 0x10a   : > { %v825_v41 = vsel %vm6485_vm7, %v817_v31, %v824_v22  ;;  %v1121_v24 = vsel %vm6491_vm8, %v826_v35, %v1120_v33  ;;  %v747_v42 = vpack.c.bf16 %v715_v37, %v715_v37  ;;  %v1596_v43 = vrot.slane %v1594_v38, 1  ;;  %v5909_v39 = vld [vmem:[#allocation2 + $0x24] sm:$0xe]  ;;  %v1130_v33 = vld [vmem:[#allocation2 + $0x3c] sm:$0xf] }
 0x10b   : > { %1119 = vst [vmem:[#allocation2 + $0x28] sm:$0xf] %v825_v41 }
 0x10c   : > { %1122 = vst [vmem:[#allocation2 + $0x2c] sm:$0x1] %v1121_v24  ;;  %v828_v46 = vshrl.u32 %v747_v42, 16  ;;  %v1597_v48 = vsel %vm1561_vm0, %v6537_v45, %v1596_v43  ;;  %v831_v50 = vshll.u32 %v747_v42, 16 }
 0x10d   : > { %v646_v47 = vpop.f32.mrf.mxu0  ;;  %3498 = vmatmul.bf16.gmra.mxu2 %v1597_v48 }
 0x10e   : > { %v830_v49 = vrot.slane %v828_v46, 7  ;;  %v647_v51 = vadd.f32 %v6457_v44, %v646_v47 }
 0x110   : > { %v833_v54 = vor.u32 %v831_v50, %v830_v49  ;;  %v716_v55 = vmax.f32 %v647_v51, 0.0  ;;  %v834_v4 = vrot.slane %v830_v49, 4 }
 0x112   : > { %v1124_v56 = vsel %vm6475_vm3, %v833_v54, %v1123_v53  ;;  %v748_v58 = vpack.c.bf16 %v716_v55, %v716_v55  ;;  %v1223_v59 = vld [vmem:[#allocation2 + $0x24] sm:$0xff]  }
 0x113   : > { %v5908_v60 = vld [vmem:[#allocation2 + $0x24] sm:$0xf0]  ;;  %1125 = vst [vmem:[#allocation2 + $0x30] sm:$0xf] %v1124_v56  ;;  %v1252_v61 = vld [vmem:[#allocation2 + $0x2c] sm:$0x1]  ;;  %3414 = vmatmul.bf16.gmra.mxu1 %v1223_v59 }
 0x114   : > { %v836_v62 = vshrl.u32 %v748_v58, 16  ;;  %v1532_v28 = vunpack.c.l.b16 %v1252_v61  ;;  %v839_v1 = vshll.u32 %v748_v58, 16  ;;  %v1601_v7 = vshll.u32 %v1223_v59, 16  ;;  %v1134_v56 = vld [vmem:[#allocation2 + $0x44] sm:$0x1] }
 0x115   : > { %v649_v63 = vpop.f32.mrf.mxu0  ;;  %v1599_v12 = vshrl.u32 %v1223_v59, 16  ;;  %v5910_v34 = vor.u32 %v5909_v39, %v5908_v60 }
 0x116   : > { %v838_v0 = vrot.slane %v836_v62, 7  ;;  %v650_v2 = vadd.f32 %v6457_v44, %v649_v63  ;;  %v1548_v3 = vpack.c.b16 %v1532_v28, %v1532_v28  ;;  %v1603_v13 = vrot.slane %v1601_v7, 1 }
 0x117   : > { %v1828_v38 = vrot.slane %v5910_v34, 1 }
 0x118   : > { %v841_v32 = vor.u32 %v839_v1, %v838_v0  ;;  %v843_v8 = vrot.slane %v838_v0, 4  ;;  %v717_v10 = vmax.f32 %v650_v2, 0.0  ;;  %3666 = vmatmul.bf16.vlgmr.msrb.gmra.mxu0 %v6542_v52  ;;  %v1606_v11 = vshll.u32 %v1548_v3, 16 }
 0x119   : > { %v1604_v18 = vor.u32 %v1603_v13, %v1599_v12  ;;  %v1829_v22 = vrot.slane %v1548_v3, 1  ;;  %v1137_v12 = vld [vmem:[#allocation2 + $0x48] sm:$0xf] }
 0x11a   : > { %v842_v15 = vsel %vm6485_vm7, %v834_v4, %v841_v32  ;;  %v1128_v16 = vsel %vm6491_vm8, %v843_v8, %v1127_v6  ;;  %v749_v19 = vpack.c.bf16 %v717_v10, %v717_v10  ;;  %v1608_v20 = vrot.slane %v1606_v11, 1  ;;  %v6580_v10 = vld [vmem:[#allocation2 + $0x24] sm:$0xff]  }
 0x11b   : > { %1126 = vst [vmem:[#allocation2 + $0x34] sm:$0xf] %v842_v15  ;;  %v6562_v46 = vsel %vm1818_vm9, %v1828_v38, %v1829_v22  ;;  %v6582_v11 = vld [vmem:[#allocation2 + $0x24] sm:$0xf0]  ;;  %v1141_v22 = vld [vmem:[#allocation2 + $0x50] sm:$0x1] }
 0x11c   : > { %1129 = vst [vmem:[#allocation2 + $0x38] sm:$0x1] %v1128_v16  ;;  %v845_v21 = vshrl.u32 %v749_v19, 16  ;;  %v1609_v25 = vsel %vm1561_vm0, %v1604_v18, %v1608_v20  ;;  %v848_v29 = vshll.u32 %v749_v19, 16 }
 0x11d   : > { %v651_v23 = vpop.f32.mrf.mxu0  ;;  %3503 = vmatmul.bf16.gmra.mxu2 %v1609_v25 }
 0x11e   : > { %v847_v27 = vrot.slane %v845_v21, 7  ;;  %v652_v31 = vadd.f32 %v6457_v44, %v651_v23 }
 0x120   : > { %v850_v35 = vor.u32 %v848_v29, %v847_v27  ;;  %v718_v37 = vmax.f32 %v652_v31, 0.0  ;;  %v851_v55 = vrot.slane %v847_v27, 4 }
 0x122   : > { %v1131_v40 = vsel %vm6475_vm3, %v850_v35, %v1130_v33  ;;  %v750_v41 = vpack.c.bf16 %v718_v37, %v718_v37  ;;  %v6558_v24 = vld [vmem:[#allocation2 + $0x30] sm:$0xff]  }
 0x123   : > { %1132 = vst [vmem:[#allocation2 + $0x3c] sm:$0xf] %v1131_v40  ;;  %v1613_v42 = vshll.u32 %v6558_v24, 16  ;;  %v1253_v43 = vld [vmem:[#allocation2 + $0x38] sm:$0x1]  ;;  %3419 = vmatmul.bf16.gmra.mxu1 %v6558_v24  ;;  %v1611_v28 = vshrl.u32 %v6558_v24, 16 }
 0x124   : > { %v853_v47 = vshrl.u32 %v750_v41, 16  ;;  %v1533_v48 = vunpack.c.l.b16 %v1253_v43  ;;  %v856_v51 = vshll.u32 %v750_v41, 16 }
 0x125   : > { %v654_v49 = vpop.f32.mrf.mxu0  ;;  %v1615_v58 = vrot.slane %v1613_v42, 1 }
 0x126   : > { %v855_v50 = vrot.slane %v853_v47, 7  ;;  %v655_v53 = vadd.f32 %v6457_v44, %v654_v49  ;;  %v6565_v54 = vpack.c.b16 %v1533_v48, %v1533_v48 }
 0x127   : > { %v6575_v3 = vor.u32 %v1615_v58, %v1611_v28 }
 0x128   : > { %v858_v59 = vor.u32 %v856_v51, %v855_v50  ;;  %v860_v60 = vrot.slane %v855_v50, 4  ;;  %v719_v61 = vmax.f32 %v655_v53, 0.0  ;;  %3671 = vmatmul.bf16.gmra.mxu0 %v6523_v17  ;;  %v1618_v62 = vshll.u32 %v6565_v54, 16 }
 0x12a   : > { %v859_v63 = vsel %vm6485_vm7, %v851_v55, %v858_v59  ;;  %v1135_v0 = vsel %vm6491_vm8, %v860_v60, %v1134_v56  ;;  %v751_v1 = vpack.c.bf16 %v719_v61, %v719_v61  ;;  %v1620_v2 = vrot.slane %v1618_v62, 1  ;;  %v5912_v61 = vld [vmem:[#allocation2 + $0x3c] sm:$0xe]  ;;  %v1144_v62 = vld [vmem:[#allocation2 + $0x54] sm:$0xf] }
 0x12b   : > { %1133 = vst [vmem:[#allocation2 + $0x40] sm:$0xf] %v859_v63 }
 0x12c   : > { %1136 = vst [vmem:[#allocation2 + $0x44] sm:$0x1] %v1135_v0  ;;  %v862_v4 = vshrl.u32 %v751_v1, 16  ;;  %v1621_v17 = vsel %vm1561_vm0, %v6575_v3, %v1620_v2  ;;  %v865_v32 = vshll.u32 %v751_v1, 16 }
 0x12d   : > { %v656_v6 = vpop.f32.mrf.mxu0  ;;  %3508 = vmatmul.bf16.gmra.mxu2 %v1621_v17 }
 0x12e   : > { %v864_v7 = vrot.slane %v862_v4, 7  ;;  %v657_v8 = vadd.f32 %v6457_v44, %v656_v6 }
 0x130   : > { %v867_v13 = vor.u32 %v865_v32, %v864_v7  ;;  %v720_v15 = vmax.f32 %v657_v8, 0.0  ;;  %v868_v34 = vrot.slane %v864_v7, 4 }
 0x132   : > { %v1138_v16 = vsel %vm6475_vm3, %v867_v13, %v1137_v12  ;;  %v752_v19 = vpack.c.bf16 %v720_v15, %v720_v15  ;;  %v1227_v39 = vld [vmem:[#allocation2 + $0x3c] sm:$0xff]  }
 0x133   : > { %v5911_v18 = vld [vmem:[#allocation2 + $0x3c] sm:$0xf0]  ;;  %1139 = vst [vmem:[#allocation2 + $0x48] sm:$0xf] %v1138_v16  ;;  %v1254_v20 = vld [vmem:[#allocation2 + $0x44] sm:$0x1]  ;;  %3424 = vmatmul.bf16.gmra.mxu1 %v1227_v39 }
 0x134   : > { %v870_v21 = vshrl.u32 %v752_v19, 16  ;;  %v1534_v23 = vunpack.c.l.b16 %v1254_v20  ;;  %v873_v29 = vshll.u32 %v752_v19, 16  ;;  %v1625_v35 = vshll.u32 %v1227_v39, 16 }
 0x135   : > { %v659_v25 = vpop.f32.mrf.mxu0  ;;  %v1623_v42 = vshrl.u32 %v1227_v39, 16  ;;  %v5913_v17 = vor.u32 %v5912_v61, %v5911_v18  ;;  %v5317_v39 = vld [vmem:[%s6364_s22 + $0x78] sm:$0xff] }
 0x136   : > { %v872_v27 = vrot.slane %v870_v21, 7  ;;  %v660_v31 = vadd.f32 %v6457_v44, %v659_v25  ;;  %v1550_v33 = vpack.c.b16 %v1534_v23, %v1534_v23  ;;  %v1627_v43 = vrot.slane %v1625_v35, 1  ;;  %v1148_v21 = vld [vmem:[#allocation2 + $0x5c] sm:$0x1]  ;;  %703 = vmatmul.bf16.gmra.mxu3 %v5317_v39 }
 0x137   : > { %v1834_v25 = vrot.slane %v5913_v17, 1 }
 0x138   : > { %v875_v37 = vor.u32 %v873_v29, %v872_v27  ;;  %v877_v38 = vrot.slane %v872_v27, 4  ;;  %v721_v40 = vmax.f32 %v660_v31, 0.0  ;;  %3676 = vmatmul.bf16.gmra.mxu0 %v6580_v10  ;;  %v1630_v41 = vshll.u32 %v1550_v33, 16 }
 0x139   : > { %v1628_v50 = vor.u32 %v1627_v43, %v1623_v42  ;;  %v1835_v12 = vrot.slane %v1550_v33, 1 }
 0x13a   : > { %v876_v47 = vsel %vm6485_vm7, %v868_v34, %v875_v37  ;;  %v1142_v48 = vsel %vm6491_vm8, %v877_v38, %v1141_v22  ;;  %v753_v49 = vpack.c.bf16 %v721_v40, %v721_v40  ;;  %v1632_v51 = vrot.slane %v1630_v41, 1 }
 0x13b   : > { %1140 = vst [vmem:[#allocation2 + $0x4c] sm:$0xf] %v876_v47  ;;  %v6608_v34 = vsel %vm1818_vm9, %v1834_v25, %v1835_v12 }
 0x13c   : > { %1143 = vst [vmem:[#allocation2 + $0x50] sm:$0x1] %v1142_v48  ;;  %v879_v53 = vshrl.u32 %v753_v49, 16  ;;  %v1633_v56 = vsel %vm1561_vm0, %v1628_v50, %v1632_v51  ;;  %v882_v59 = vshll.u32 %v753_v49, 16  ;;  %v6619_v49 = vld [vmem:[#allocation2 + $0x3c] sm:$0xff]  }
 0x13d   : > { %v661_v55 = vpop.f32.mrf.mxu0  ;;  %3513 = vmatmul.bf16.gmra.mxu2 %v1633_v56  ;;  %v6621_v50 = vld [vmem:[#allocation2 + $0x3c] sm:$0xf0] }
 0x13e   : > { %v881_v58 = vrot.slane %v879_v53, 7  ;;  %v662_v60 = vadd.f32 %v6457_v44, %v661_v55  ;;  %v1151_v51 = vld [vmem:[#allocation2 + $0x60] sm:$0xf] }
 0x140   : > { %v884_v28 = vor.u32 %v882_v59, %v881_v58  ;;  %v722_v63 = vmax.f32 %v662_v60, 0.0  ;;  %v885_v20 = vrot.slane %v881_v58, 4 }
 0x142   : > { %v1145_v0 = vsel %vm6475_vm3, %v884_v28, %v1144_v62  ;;  %v754_v1 = vpack.c.bf16 %v722_v63, %v722_v63  ;;  %v6596_v2 = vld [vmem:[#allocation2 + $0x48] sm:$0xff]  }
 0x143   : > { %1146 = vst [vmem:[#allocation2 + $0x54] sm:$0xf] %v1145_v0  ;;  %v1637_v4 = vshll.u32 %v6596_v2, 16  ;;  %v1255_v6 = vld [vmem:[#allocation2 + $0x50] sm:$0x1]  ;;  %3429 = vmatmul.bf16.gmra.mxu1 %v6596_v2  ;;  %v1635_v33 = vshrl.u32 %v6596_v2, 16 }
 0x144   : > { %v887_v7 = vshrl.u32 %v754_v1, 16  ;;  %v1535_v32 = vunpack.c.l.b16 %v1255_v6  ;;  %v890_v15 = vshll.u32 %v754_v1, 16  ;;  %v6630_v0 = vld [vmem:[%s7903_s4] ss:$0 sm:$0xff] }
 0x145   : > { %v664_v8 = vpop.f32.mrf.mxu0  ;;  %v1639_v23 = vrot.slane %v1637_v4, 1 }
 0x146   : > { %v889_v13 = vrot.slane %v887_v7, 7  ;;  %v665_v16 = vadd.f32 %v6457_v44, %v664_v8  ;;  %v6600_v19 = vpack.c.b16 %v1535_v32, %v1535_v32  ;;  %v3400_v7 = vpop.f32.mrf.mxu1  ;;  %v1155_v8 = vld [vmem:[#allocation2 + $0x68] sm:$0x1] }
 0x147   : > { %v6614_v40 = vor.u32 %v1639_v23, %v1635_v33  ;;  %v4945_v23 = vld [vmem:[#allocation2 + $0x2c] sm:$0x1] }
 0x148   : > { %v892_v27 = vor.u32 %v890_v15, %v889_v13  ;;  %v894_v29 = vrot.slane %v889_v13, 4  ;;  %v723_v18 = vmax.f32 %v665_v16, 0.0  ;;  %3681 = vmatmul.bf16.gmra.mxu0 %v6558_v24  ;;  %v1642_v31 = vshll.u32 %v6600_v19, 16  ;;  %v6636_v15 = vld [vmem:[#allocation2 + $0x24] sm:$0xff]  }
 0x149   : > { %v3401_v13 = vadd.f32 %v6630_v0, %v3400_v7 }
 0x14a   : > { %v893_v22 = vsel %vm6485_vm7, %v885_v20, %v892_v27  ;;  %v1149_v35 = vsel %vm6491_vm8, %v894_v29, %v1148_v21  ;;  %v755_v37 = vpack.c.bf16 %v723_v18, %v723_v18  ;;  %v1644_v38 = vrot.slane %v1642_v31, 1  ;;  %v4961_v29 = vld [vmem:[#allocation2 + $0x24] sm:$0xe] }
 0x14b   : > { %1147 = vst [vmem:[#allocation2 + $0x58] sm:$0xf] %v893_v22  ;;  %v7912_v22 = vunpack.c.h.b16 %v6636_v15 }
 0x14c   : > { %1150 = vst [vmem:[#allocation2 + $0x5c] sm:$0x1] %v1149_v35  ;;  %v896_v24 = vshrl.u32 %v755_v37, 16  ;;  %v1645_v42 = vsel %vm1561_vm0, %v6614_v40, %v1644_v38  ;;  %v899_v47 = vshll.u32 %v755_v37, 16  ;;  %v3489_v38 = vpop.f32.mrf.mxu2 }
 0x14d   : > { %v666_v41 = vpop.f32.mrf.mxu0  ;;  %3518 = vmatmul.bf16.gmra.mxu2 %v1645_v42  ;;  %v5365_v42 = vld [vmem:[#allocation8 + $0x138] sm:$0xff] }
 0x14e   : > { %v898_v43 = vrot.slane %v896_v24, 7  ;;  %v667_v48 = vadd.f32 %v6457_v44, %v666_v41  ;;  %v2460_v24 = vunpack.c.l.b16 %v4945_v23  ;;  %3747 = vmatpush.bf16.msrb.mxu1 %v5365_v42 }
 0x150   : > { %v901_v53 = vor.u32 %v899_v47, %v898_v43  ;;  %v724_v55 = vmax.f32 %v667_v48, 0.0  ;;  %v902_v32 = vrot.slane %v898_v43, 4  ;;  %v6645_v43 = vadd.f32 %v3489_v38, %v3401_v13 }
 0x151   : > { %v2716_v47 = vunpack.c.l.b16 %v4961_v29  ;;  %v1162_v29 = vld [vmem:[#allocation2 + $0x74] sm:$0x1] }
 0x152   : > { %v1152_v56 = vsel %vm6475_vm3, %v901_v53, %v1151_v51  ;;  %v756_v58 = vpack.c.bf16 %v724_v55, %v724_v55  ;;  %v1231_v59 = vld [vmem:[#allocation2 + $0x54] sm:$0xff]   ;;  %7946 = vst [vmem:[#allocation18_spill] sm:$0xff] %v6645_v43 }
 0x153   : > { %v6625_v60 = vld [vmem:[#allocation2 + $0x54] sm:$0xf0]  ;;  %1153 = vst [vmem:[#allocation2 + $0x60] sm:$0xf] %v1152_v56  ;;  %v1256_v61 = vld [vmem:[#allocation2 + $0x5c] sm:$0x1]  ;;  %3434 = vmatmul.bf16.gmra.mxu1 %v1231_v59 }
 0x154   : > { %v904_v62 = vshrl.u32 %v756_v58, 16  ;;  %v1536_v28 = vunpack.c.l.b16 %v1256_v61  ;;  %v907_v4 = vshll.u32 %v756_v58, 16  ;;  %v1649_v12 = vshll.u32 %v1231_v59, 16 }
 0x155   : > { %v669_v63 = vpop.f32.mrf.mxu0  ;;  %v1647_v25 = vshrl.u32 %v1231_v59, 16  ;;  %v2732_v58 = vpack.c.b16 %v7912_v22, %v2716_v47  ;;  %v1158_v59 = vld [vmem:[#allocation2 + $0x6c] sm:$0xf]  ;;  %v6651_v61 = vpack.c.b16 %v2460_v24, %v2460_v24 }
 0x156   : > { %v906_v1 = vrot.slane %v904_v62, 7  ;;  %v670_v6 = vadd.f32 %v6457_v44, %v669_v63  ;;  %v6633_v17 = vpack.c.b16 %v1536_v28, %v1536_v28  ;;  %v1651_v27 = vrot.slane %v1649_v12, 1 }
 0x158   : > { %v909_v16 = vor.u32 %v907_v4, %v906_v1  ;;  %v911_v39 = vrot.slane %v906_v1, 4  ;;  %v725_v20 = vmax.f32 %v670_v6, 0.0  ;;  %3686 = vmatmul.bf16.gmra.mxu0 %v6619_v49  ;;  %v1654_v21 = vshll.u32 %v6633_v17, 16 }
 0x159   : > { %v1652_v35 = vor.u32 %v1651_v27, %v1647_v25  ;;  %v2750_v6 = vrot.slane %v2732_v58, 1 }
 0x15a   : > { %v910_v18 = vsel %vm6485_vm7, %v902_v32, %v909_v16  ;;  %v1156_v31 = vsel %vm6491_vm8, %v911_v39, %v1155_v8  ;;  %v757_v33 = vpack.c.bf16 %v725_v20, %v725_v20  ;;  %v1656_v37 = vrot.slane %v1654_v21, 1  ;;  %v689_v39 = vpop.f32.mrf.mxu3 }
 0x15b   : > { %1154 = vst [vmem:[#allocation2 + $0x64] sm:$0xf] %v910_v18  ;;  %v2751_v8 = vrot.slane %v6651_v61, 1  ;;  %v690_v58 = vadd.f32 %v6457_v44, %v689_v39 }
 0x15c   : > { %1157 = vst [vmem:[#allocation2 + $0x68] sm:$0x1] %v1156_v31  ;;  %v913_v41 = vshrl.u32 %v757_v33, 16  ;;  %v1657_v51 = vsel %vm1561_vm0, %v1652_v35, %v1656_v37  ;;  %v916_v55 = vshll.u32 %v757_v33, 16 }
 0x15d   : > { %v671_v48 = vpop.f32.mrf.mxu0  ;;  %3523 = vmatmul.bf16.gmra.mxu2 %v1657_v51  ;;  %v6664_v31 = vsel %vm1818_vm9, %v2750_v6, %v2751_v8  ;;  %v1165_v8 = vld [vmem:[#allocation2 + $0x78] sm:$0xf] }
 0x15e   : > { %v915_v53 = vrot.slane %v913_v41, 7  ;;  %v672_v56 = vadd.f32 %v6457_v44, %v671_v48  ;;  %7948 = vst [vmem:[#allocation20_spill] sm:$0xff] %v6664_v31  ;;  %v6673_v48 = vpop.f32.mrf.mxu1 }
 0x15f   : > { %7949 = vst [vmem:[#allocation21_spill] sm:$0xff] %v6673_v48 }
 0x160   : > { %v918_v62 = vor.u32 %v916_v55, %v915_v53  ;;  %v726_v28 = vmax.f32 %v672_v56, 0.0  ;;  %v919_v27 = vrot.slane %v915_v53, 4  ;;  %v6679_v56 = vld [vmem:[#allocation2 + $0x54] sm:$0xf0] }
 0x162   : > { %v1159_v63 = vsel %vm6475_vm3, %v918_v62, %v1158_v59  ;;  %v758_v1 = vpack.c.bf16 %v726_v28, %v726_v28  ;;  %v6655_v4 = vld [vmem:[#allocation2 + $0x60] sm:$0xff]   ;;  %v5364_v28 = vld [vmem:[#allocation8 + $0x130] sm:$0xff] }
 0x163   : > { %1160 = vst [vmem:[#allocation2 + $0x6c] sm:$0xf] %v1159_v63  ;;  %v1661_v7 = vshll.u32 %v6655_v4, 16  ;;  %v1257_v32 = vld [vmem:[#allocation2 + $0x68] sm:$0x1]  ;;  %3439 = vmatmul.bf16.gmra.mxu1 %v6655_v4  ;;  %v1659_v24 = vshrl.u32 %v6655_v4, 16  ;;  %v691_v63 = vpop.f32.mrf.mxu3 }
 0x164   : > { %v921_v12 = vshrl.u32 %v758_v1, 16  ;;  %v1537_v13 = vunpack.c.l.b16 %v1257_v32  ;;  %v924_v21 = vshll.u32 %v758_v1, 16  ;;  %v733_v32 = vmax.f32 %v690_v58, 0.0  ;;  %3748 = vmatpush.bf16.msrb.mxu1 %v5364_v28 }
 0x165   : > { %v674_v16 = vpop.f32.mrf.mxu0  ;;  %v1663_v18 = vrot.slane %v1661_v7, 1 }
 0x166   : > { %v923_v20 = vrot.slane %v921_v12, 7  ;;  %v675_v23 = vadd.f32 %v6457_v44, %v674_v16  ;;  %v6660_v25 = vpack.c.b16 %v1537_v13, %v1537_v13  ;;  %v5373_v12 = vld [vmem:[#allocation8 + $0x178] sm:$0xff]  ;;  %v765_v39 = vpack.c.bf16 %v733_v32, %v733_v32 }
 0x167   : > { %v6675_v53 = vor.u32 %v1663_v18, %v1659_v24  ;;  %3836 = vmatpush.bf16.msrb.mxu2 %v5373_v12  ;;  %v5372_v24 = vld [vmem:[#allocation8 + $0x170] sm:$0xff] }
 0x168   : > { %7947 = vst [vmem:[#allocation19_spill] sm:$0xff] %v6660_v25  ;;  %v926_v33 = vor.u32 %v924_v21, %v923_v20  ;;  %v928_v35 = vrot.slane %v923_v20, 4  ;;  %v727_v37 = vmax.f32 %v675_v23, 0.0  ;;  %3691 = vmatmul.bf16.gmra.mxu0 %v6596_v2  ;;  %v1666_v38 = vshll.u32 %v6660_v25, 16  ;;  %v6677_v2 = vld [vmem:[#allocation2 + $0x54] sm:$0xff]   ;;  %v5363_v20 = vld [vmem:[#allocation8 + $0x128] sm:$0xff] }
 0x169   : > { %v692_v21 = vadd.f32 %v6457_v44, %v691_v63  ;;  %3749 = vmatpush.bf16.msrb.mxu1 %v5363_v20 }
 0x16a   : > { %v927_v41 = vsel %vm6485_vm7, %v919_v27, %v926_v33  ;;  %v1163_v42 = vsel %vm6491_vm8, %v928_v35, %v1162_v29  ;;  %v759_v47 = vpack.c.bf16 %v727_v37, %v727_v37  ;;  %v1668_v51 = vrot.slane %v1666_v38, 1 }
 0x16b   : > { %1161 = vst [vmem:[#allocation2 + $0x70] sm:$0xf] %v927_v41  ;;  %v981_v33 = vshrl.u32 %v765_v39, 16  ;;  %v984_v35 = vshll.u32 %v765_v39, 16  ;;  %v734_v38 = vmax.f32 %v692_v21, 0.0  ;;  %v694_v28 = vpop.f32.mrf.mxu3  ;;  %3837 = vmatpush.bf16.msrb.mxu2 %v5372_v24 }
 0x16c   : > { %1164 = vst [vmem:[#allocation2 + $0x74] sm:$0x1] %v1163_v42  ;;  %v930_v55 = vshrl.u32 %v759_v47, 16  ;;  %v1669_v62 = vsel %vm1561_vm0, %v6675_v53, %v1668_v51  ;;  %v933_v6 = vshll.u32 %v759_v47, 16  ;;  %v5362_v51 = vld [vmem:[#allocation8 + $0x120] sm:$0xff] }
 0x16d   : > { %v676_v59 = vpop.f32.mrf.mxu0  ;;  %3528 = vmatmul.bf16.gmra.mxu2 %v1669_v62  ;;  %v766_v62 = vpack.c.bf16 %v734_v38, %v734_v38  ;;  %3750 = vmatpush.bf16.msrb.mxu1 %v5362_v51 }
 0x16e   : > { %v6684_v1 = vrot.slane %v930_v55, 7  ;;  %v677_v7 = vadd.f32 %v6457_v44, %v676_v59  ;;  %v983_v44 = vrot.slane %v981_v33, 7 }
 0x16f   : > { %v989_v21 = vshrl.u32 %v766_v62, 16 }
 0x170   : > { %v935_v13 = vor.u32 %v933_v6, %v6684_v1  ;;  %v728_v16 = vmax.f32 %v677_v7, 0.0  ;;  %v6693_v42 = vpop.f32.mrf.mxu1  ;;  %v936_v55 = vrot.slane %v6684_v1, 4  ;;  %v1169_v6 = vld [vmem:[#allocation2 + $0x80] sm:$0x1]  ;;  %v986_v12 = vor.u32 %v984_v35, %v983_v44  ;;  %v6704_v1 = vpop.f32.mrf.mxu2 }
 0x171   : > { %v6699_v7 = vld [vmem:[%s7901_s2] ss:$0 sm:$0xff]  ;;  %7952 = vst [vmem:[#allocation24_spill] sm:$0xff] %v6704_v1  ;;  %v987_v20 = vrot.slane %v983_v44, 4 }
 0x172   : > { %v1166_v23 = vsel %vm6475_vm3, %v935_v13, %v1165_v8  ;;  %v760_v27 = vpack.c.bf16 %v728_v16, %v728_v16  ;;  %v1235_v29 = vld [vmem:[#allocation2 + $0x6c] sm:$0xff]   ;;  %v1186_v13 = vld [vmem:[#allocation2 + $0x9c] sm:$0xf] }
 0x173   : > { %v6691_v18 = vld [vmem:[#allocation2 + $0x6c] sm:$0xf0]  ;;  %1167 = vst [vmem:[#allocation2 + $0x78] sm:$0xf] %v1166_v23  ;;  %v1258_v37 = vld [vmem:[#allocation2 + $0x74] sm:$0x1]  ;;  %3444 = vmatmul.bf16.gmra.mxu1 %v1235_v29  ;;  %v1187_v35 = vsel %vm6475_vm3, %v986_v12, %v1186_v13 }
 0x174   : > { %7950 = vst [vmem:[#allocation22_spill] sm:$0xff] %v6691_v18  ;;  %v938_v41 = vshrl.u32 %v760_v27, 16  ;;  %v1538_v47 = vunpack.c.l.b16 %v1258_v37  ;;  %v941_v58 = vshll.u32 %v760_v27, 16  ;;  %v1671_v16 = vshrl.u32 %v1235_v29, 16  ;;  %v5371_v23 = vld [vmem:[#allocation8 + $0x168] sm:$0xff] }
 0x175   : > { %v679_v59 = vpop.f32.mrf.mxu0  ;;  %v1673_v39 = vshll.u32 %v1235_v29, 16  ;;  %3838 = vmatpush.bf16.msrb.mxu2 %v5371_v23  ;;  %1188 = vst [vmem:[#allocation2 + $0x9c] sm:$0xf] %v1187_v35  ;;  %v5361_v23 = vld [vmem:[#allocation8 + $0x118] sm:$0xff] }
 0x176   : > { %v940_v63 = vrot.slane %v938_v41, 7  ;;  %v680_v32 = vadd.f32 %v6699_v7, %v679_v59  ;;  %v6702_v8 = vpack.c.b16 %v1538_v47, %v1538_v47  ;;  %v991_v41 = vrot.slane %v989_v21, 7  ;;  %v1190_v59 = vld [vmem:[#allocation2 + $0xa4] sm:$0x1]  ;;  %3751 = vmatpush.bf16.msrb.mxu1 %v5361_v23 }
 0x177   : > { %v1675_v24 = vrot.slane %v1673_v39, 1  ;;  %v992_v47 = vshll.u32 %v766_v62, 16  ;;  %v695_v62 = vadd.f32 %v6699_v7, %v694_v28 }
 0x178   : > { %7951 = vst [vmem:[#allocation23_spill] sm:$0xff] %v6702_v8  ;;  %v943_v27 = vor.u32 %v941_v58, %v940_v63  ;;  %v945_v33 = vrot.slane %v940_v63, 4  ;;  %v729_v37 = vmax.f32 %v680_v32, 0.0  ;;  %3696 = vmatmul.bf16.gmra.mxu0 %v6677_v2  ;;  %v1678_v38 = vshll.u32 %v6702_v8, 16  ;;  %v3407_v12 = vpop.f32.mrf.mxu1 }
 0x179   : > { %v1676_v63 = vor.u32 %v1675_v24, %v1671_v16  ;;  %v994_v51 = vor.u32 %v992_v47, %v991_v41  ;;  %v996_v39 = vrot.slane %v991_v41, 4  ;;  %v5370_v16 = vld [vmem:[#allocation8 + $0x160] sm:$0xff]  ;;  %v735_v28 = vmax.f32 %v695_v62, 0.0  ;;  %v1172_v24 = vld [vmem:[#allocation2 + $0x84] sm:$0xf]  ;;  %v5369_v41 = vld [vmem:[#allocation8 + $0x158] sm:$0xff] }
 0x17a   : > { %v944_v29 = vsel %vm6485_vm7, %v936_v55, %v943_v27  ;;  %v1170_v44 = vsel %vm6491_vm8, %v945_v33, %v1169_v6  ;;  %v761_v58 = vpack.c.bf16 %v729_v37, %v729_v37  ;;  %v1680_v32 = vrot.slane %v1678_v38, 1  ;;  %v696_v27 = vpop.f32.mrf.mxu3  ;;  %3839 = vmatpush.bf16.msrb.mxu2 %v5370_v16 }
 0x17b   : > { %1168 = vst [vmem:[#allocation2 + $0x7c] sm:$0xf] %v944_v29  ;;  %v995_v55 = vsel %vm6485_vm7, %v987_v20, %v994_v51  ;;  %v1191_v6 = vsel %vm6491_vm8, %v996_v39, %v1190_v59  ;;  %v697_v35 = vadd.f32 %v6699_v7, %v696_v27  ;;  %v5360_v20 = vld [vmem:[#allocation8 + $0x110] sm:$0xff]  ;;  %v3406_v47 = vadd.f32 %v6630_v0, %v6693_v42 }
 0x17c   : > { %1171 = vst [vmem:[#allocation2 + $0x80] sm:$0x1] %v1170_v44  ;;  %v947_v22 = vshrl.u32 %v761_v58, 16  ;;  %v1681_v21 = vsel %vm1561_vm0, %v1676_v63, %v1680_v32  ;;  %v950_v37 = vshll.u32 %v761_v58, 16  ;;  %v767_v44 = vpack.c.bf16 %v735_v28, %v735_v28  ;;  %3752 = vmatpush.bf16.msrb.mxu1 %v5360_v20  ;;  %v5359_v28 = vld [vmem:[#allocation8 + $0x108] sm:$0xff] }
 0x17d   : > { %v681_v13 = vpop.f32.mrf.mxu0  ;;  %3533 = vmatmul.bf16.gmra.mxu2 %v1681_v21  ;;  %1189 = vst [vmem:[#allocation2 + $0xa0] sm:$0xf] %v995_v55  ;;  %v736_v59 = vmax.f32 %v697_v35, 0.0  ;;  %v3408_v42 = vadd.f32 %v6630_v0, %v3407_v12 }
 0x17e   : > { %v6720_v33 = vrot.slane %v947_v22, 7  ;;  %v682_v38 = vadd.f32 %v6699_v7, %v681_v13  ;;  %1192 = vst [vmem:[#allocation2 + $0xa4] sm:$0x1] %v1191_v6  ;;  %v998_v62 = vshrl.u32 %v767_v44, 16  ;;  %3840 = vmatpush.bf16.msrb.mxu2 %v5369_v41  ;;  %v1193_v41 = vld [vmem:[#allocation2 + $0xa8] sm:$0xf] }
 0x17f   : > { %v768_v6 = vpack.c.bf16 %v736_v59, %v736_v59  ;;  %v1176_v59 = vld [vmem:[#allocation2 + $0x8c] sm:$0x1] }
 0x180   : > { %v952_v22 = vor.u32 %v950_v37, %v6720_v33  ;;  %v730_v29 = vmax.f32 %v682_v38, 0.0  ;;  %v3494_v58 = vpop.f32.mrf.mxu2  ;;  %v953_v13 = vrot.slane %v6720_v33, 4  ;;  %v6736_v27 = vpop.f32.mrf.mxu1  ;;  %v1000_v38 = vrot.slane %v998_v62, 7  ;;  %3753 = vmatpush.bf16.msrb.mxu1 %v5359_v28 }
 0x181   : > { %v6729_v51 = vadd.f32 %v3494_v58, %v3406_v47  ;;  %v1001_v47 = vshll.u32 %v767_v44, 16  ;;  %v1009_v1 = vshll.u32 %v768_v6, 16 }
 0x182   : > { %v1173_v63 = vsel %vm6475_vm3, %v952_v22, %v1172_v24  ;;  %v762_v32 = vpack.c.bf16 %v730_v29, %v730_v29  ;;  %v6731_v39 = vld [vmem:[#allocation2 + $0x78] sm:$0xff]   ;;  %v1006_v22 = vshrl.u32 %v768_v6, 16  ;;  %v1004_v20 = vrot.slane %v1000_v38, 4  ;;  %v699_v48 = vpop.f32.mrf.mxu3 }
 0x183   : > { %7953 = vst [vmem:[#allocation25_spill] sm:$0xff] %v6729_v51  ;;  %v1685_v21 = vshll.u32 %v6731_v39, 16  ;;  %v1259_v55 = vld [vmem:[#allocation2 + $0x80] sm:$0x1]  ;;  %v1683_v16 = vshrl.u32 %v6731_v39, 16  ;;  %3449 = vmatmul.bf16.gmra.mxu1 %v6731_v39  ;;  %v700_v6 = vadd.f32 %v6699_v7, %v699_v48 }
 0x184   : > { %1174 = vst [vmem:[#allocation2 + $0x84] sm:$0xf] %v1173_v63  ;;  %v955_v23 = vshrl.u32 %v762_v32, 16  ;;  %v1539_v37 = vunpack.c.l.b16 %v1259_v55  ;;  %v958_v24 = vshll.u32 %v762_v32, 16  ;;  %v1003_v55 = vor.u32 %v1001_v47, %v1000_v38  ;;  %v5368_v32 = vld [vmem:[#allocation8 + $0x150] sm:$0xff]  ;;  %v5367_v47 = vld [vmem:[#allocation8 + $0x148] sm:$0xff] }
 0x185   : > { %v684_v35 = vpop.f32.mrf.mxu0  ;;  %v1687_v33 = vrot.slane %v1685_v21, 1  ;;  %v1008_v62 = vrot.slane %v1006_v22, 7  ;;  %3841 = vmatpush.bf16.msrb.mxu2 %v5368_v32  ;;  %v737_v48 = vmax.f32 %v700_v6, 0.0  ;;  %v6763_v32 = vld [vmem:[#allocation2 + $0x6c] sm:$0xff]  }
 0x186   : > { %v957_v12 = vrot.slane %v955_v23, 7  ;;  %v685_v29 = vadd.f32 %v6699_v7, %v684_v35  ;;  %v6740_v58 = vpack.c.b16 %v1539_v37, %v1539_v37  ;;  %v1197_v37 = vld [vmem:[#allocation2 + $0xb0] sm:$0x1]  ;;  %v5358_v35 = vld [vmem:[#allocation8 + $0x100] sm:$0xff] }
 0x187   : > { %v6743_v63 = vor.u32 %v1687_v33, %v1683_v16  ;;  %v1194_v16 = vsel %vm6475_vm3, %v1003_v55, %v1193_v41  ;;  %v1011_v33 = vor.u32 %v1009_v1, %v1008_v62  ;;  %v1013_v38 = vrot.slane %v1008_v62, 4  ;;  %3754 = vmatpush.bf16.msrb.mxu1 %v5358_v35 }
 0x188   : > { %7954 = vst [vmem:[#allocation26_spill] sm:$0xff] %v6740_v58  ;;  %v960_v21 = vor.u32 %v958_v24, %v957_v12  ;;  %v962_v44 = vrot.slane %v957_v12, 4  ;;  %v731_v31 = vmax.f32 %v685_v29, 0.0  ;;  %3701 = vmatmul.bf16.gmra.mxu0 %v6655_v4  ;;  %v1690_v23 = vshll.u32 %v6740_v58, 16  ;;  %v3496_v51 = vpop.f32.mrf.mxu2  ;;  %v3412_v55 = vpop.f32.mrf.mxu1 }
 0x189   : > { %v6754_v12 = vadd.f32 %v3496_v51, %v3408_v42  ;;  %1195 = vst [vmem:[#allocation2 + $0xa8] sm:$0xf] %v1194_v16  ;;  %v1012_v1 = vsel %vm6485_vm7, %v1004_v20, %v1011_v33  ;;  %v1198_v29 = vsel %vm6491_vm8, %v1013_v38, %v1197_v37  ;;  %v769_v51 = vpack.c.bf16 %v737_v48, %v737_v48  ;;  %v5366_v42 = vld [vmem:[#allocation8 + $0x140] sm:$0xff]  ;;  %v1200_v48 = vld [vmem:[#allocation2 + $0xb4] sm:$0xf] }
 0x18a   : > { %v961_v24 = vsel %vm6485_vm7, %v953_v13, %v960_v21  ;;  %v1177_v4 = vsel %vm6491_vm8, %v962_v44, %v1176_v59  ;;  %v763_v22 = vpack.c.bf16 %v731_v31, %v731_v31  ;;  %v1692_v28 = vrot.slane %v1690_v23, 1  ;;  %1196 = vst [vmem:[#allocation2 + $0xac] sm:$0xf] %v1012_v1  ;;  %3842 = vmatpush.bf16.msrb.mxu2 %v5367_v47  ;;  %v6765_v21 = vld [vmem:[#allocation2 + $0x6c] sm:$0xf0]  ;;  %v701_v35 = vpop.f32.mrf.mxu3 }
 0x18b   : > { %7955 = vst [vmem:[#allocation27_spill] sm:$0xff] %v6754_v12  ;;  %v1179_v44 = vld [vmem:[#allocation2 + $0x90] sm:$0xf]  ;;  %v1015_v23 = vshrl.u32 %v769_v51, 16  ;;  %v1018_v37 = vshll.u32 %v769_v51, 16  ;;  %v3411_v16 = vadd.f32 %v6630_v0, %v6736_v27  ;;  %v702_v6 = vadd.f32 %v6699_v7, %v701_v35 }
 0x18c   : > { %1175 = vst [vmem:[#allocation2 + $0x88] sm:$0xf] %v961_v24  ;;  %v964_v41 = vshrl.u32 %v763_v22, 16  ;;  %v1693_v31 = vsel %vm1561_vm0, %v6743_v63, %v1692_v28  ;;  %v967_v62 = vshll.u32 %v763_v22, 16 }
 0x18d   : > { %1178 = vst [vmem:[#allocation2 + $0x8c] sm:$0x1] %v1177_v4  ;;  %v686_v13 = vpop.f32.mrf.mxu0  ;;  %3538 = vmatmul.bf16.gmra.mxu2 %v1693_v31  ;;  %v1017_v24 = vrot.slane %v1015_v23, 7 }
 0x18e   : > { %v966_v59 = vrot.slane %v964_v41, 7  ;;  %v687_v20 = vadd.f32 %v6699_v7, %v686_v13  ;;  %1199 = vst [vmem:[#allocation2 + $0xb0] sm:$0x1] %v1198_v29  ;;  %3843 = vmatpush.bf16.msrb.mxu2 %v5366_v42  ;;  %v4880_v41 = vld [vmem:[#allocation2 + $0x14] sm:$0x1]  ;;  %v738_v13 = vmax.f32 %v702_v6, 0.0 }
 0x18f   : > { %v1020_v31 = vor.u32 %v1018_v37, %v1017_v24  ;;  %v1995_v35 = vunpack.c.l.b16 %v4880_v41  ;;  %v1183_v37 = vld [vmem:[#allocation2 + $0x98] sm:$0x1] }
 0x190   : > { %v969_v33 = vor.u32 %v967_v62, %v966_v59  ;;  %v732_v38 = vmax.f32 %v687_v20, 0.0  ;;  %v3499_v47 = vpop.f32.mrf.mxu2  ;;  %v3415_v62 = vpop.f32.mrf.mxu1  ;;  %v770_v23 = vpack.c.bf16 %v738_v13, %v738_v13  ;;  %v970_v6 = vrot.slane %v966_v59, 4 }
 0x191   : > { %v6772_v28 = vadd.f32 %v3499_v47, %v3411_v16 }
 0x192   : > { %v1180_v4 = vsel %vm6475_vm3, %v969_v33, %v1179_v44  ;;  %v764_v22 = vpack.c.bf16 %v732_v38, %v732_v38  ;;  %v1201_v44 = vsel %vm6475_vm3, %v1020_v31, %v1200_v48  ;;  %v1023_v47 = vshrl.u32 %v770_v23, 16 }
 0x193   : > { %7956 = vst [vmem:[#allocation28_spill] sm:$0xff] %v6772_v28  ;;  %v1239_v1 = vld [vmem:[#allocation2 + $0x84] sm:$0xff]  }
 0x194   : > { %v6774_v29 = vld [vmem:[#allocation2 + $0x84] sm:$0xf0]  ;;  %1181 = vst [vmem:[#allocation2 + $0x90] sm:$0xf] %v1180_v4  ;;  %v1260_v27 = vld [vmem:[#allocation2 + $0x8c] sm:$0x1]  ;;  %v3413_v4 = vadd.f32 %v6630_v0, %v3412_v55  ;;  %3454 = vmatmul.bf16.gmra.mxu1 %v1239_v1 }
 0x195   : > { %v972_v51 = vshrl.u32 %v764_v22, 16  ;;  %v1540_v20 = vunpack.c.l.b16 %v1260_v27  ;;  %v6776_v42 = vpop.f32.mrf.mxu0  ;;  %v975_v33 = vshll.u32 %v764_v22, 16  ;;  %1202 = vst [vmem:[#allocation2 + $0xb4] sm:$0xf] %v1201_v44  ;;  %v1697_v28 = vshll.u32 %v1239_v1, 16  ;;  %v6785_v44 = vld [vmem:[#allocation2 + $0xa8] sm:$0xff]  }
 0x196   : > { %7957 = vst [vmem:[#allocation29_spill] sm:$0xff] %v6776_v42  ;;  %v1026_v27 = vshll.u32 %v770_v23, 16  ;;  %v1025_v41 = vrot.slane %v1023_v47, 7  ;;  %v1695_v22 = vshrl.u32 %v1239_v1, 16  ;;  %v1731_v8 = vshrl.u32 %v6785_v44, 16 }
 0x197   : > { %v974_v16 = vrot.slane %v972_v51, 7  ;;  %v6780_v38 = vpack.c.b16 %v1540_v20, %v1540_v20  ;;  %v1699_v51 = vrot.slane %v1697_v28, 1  ;;  %v1021_v20 = vrot.slane %v1017_v24, 4 }
 0x198   : > { %3706 = vmatmul.bf16.gmra.mxu0 %v6763_v32  ;;  %v3501_v31 = vpop.f32.mrf.mxu2  ;;  %v1028_v58 = vor.u32 %v1026_v27, %v1025_v41  ;;  %v1030_v1 = vrot.slane %v1025_v41, 4  ;;  %v3417_v24 = vpop.f32.mrf.mxu1  ;;  %v2011_v28 = vpack.c.b16 %v1995_v35, %v1995_v35  ;;  %v3416_v35 = vadd.f32 %v6630_v0, %v3415_v62 }
 0x199   : > { %v977_v13 = vor.u32 %v975_v33, %v974_v16  ;;  %v979_v12 = vrot.slane %v974_v16, 4  ;;  %v1702_v48 = vshll.u32 %v6780_v38, 16  ;;  %v6791_v23 = vadd.f32 %v3501_v31, %v3413_v4  ;;  %v1204_v33 = vld [vmem:[#allocation2 + $0xbc] sm:$0x1] }
 0x19a   : > { %v2030_v16 = vshll.u32 %v6542_v52, 16  ;;  %v1700_v42 = vor.u32 %v1699_v51, %v1695_v22  ;;  %v1029_v4 = vsel %vm6485_vm7, %v1021_v20, %v1028_v58  ;;  %v2028_v41 = vshrl.u32 %v6542_v52, 16  ;;  %v5915_v22 = vld [vmem:[#allocation2 + $0xc] sm:$0xe] }
 0x19b   : > { %v978_v55 = vsel %vm6485_vm7, %v970_v6, %v977_v13  ;;  %v1184_v59 = vsel %vm6491_vm8, %v979_v12, %v1183_v37  ;;  %7958 = vst [vmem:[#allocation30_spill] sm:$0xff] %v6791_v23  ;;  %v1704_v47 = vrot.slane %v1702_v48, 1  ;;  %v1733_v6 = vshll.u32 %v6785_v44, 16 }
 0x19c   : > { %1182 = vst [vmem:[#allocation2 + $0x94] sm:$0xf] %v978_v55  ;;  %v1205_v37 = vsel %vm6491_vm8, %v1030_v1, %v1204_v33  ;;  %v2032_v27 = vrot.slane %v2030_v16, 1  ;;  %v2035_v31 = vshll.u32 %v2011_v28, 16  ;;  %v5916_v62 = vor.u32 %v5915_v22, %v6544_v26 }
 0x19d   : > { %1185 = vst [vmem:[#allocation2 + $0x98] sm:$0x1] %v1184_v59  ;;  %v6796_v13 = vpop.f32.mrf.mxu0  ;;  %v1705_v12 = vsel %vm1561_vm0, %v1700_v42, %v1704_v47  ;;  %v1735_v48 = vrot.slane %v1733_v6, 1  ;;  %v4881_v59 = vld [vmem:[#allocation2 + $0x20] sm:$0x1] }
 0x19e   : > { %7959 = vst [vmem:[#allocation31_spill] sm:$0xff] %v6796_v13  ;;  %3543 = vmatmul.bf16.gmra.mxu2 %v1705_v12  ;;  %v2033_v20 = vor.u32 %v2032_v27, %v2028_v41  ;;  %v2037_v33 = vrot.slane %v2035_v31, 1  ;;  %v1996_v1 = vunpack.c.l.b16 %v4881_v59  ;;  %v2283_v12 = vrot.slane %v5916_v62, 1  ;;  %v6820_v27 = vld [vmem:[#allocation2 + $0x9c] sm:$0xff]  }
 0x19f   : > { %1203 = vst [vmem:[#allocation2 + $0xb8] sm:$0xf] %v1029_v4  ;;  %v6805_v51 = vor.u32 %v1735_v48, %v1731_v8  ;;  %v3418_v8 = vadd.f32 %v6630_v0, %v3417_v24  ;;  %v2284_v4 = vrot.slane %v2011_v28, 1  ;;  %v6822_v48 = vld [vmem:[#allocation2 + $0x9c] sm:$0xf0]  ;;  %v6827_v24 = vld [vmem:[#allocation2 + $0x84] sm:$0xff]  }
 0x1a0   : > { %1206 = vst [vmem:[#allocation2 + $0xbc] sm:$0x1] %v1205_v37  ;;  %v3504_v42 = vpop.f32.mrf.mxu2  ;;  %v3420_v16 = vpop.f32.mrf.mxu1  ;;  %v2038_v52 = vsel %vm1561_vm0, %v2033_v20, %v2037_v33  ;;  %v5694_v62 = vld [vmem:[#allocation2 + $0x18] sm:$0xf0] }
 0x1a1   : > { %v6807_v55 = vadd.f32 %v3504_v42, %v3416_v35  ;;  %7963 = vst [vmem:[#allocation35_spill] sm:$0xff] %v6822_v48  ;;  %v2012_v35 = vpack.c.b16 %v1996_v1, %v1996_v1  ;;  %v2285_v31 = vsel %vm1818_vm9, %v2283_v12, %v2284_v4  ;;  %v3421_v28 = vadd.f32 %v6630_v0, %v3420_v16  ;;  %v4882_v1 = vld [vmem:[#allocation2 + $0x2c] sm:$0x1] }
 0x1a2   : > { %v1997_v16 = vunpack.c.l.b16 %v4882_v1 }
 0x1a3   : > { %7960 = vst [vmem:[#allocation32_spill] sm:$0xff] %v6807_v55  ;;  %v6809_v58 = vld [vmem:[#allocation2 + $0x90] sm:$0xff]   ;;  %v2047_v22 = vshll.u32 %v2012_v35, 16 }
 0x1a4   : > { %3459 = vmatmul.bf16.vlgmr.msrb.gmra.mxu3 %v6809_v58  ;;  %3755 = vmatmul.bf16.vlgmr.msrb.gmra.mxu1 %v2038_v52 }
 0x1a5   : > { %v6812_v47 = vpop.f32.mrf.mxu0  ;;  %v2049_v59 = vrot.slane %v2047_v22, 1  ;;  %v2287_v22 = vrot.slane %v2012_v35, 1 }
 0x1a6   : > { %7961 = vst [vmem:[#allocation33_spill] sm:$0xff] %v6812_v47  ;;  %v2013_v47 = vpack.c.b16 %v1997_v16, %v1997_v16 }
 0x1a8   : > { %3711 = vmatmul.bf16.gmra.mxu0 %v6731_v39  ;;  %v3506_v6 = vpop.f32.mrf.mxu2  ;;  %v3422_v41 = vpop.f32.mrf.mxu1  ;;  %v6829_v39 = vld [vmem:[#allocation2 + $0x84] sm:$0xf0]  ;;  %v2059_v1 = vshll.u32 %v2013_v47, 16 }
 0x1a9   : > { %v6818_v37 = vadd.f32 %v3506_v6, %v3418_v8  ;;  %v2050_v8 = vsel %vm1561_vm0, %v6537_v45, %v2049_v59  ;;  %v5695_v6 = vld [vmem:[#allocation2 + $0x18] sm:$0xe]  ;;  %v3423_v4 = vadd.f32 %v6630_v0, %v3422_v41 }
 0x1aa   : > { %v5696_v12 = vor.u32 %v5695_v6, %v5694_v62  ;;  %v2052_v62 = vshrl.u32 %v6580_v10, 16  ;;  %v4883_v6 = vld [vmem:[#allocation2 + $0x38] sm:$0x1] }
 0x1ab   : > { %7962 = vst [vmem:[#allocation34_spill] sm:$0xff] %v6818_v37 }
 0x1ad   : > { %v6824_v26 = vpop.f32.mrf.mxu0 }
 0x1ae   : > { %7964 = vst [vmem:[#allocation36_spill] sm:$0xff] %v6824_v26  ;;  %3844 = vmatmul.bf16.vlgmr.msrb.gmra.mxu2 %v2285_v31  ;;  %v2286_v26 = vrot.slane %v5696_v12, 1  ;;  %v5349_v12 = vld [vmem:[#allocation8 + $0xb8] sm:$0xff] }
 0x1af   : > { %3569 = vmatpush.bf16.msrb.mxu3 %v5349_v12 }
 0x1b0   : > { %v3509_v42 = vpop.f32.mrf.mxu2  ;;  %v3425_v33 = vpop.f32.mrf.mxu1  ;;  %v2288_v45 = vsel %vm1818_vm9, %v2286_v26, %v2287_v22 }
 0x1b1   : > { %v6832_v20 = vadd.f32 %v3509_v42, %v3421_v28  ;;  %v2054_v28 = vshll.u32 %v6580_v10, 16  ;;  %v3426_v41 = vadd.f32 %v6630_v0, %v3425_v33 }
 0x1b3   : > { %7965 = vst [vmem:[#allocation37_spill] sm:$0xff] %v6832_v20  ;;  %v2056_v59 = vrot.slane %v2054_v28, 1 }
 0x1b4   : > { %3464 = vmatmul.bf16.gmra.mxu3 %v6820_v27  ;;  %3760 = vmatmul.bf16.gmra.mxu1 %v2050_v8  ;;  %v5918_v8 = vld [vmem:[#allocation2 + $0x24] sm:$0xe] }
 0x1b5   : > { %v6835_v52 = vpop.f32.mrf.mxu0  ;;  %v5919_v22 = vor.u32 %v5918_v8, %v6582_v11  ;;  %v5348_v11 = vld [vmem:[#allocation8 + $0xb0] sm:$0xff] }
 0x1b6   : > { %7966 = vst [vmem:[#allocation38_spill] sm:$0xff] %v6835_v52  ;;  %3570 = vmatpush.bf16.msrb.mxu3 %v5348_v11 }
 0x1b8   : > { %3716 = vmatmul.bf16.gmra.mxu0 %v6827_v24  ;;  %v3511_v31 = vpop.f32.mrf.mxu2  ;;  %v3427_v52 = vpop.f32.mrf.mxu1 }
 0x1b9   : > { %v6842_v42 = vadd.f32 %v3511_v31, %v3423_v4  ;;  %v2057_v4 = vor.u32 %v2056_v59, %v2052_v62  ;;  %v2061_v31 = vrot.slane %v2059_v1, 1  ;;  %v3428_v33 = vadd.f32 %v6630_v0, %v3427_v52  ;;  %v6862_v1 = vld [vmem:[#allocation2 + $0xb4] sm:$0xff]   ;;  %v704_v8 = vpop.f32.mrf.mxu3 }
 0x1ba   : > { %v2289_v59 = vrot.slane %v5919_v22, 1  ;;  %v705_v52 = vadd.f32 %v6699_v7, %v704_v8  ;;  %v1261_v22 = vld [vmem:[#allocation2 + $0x98] sm:$0x1] }
 0x1bb   : > { %7967 = vst [vmem:[#allocation39_spill] sm:$0xff] %v6842_v42  ;;  %v2062_v10 = vsel %vm1561_vm0, %v2057_v4, %v2061_v31  ;;  %v6873_v31 = vld [vmem:[#allocation2 + $0x9c] sm:$0xf0]  ;;  %v1541_v8 = vunpack.c.l.b16 %v1261_v22 }
 0x1bd   : > { %v6844_v13 = vpop.f32.mrf.mxu0 }
 0x1be   : > { %7968 = vst [vmem:[#allocation40_spill] sm:$0xff] %v6844_v13  ;;  %3849 = vmatmul.bf16.gmra.mxu2 %v2288_v45  ;;  %v1998_v13 = vunpack.c.l.b16 %v4883_v6 }
 0x1c0   : > { %v3514_v35 = vpop.f32.mrf.mxu2  ;;  %v3430_v16 = vpop.f32.mrf.mxu1  ;;  %v6858_v28 = vpack.c.b16 %v1998_v13, %v1998_v13 }
 0x1c1   : > { %v6849_v48 = vadd.f32 %v3514_v35, %v3426_v41  ;;  %v2290_v41 = vrot.slane %v2013_v47, 1  ;;  %v6864_v35 = vld [vmem:[#allocation2 + $0xb4] sm:$0xf0]  ;;  %v6871_v47 = vld [vmem:[#allocation2 + $0x9c] sm:$0xff]   ;;  %v706_v20 = vpop.f32.mrf.mxu3 }
 0x1c2   : > { %7972 = vst [vmem:[#allocation44_spill] sm:$0xff] %v6864_v35  ;;  %v2071_v4 = vshll.u32 %v6858_v28, 16  ;;  %v707_v22 = vadd.f32 %v6699_v7, %v706_v20  ;;  %v1853_v20 = vrot.slane %v6780_v38, 1 }
 0x1c3   : > { %7969 = vst [vmem:[#allocation41_spill] sm:$0xff] %v6849_v48  ;;  %v2291_v13 = vsel %vm1818_vm9, %v2289_v59, %v2290_v41  ;;  %v6878_v41 = vld [vmem:[#allocation2 + $0x6c] sm:$0xff]  }
 0x1c4   : > { %3469 = vmatmul.bf16.gmra.mxu3 %v6785_v44  ;;  %3765 = vmatmul.bf16.gmra.mxu1 %v2062_v10  ;;  %v739_v10 = vmax.f32 %v705_v52, 0.0  ;;  %v5347_v52 = vld [vmem:[#allocation8 + $0xa8] sm:$0xff]  ;;  %v7916_v23 = vunpack.c.h.b16 %v6878_v41  ;;  %v740_v43 = vmax.f32 %v707_v22, 0.0 }
 0x1c5   : > { %v6852_v26 = vpop.f32.mrf.mxu0  ;;  %3571 = vmatpush.bf16.msrb.mxu3 %v5347_v52  ;;  %v2293_v52 = vrot.slane %v6858_v28, 1 }
 0x1c6   : > { %7970 = vst [vmem:[#allocation42_spill] sm:$0xff] %v6852_v26  ;;  %v2073_v26 = vrot.slane %v2071_v4, 1  ;;  %v771_v35 = vpack.c.bf16 %v739_v10, %v739_v10  ;;  %v4967_v10 = vld [vmem:[#allocation2 + $0x6c] sm:$0xe] }
 0x1c8   : > { %3721 = vmatmul.bf16.gmra.mxu0 %v6809_v58  ;;  %v3516_v45 = vpop.f32.mrf.mxu2  ;;  %v3432_v6 = vpop.f32.mrf.mxu1  ;;  %v1032_v42 = vshrl.u32 %v771_v35, 16  ;;  %v1035_v59 = vshll.u32 %v771_v35, 16  ;;  %v2074_v35 = vsel %vm1561_vm0, %v6575_v3, %v2073_v26  ;;  %v2722_v3 = vunpack.c.l.b16 %v4967_v10 }
 0x1c9   : > { %v6860_v62 = vadd.f32 %v3516_v45, %v3428_v33  ;;  %v5921_v33 = vld [vmem:[#allocation2 + $0x84] sm:$0xe]  ;;  %v3431_v45 = vadd.f32 %v6630_v0, %v3430_v16  ;;  %v4884_v16 = vld [vmem:[#allocation2 + $0x44] sm:$0x1]  ;;  %v1709_v26 = vshll.u32 %v6809_v58, 16 }
 0x1ca   : > { %v6883_v4 = vrot.slane %v1032_v42, 7  ;;  %v1999_v7 = vunpack.c.l.b16 %v4884_v16  ;;  %v2738_v38 = vpack.c.b16 %v7916_v23, %v2722_v3  ;;  %v2076_v23 = vshrl.u32 %v6619_v49, 16 }
 0x1cb   : > { %7971 = vst [vmem:[#allocation43_spill] sm:$0xff] %v6860_v62  ;;  %v4951_v62 = vld [vmem:[#allocation2 + $0x74] sm:$0x1] }
 0x1cc   : > { %v2466_v37 = vunpack.c.l.b16 %v4951_v62  ;;  %v6892_v62 = vpack.c.b16 %v1541_v8, %v1541_v8  ;;  %v1037_v42 = vor.u32 %v1035_v59, %v6883_v4  ;;  %v772_v8 = vpack.c.bf16 %v740_v43, %v740_v43  ;;  %v5346_v43 = vld [vmem:[#allocation8 + $0xa0] sm:$0xff] }
 0x1cd   : > { %v6868_v12 = vpop.f32.mrf.mxu0  ;;  %v2078_v59 = vshll.u32 %v6619_v49, 16  ;;  %v2768_v10 = vrot.slane %v2738_v38, 1  ;;  %3572 = vmatpush.bf16.msrb.mxu3 %v5346_v43 }
 0x1ce   : > { %7973 = vst [vmem:[#allocation45_spill] sm:$0xff] %v6868_v12  ;;  %3854 = vmatmul.bf16.gmra.mxu2 %v2291_v13  ;;  %v5697_v12 = vld [vmem:[#allocation2 + $0x30] sm:$0xf0]  ;;  %v5698_v13 = vld [vmem:[#allocation2 + $0x30] sm:$0xe]  ;;  %v1043_v57 = vshll.u32 %v772_v8, 16 }
 0x1d0   : > { %v3519_v48 = vpop.f32.mrf.mxu2  ;;  %v6881_v55 = vpop.f32.mrf.mxu1 }
 0x1d1   : > { %v6876_v11 = vadd.f32 %v3519_v48, %v3431_v45  ;;  %v5922_v48 = vor.u32 %v5921_v33, %v6774_v29  ;;  %v5699_v45 = vor.u32 %v5698_v13, %v5697_v12  ;;  %v6895_v29 = vpack.c.b16 %v2466_v37, %v2466_v37 }
 0x1d2   : > { %v3433_v12 = vadd.f32 %v6630_v0, %v3432_v6  ;;  %v1714_v0 = vshll.u32 %v6892_v62, 16  ;;  %v1040_v6 = vshrl.u32 %v772_v8, 16  ;;  %v5388_v8 = vld [vmem:[#allocation8 + $0x1f0] sm:$0xff] }
 0x1d3   : > { %7974 = vst [vmem:[#allocation46_spill] sm:$0xff] %v6876_v11  ;;  %v1207_v11 = vld [vmem:[#allocation2 + $0xc0] sm:$0xf]  ;;  %v1852_v25 = vrot.slane %v5922_v48, 1  ;;  %v2292_v22 = vrot.slane %v5699_v45, 1  ;;  %v6913_v48 = vpack.c.b16 %v1999_v7, %v1999_v7  ;;  %v2769_v28 = vrot.slane %v6895_v29, 1 }
 0x1d4   : > { %3474 = vmatmul.bf16.gmra.mxu3 %v6862_v1  ;;  %3770 = vmatmul.bf16.gmra.mxu1 %v2074_v35  ;;  %v1208_v33 = vsel %vm6475_vm3, %v1037_v42, %v1207_v11  ;;  %v5389_v11 = vld [vmem:[#allocation8 + $0x1f8] sm:$0xff]  ;;  %v1711_v35 = vrot.slane %v1709_v26, 1  ;;  %v1038_v42 = vrot.slane %v6883_v4, 4  ;;  %v1707_v45 = vshrl.u32 %v6809_v58, 16 }
 0x1d5   : > { %v6890_v18 = vpop.f32.mrf.mxu0  ;;  %1209 = vst [vmem:[#allocation2 + $0xc0] sm:$0xf] %v1208_v33  ;;  %v6906_v37 = vsel %vm1818_vm9, %v1852_v25, %v1853_v20  ;;  %v1042_v20 = vrot.slane %v1040_v6, 7  ;;  %4014 = vmatpush.bf16.msra.mxu0 %v5389_v11  ;;  %v2294_v3 = vsel %vm1818_vm9, %v2292_v22, %v2293_v52  ;;  %v1211_v33 = vld [vmem:[#allocation2 + $0xc8] sm:$0x1]  ;;  %v1716_v7 = vrot.slane %v1714_v0, 1 }
 0x1d6   : > { %7975 = vst [vmem:[#allocation47_spill] sm:$0xff] %v6890_v18  ;;  %v2083_v4 = vshll.u32 %v6913_v48, 16  ;;  %v1262_v6 = vld [vmem:[#allocation2 + $0xa4] sm:$0x1]  ;;  %v6924_v11 = vor.u32 %v1711_v35, %v1707_v45  ;;  %v5924_v0 = vld [vmem:[#allocation2 + $0x3c] sm:$0xe] }
 0x1d7   : > { %v1045_v38 = vor.u32 %v1043_v57, %v1042_v20  ;;  %v1047_v26 = vrot.slane %v1042_v20, 4  ;;  %v4885_v35 = vld [vmem:[#allocation2 + $0x50] sm:$0x1]  ;;  %v5387_v20 = vld [vmem:[#allocation8 + $0x1e8] sm:$0xff]  ;;  %v5925_v9 = vor.u32 %v5924_v0, %v6621_v50  ;;  %v1719_v0 = vshrl.u32 %v6820_v27, 16 }
 0x1d8   : > { %3726 = vmatmul.bf16.gmra.mxu0 %v6871_v47  ;;  %v3521_v13 = vpop.f32.mrf.mxu2  ;;  %v3437_v25 = vpop.f32.mrf.mxu1 }
 0x1d9   : > { %v6910_v16 = vadd.f32 %v3521_v13, %v3433_v12  ;;  %v2080_v12 = vrot.slane %v2078_v59, 1  ;;  %v6919_v13 = vsel %vm1818_vm9, %v2768_v10, %v2769_v28  ;;  %v6929_v59 = vld [vmem:[%s7903_s4] ss:$0 sm:$0xff]  ;;  %v1046_v57 = vsel %vm6485_vm7, %v1038_v42, %v1045_v38  ;;  %4015 = vmatpush.bf16.msra.mxu0 %v5388_v8  ;;  %v5386_v8 = vld [vmem:[#allocation8 + $0x1e0] sm:$0xff] }
 0x1da   : > { %7976 = vst [vmem:[#allocation48_spill] sm:$0xff] %v6919_v13  ;;  %v3436_v52 = vadd.f32 %v6929_v59, %v6881_v55  ;;  %v1212_v49 = vsel %vm6491_vm8, %v1047_v26, %v1211_v33  ;;  %v1717_v10 = vsel %vm1561_vm0, %v6924_v11, %v1716_v7  ;;  %v1542_v55 = vunpack.c.l.b16 %v1262_v6  ;;  %v5703_v13 = vld [vmem:[#allocation2 + $0x60] sm:$0xf0] }
 0x1db   : > { %1210 = vst [vmem:[#allocation2 + $0xc4] sm:$0xf] %v1046_v57  ;;  %v2081_v28 = vor.u32 %v2080_v12, %v2076_v23  ;;  %v2085_v42 = vrot.slane %v2083_v4, 1  ;;  %v2000_v33 = vunpack.c.l.b16 %v4885_v35  ;;  %v1721_v23 = vshll.u32 %v6820_v27, 16  ;;  %v6963_v27 = vld [vmem:[#allocation2 + $0xb4] sm:$0xf0] }
 0x1dc   : > { %1213 = vst [vmem:[#allocation2 + $0xc8] sm:$0x1] %v1212_v49  ;;  %v6945_v38 = vpack.c.b16 %v1542_v55, %v1542_v55  ;;  %v3438_v12 = vadd.f32 %v6929_v59, %v3437_v25  ;;  %v2295_v26 = vrot.slane %v5925_v9, 1  ;;  %v2296_v4 = vrot.slane %v6913_v48, 1  ;;  %v5344_v25 = vld [vmem:[#allocation8 + $0x90] sm:$0xff] }
 0x1dd   : > { %v6933_v58 = vpop.f32.mrf.mxu0  ;;  %4016 = vmatpush.bf16.msra.mxu0 %v5387_v20  ;;  %v2086_v45 = vsel %vm1561_vm0, %v2081_v28, %v2085_v42  ;;  %v6951_v6 = vpack.c.b16 %v2000_v33, %v2000_v33  ;;  %v1723_v57 = vrot.slane %v1721_v23, 1  ;;  %v5384_v28 = vld [vmem:[#allocation8 + $0x1d0] sm:$0xff]  ;;  %v1263_v20 = vld [vmem:[#allocation2 + $0xb0] sm:$0x1] }
 0x1de   : > { %3859 = vmatmul.bf16.gmra.mxu2 %v2294_v3  ;;  %7977 = vst [vmem:[#allocation49_spill] sm:$0xff] %v6933_v58  ;;  %v5345_v3 = vld [vmem:[#allocation8 + $0x98] sm:$0xff]  ;;  %v1726_v49 = vshll.u32 %v6945_v38, 16  ;;  %v4953_v9 = vld [vmem:[#allocation2 + $0x8c] sm:$0x1] }
 0x1df   : > { %3573 = vmatpush.bf16.msrb.mxu3 %v5345_v3  ;;  %v2095_v48 = vshll.u32 %v6951_v6, 16  ;;  %v1724_v55 = vor.u32 %v1723_v57, %v1719_v0  ;;  %v6961_v3 = vld [vmem:[#allocation2 + $0xb4] sm:$0xff]   ;;  %v5343_v0 = vld [vmem:[#allocation8 + $0x88] sm:$0xff]  ;;  %v2468_v57 = vunpack.c.l.b16 %v4953_v9 }
 0x1e0   : > { %v3524_v43 = vpop.f32.mrf.mxu2  ;;  %v3440_v5 = vpop.f32.mrf.mxu1  ;;  %v1728_v35 = vrot.slane %v1726_v49, 1 }
 0x1e1   : > { %v6939_v22 = vadd.f32 %v3524_v43, %v3436_v52  ;;  %4017 = vmatpush.bf16.msra.mxu0 %v5386_v8  ;;  %v5385_v43 = vld [vmem:[#allocation8 + $0x1d8] sm:$0xff]  ;;  %v3441_v42 = vadd.f32 %v6929_v59, %v3440_v5  ;;  %v2097_v8 = vrot.slane %v2095_v48, 1  ;;  %v5700_v5 = vld [vmem:[#allocation2 + $0x48] sm:$0xf0]  ;;  %v5382_v48 = vld [vmem:[#allocation8 + $0x1c0] sm:$0xff] }
 0x1e2   : > { %v7000_v18 = vld [vmem:[#allocation2 + $0xc0] sm:$0xff]  }
 0x1e3   : > { %7978 = vst [vmem:[#allocation50_spill] sm:$0xff] %v6939_v22  ;;  %3574 = vmatpush.bf16.msrb.mxu3 %v5344_v25  ;;  %v6151_v25 = vld [vmem:[#allocation2 + $0x84] sm:$0xe] }
 0x1e4   : > { %3548 = vmatmul.bf16.vlgmr.msra.gmra.mxu3 %v1717_v10  ;;  %3775 = vmatmul.bf16.gmra.mxu1 %v2086_v45  ;;  %v1543_v45 = vunpack.c.l.b16 %v1263_v20  ;;  %v5670_v22 = vld [vmem:[#allocation2] sm:$0xf0] }
 0x1e5   : > { %v6953_v50 = vpop.f32.mrf.mxu0  ;;  %4018 = vmatpush.bf16.msra.mxu0 %v5385_v43 }
 0x1e6   : > { %7979 = vst [vmem:[#allocation51_spill] sm:$0xff] %v6953_v50 }
 0x1e7   : > { %3575 = vmatpush.bf16.msrb.mxu3 %v5343_v0 }
 0x1e8   : > { %3731 = vmatmul.bf16.gmra.mxu0 %v6785_v44  ;;  %v3526_v7 = vpop.f32.mrf.mxu2  ;;  %v3442_v10 = vpop.f32.mrf.mxu1  ;;  %v2297_v44 = vsel %vm1818_vm9, %v2295_v26, %v2296_v4  ;;  %v6969_v26 = vld [vmem:[#allocation2 + $0x84] sm:$0xff]  }
 0x1e9   : > { %v6955_v52 = vadd.f32 %v3526_v7, %v3438_v12  ;;  %4019 = vmatpush.bf16.msra.mxu0 %v5384_v28  ;;  %v1729_v12 = vsel %vm1561_vm0, %v1724_v55, %v1728_v35  ;;  %v5383_v7 = vld [vmem:[#allocation8 + $0x1c8] sm:$0xff]  ;;  %v6150_v4 = vld [vmem:[#allocation2 + $0x84] sm:$0xf0]  ;;  %v2098_v28 = vsel %vm1561_vm0, %v6614_v40, %v2097_v8  ;;  %v6975_v35 = vpack.c.b16 %v1543_v45, %v1543_v45  ;;  %v5342_v45 = vld [vmem:[#allocation8 + $0x80] sm:$0xff] }
 0x1ea   : > { %v5701_v55 = vld [vmem:[#allocation2 + $0x48] sm:$0xe]  ;;  %v3443_v9 = vadd.f32 %v6929_v59, %v3442_v10  ;;  %v6152_v0 = vor.u32 %v6151_v25, %v6150_v4 }
 0x1eb   : > { %7980 = vst [vmem:[#allocation52_spill] sm:$0xff] %v6955_v52  ;;  %v5702_v20 = vor.u32 %v5701_v55, %v5700_v5  ;;  %v1738_v8 = vshll.u32 %v6975_v35, 16  ;;  %3576 = vmatpush.bf16.msrb.mxu3 %v5342_v45  ;;  %v5397_v52 = vld [vmem:[#allocation8 + $0x238] sm:$0xff] }
 0x1ec   : > { %4103 = vmatpush.bf16.msra.mxu1 %v5397_v52 }
 0x1ed   : > { %v6971_v49 = vpop.f32.mrf.mxu0  ;;  %4020 = vmatpush.bf16.msra.mxu0 %v5383_v7  ;;  %v2299_v7 = vrot.slane %v6951_v6, 1  ;;  %v2298_v5 = vrot.slane %v5702_v20, 1  ;;  %v1740_v25 = vrot.slane %v1738_v8, 1  ;;  %v4955_v8 = vld [vmem:[#allocation2 + $0xa4] sm:$0x1] }
 0x1ee   : > { %3864 = vmatmul.bf16.gmra.mxu2 %v2297_v44  ;;  %7982 = vst [vmem:[#allocation54_spill] sm:$0xff] %v6971_v49  ;;  %v4886_v44 = vld [vmem:[#allocation2 + $0x5c] sm:$0x1]  ;;  %v2102_v49 = vshll.u32 %v6677_v2, 16 }
 0x1f0   : > { %v3529_v33 = vpop.f32.mrf.mxu2  ;;  %v3445_v43 = vpop.f32.mrf.mxu1 }
 0x1f1   : > { %v6966_v23 = vadd.f32 %v3529_v33, %v3441_v42  ;;  %v6977_v42 = vpack.c.b16 %v2468_v57, %v2468_v57  ;;  %v2001_v33 = vunpack.c.l.b16 %v4886_v44  ;;  %4021 = vmatpush.bf16.msra.mxu0 %v5382_v48  ;;  %v2774_v57 = vrot.slane %v6152_v0, 1 }
 0x1f2   : > { %v2300_v44 = vsel %vm1818_vm9, %v2298_v5, %v2299_v7  ;;  %v2104_v48 = vrot.slane %v2102_v49, 1  ;;  %v3446_v20 = vadd.f32 %v6929_v59, %v3445_v43  ;;  %v2100_v0 = vshrl.u32 %v6677_v2, 16  ;;  %v4944_v43 = vld [vmem:[#allocation2 + $0x20] sm:$0x1] }
 0x1f3   : > { %7981 = vst [vmem:[#allocation53_spill] sm:$0xff] %v6966_v23  ;;  %v2017_v55 = vpack.c.b16 %v2001_v33, %v2001_v33  ;;  %v1741_v7 = vsel %vm1561_vm0, %v6805_v51, %v1740_v25  ;;  %v1745_v25 = vshll.u32 %v6862_v1, 16 }
 0x1f4   : > { %3553 = vmatmul.bf16.gmra.mxu3 %v1729_v12  ;;  %3780 = vmatmul.bf16.gmra.mxu1 %v2098_v28  ;;  %v2775_v28 = vrot.slane %v6977_v42, 1  ;;  %v2105_v45 = vor.u32 %v2104_v48, %v2100_v0  ;;  %v7006_v48 = vld [vmem:[#allocation2 + $0x9c] sm:$0xff]   ;;  %v2470_v0 = vunpack.c.l.b16 %v4955_v8 }
 0x1f5   : > { %v6991_v4 = vpop.f32.mrf.mxu0  ;;  %v2107_v50 = vshll.u32 %v2017_v55, 16 }
 0x1f6   : > { %v6989_v6 = vsel %vm1818_vm9, %v2774_v57, %v2775_v28  ;;  %7985 = vst [vmem:[#allocation57_spill] sm:$0xff] %v6991_v4  ;;  %v4887_v57 = vld [vmem:[#allocation2 + $0x68] sm:$0x1]  ;;  %v5381_v28 = vld [vmem:[#allocation8 + $0x1b8] sm:$0xff] }
 0x1f7   : > { %7984 = vst [vmem:[#allocation56_spill] sm:$0xff] %v6989_v6  ;;  %v2002_v2 = vunpack.c.l.b16 %v4887_v57  ;;  %3925 = vmatpush.bf16.msra.mxu3 %v5381_v28  ;;  %v2302_v57 = vrot.slane %v2017_v55, 1  ;;  %v6154_v28 = vld [vmem:[#allocation2 + $0x9c] sm:$0xe] }
 0x1f8   : > { %3736 = vmatmul.bf16.gmra.mxu0 %v6961_v3  ;;  %v3531_v12 = vpop.f32.mrf.mxu2  ;;  %v3447_v10 = vpop.f32.mrf.mxu1 }
 0x1f9   : > { %v6983_v40 = vadd.f32 %v3531_v12, %v3443_v9  ;;  %v5927_v9 = vld [vmem:[#allocation2 + $0x54] sm:$0xe]  ;;  %v1264_v12 = vld [vmem:[#allocation2 + $0xbc] sm:$0x1] }
 0x1fa   : > { %v1544_v5 = vunpack.c.l.b16 %v1264_v12  ;;  %v5928_v4 = vor.u32 %v5927_v9, %v6679_v56  ;;  %v6153_v12 = vld [vmem:[#allocation2 + $0x9c] sm:$0xf0] }
 0x1fb   : > { %7983 = vst [vmem:[#allocation55_spill] sm:$0xff] %v6983_v40 }
 0x1fc   : > { %v2301_v9 = vrot.slane %v5928_v4, 1 }
 0x1fd   : > { %v7009_v56 = vpop.f32.mrf.mxu0 }
 0x1fe   : > { %3869 = vmatmul.bf16.gmra.mxu2 %v2300_v44  ;;  %v2109_v44 = vrot.slane %v2107_v50, 1  ;;  %v3448_v50 = vadd.f32 %v6929_v59, %v3447_v10  ;;  %7987 = vst [vmem:[#allocation59_spill] sm:$0xff] %v7009_v56  ;;  %v6155_v56 = vor.u32 %v6154_v28, %v6153_v12  ;;  %v2303_v4 = vsel %vm1818_vm9, %v2301_v9, %v2302_v57 }
 0x200   : > { %v3534_v58 = vpop.f32.mrf.mxu2  ;;  %v3450_v49 = vpop.f32.mrf.mxu1 }
 0x201   : > { %v6995_v33 = vadd.f32 %v3534_v58, %v3446_v20  ;;  %v2110_v58 = vsel %vm1561_vm0, %v2105_v45, %v2109_v44  ;;  %v7003_v20 = vpack.c.b16 %v1544_v5, %v1544_v5  ;;  %v1743_v5 = vshrl.u32 %v6862_v1, 16 }
 0x202   : > { %v2018_v44 = vpack.c.b16 %v2002_v2, %v2002_v2 }
 0x203   : > { %7986 = vst [vmem:[#allocation58_spill] sm:$0xff] %v6995_v33  ;;  %v1747_v33 = vrot.slane %v1745_v25, 1  ;;  %v1750_v8 = vshll.u32 %v7003_v20, 16 }
 0x204   : > { %3558 = vmatmul.bf16.gmra.mxu3 %v1741_v7  ;;  %3785 = vmatmul.bf16.gmra.mxu1 %v2110_v58  ;;  %v2459_v7 = vunpack.c.l.b16 %v4944_v43  ;;  %v5662_v58 = vld [vmem:[#allocation2 + $0x18] sm:$0xff]   ;;  %v7016_v43 = vpack.c.b16 %v2470_v0, %v2470_v0  ;;  %v2119_v55 = vshll.u32 %v2018_v44, 16  ;;  %v3451_v0 = vadd.f32 %v6929_v59, %v3450_v49 }
 0x205   : > { %v2494_v23 = vshll.u32 %v5662_v58, 16  ;;  %v1748_v1 = vor.u32 %v1747_v33, %v1743_v5  ;;  %v1752_v2 = vrot.slane %v1750_v8, 1  ;;  %v7027_v9 = vpop.f32.mrf.mxu0 }
 0x206   : > { %v7018_v10 = vpack.c.b16 %v2459_v7, %v2459_v7  ;;  %v2781_v25 = vrot.slane %v7016_v43, 1  ;;  %7990 = vst [vmem:[#allocation62_spill] sm:$0xff] %v7027_v9  ;;  %v2121_v5 = vrot.slane %v2119_v55, 1  ;;  %v5704_v9 = vld [vmem:[#allocation2 + $0x60] sm:$0xe]  ;;  %v7991_v55 = vunpack.c.h.b16 %v6636_v15 }
 0x207   : > { %v2496_v28 = vrot.slane %v2494_v23, 1  ;;  %v1753_v33 = vsel %vm1561_vm0, %v1748_v1, %v1752_v2  ;;  %v5705_v1 = vor.u32 %v5704_v9, %v5703_v13  ;;  %v1820_v13 = vrot.slane %v6438_v36, 1 }
 0x208   : > { %3741 = vmatmul.bf16.gmra.mxu0 %v7000_v18  ;;  %v3536_v45 = vpop.f32.mrf.mxu2  ;;  %v3452_v40 = vpop.f32.mrf.mxu1  ;;  %v2122_v23 = vsel %vm1561_vm0, %v6675_v53, %v2121_v5 }
 0x209   : > { %v7013_v6 = vadd.f32 %v3536_v45, %v3448_v50  ;;  %v2780_v50 = vrot.slane %v6155_v56, 1  ;;  %v2499_v45 = vshll.u32 %v7018_v10, 16  ;;  %v2492_v56 = vshrl.u32 %v5662_v58, 16 }
 0x20a   : > { %v3453_v2 = vadd.f32 %v6929_v59, %v3452_v40  ;;  %v2304_v53 = vrot.slane %v5705_v1, 1 }
 0x20b   : > { %7988 = vst [vmem:[#allocation60_spill] sm:$0xff] %v7013_v6  ;;  %v7025_v7 = vsel %vm1818_vm9, %v2780_v50, %v2781_v25  ;;  %v2501_v8 = vrot.slane %v2499_v45, 1  ;;  %v2497_v49 = vor.u32 %v2496_v28, %v2492_v56  ;;  %v5671_v50 = vld [vmem:[#allocation2] sm:$0xe]  ;;  %v4888_v25 = vld [vmem:[#allocation2 + $0x74] sm:$0x1] }
 0x20c   : > { %7989 = vst [vmem:[#allocation61_spill] sm:$0xff] %v7025_v7  ;;  %v5672_v45 = vor.u32 %v5671_v50, %v5670_v22  ;;  %v2126_v56 = vshll.u32 %v6763_v32, 16 }
 0x20d   : > { %v7045_v9 = vpop.f32.mrf.mxu0 }
 0x20e   : > { %3874 = vmatmul.bf16.gmra.mxu2 %v2303_v4  ;;  %v5899_v4 = vld [vmem:[#allocation2 + $0x24] sm:$0xff]   ;;  %7993 = vst [vmem:[#allocation64_spill] sm:$0xff] %v7045_v9  ;;  %v2128_v22 = vrot.slane %v2126_v56, 1 }
 0x20f   : > { %v2381_v6 = vunpack.c.l.b16 %v5899_v4 }
 0x210   : > { %v3539_v12 = vpop.f32.mrf.mxu2 }
 0x211   : > { %v7029_v57 = vadd.f32 %v3539_v12, %v3451_v0  ;;  %v3455_v52 = vpop.f32.mrf.mxu1  ;;  %v2502_v0 = vsel %vm1561_vm0, %v2497_v49, %v2501_v8  ;;  %v7037_v58 = vpack.c.b16 %v7991_v55, %v2381_v6  ;;  %v2003_v12 = vunpack.c.l.b16 %v4888_v25 }
 0x212   : > { %v1819_v6 = vrot.slane %v5672_v45, 1  ;;  %v3456_v50 = vadd.f32 %v6929_v59, %v3455_v52  ;;  %v2511_v55 = vshll.u32 %v6651_v61, 16 }
 0x213   : > { %v2506_v5 = vshll.u32 %v7037_v58, 16  ;;  %v2019_v8 = vpack.c.b16 %v2003_v12, %v2003_v12  ;;  %v2504_v36 = vshrl.u32 %v7037_v58, 16 }
 0x214   : > { %3563 = vmatmul.bf16.gmra.mxu3 %v1753_v33  ;;  %3790 = vmatmul.bf16.gmra.mxu1 %v2122_v23  ;;  %v2305_v33 = vrot.slane %v2018_v44, 1  ;;  %v5930_v44 = vld [vmem:[#allocation2 + $0x6c] sm:$0xe]  ;;  %v1821_v25 = vsel %vm1818_vm9, %v1819_v6, %v1820_v13  ;;  %v2124_v23 = vshrl.u32 %v6763_v32, 16  ;;  %v2513_v32 = vrot.slane %v2511_v55, 1 }
 0x215   : > { %v2508_v49 = vrot.slane %v2506_v5, 1  ;;  %v4946_v5 = vld [vmem:[#allocation2 + $0x38] sm:$0x1]  ;;  %v7058_v13 = vpop.f32.mrf.mxu0 }
 0x216   : > { %v2306_v40 = vsel %vm1818_vm9, %v2304_v53, %v2305_v33  ;;  %v2129_v45 = vor.u32 %v2128_v22, %v2124_v23  ;;  %v5380_v33 = vld [vmem:[#allocation8 + $0x1b0] sm:$0xff]  ;;  %v5931_v53 = vor.u32 %v5930_v44, %v6765_v21  ;;  %7996 = vst [vmem:[#allocation67_spill] sm:$0xff] %v7058_v13  ;;  %v7063_v22 = vld [vmem:[#allocation2 + $0xb4] sm:$0xff]   ;;  %v4957_v44 = vld [vmem:[#allocation2 + $0xbc] sm:$0x1] }
 0x217   : > { %v2509_v12 = vor.u32 %v2508_v49, %v2504_v36  ;;  %3926 = vmatpush.bf16.msra.mxu3 %v5380_v33  ;;  %7997 = vst [vmem:[#allocation68_spill] sm:$0xff] %v7063_v22  ;;  %v6156_v49 = vld [vmem:[#allocation2 + $0xb4] sm:$0xf0]  ;;  %v2308_v36 = vrot.slane %v2019_v8, 1  ;;  %v2472_v55 = vunpack.c.l.b16 %v4957_v44  ;;  %v7082_v44 = vld [vmem:[#allocation2 + $0x3c] sm:$0xff]  }
 0x218   : > { %4022 = vmatmul.bf16.vlgmr.msra.gmra.mxu0 %v2502_v0  ;;  %v3541_v28 = vpop.f32.mrf.mxu2  ;;  %v2131_v0 = vshll.u32 %v2019_v8, 16  ;;  %v2307_v21 = vrot.slane %v5931_v53, 1  ;;  %v5396_v53 = vld [vmem:[#allocation8 + $0x230] sm:$0xff]  ;;  %8001 = vst [vmem:[#allocation72_spill] sm:$0xff] %v7082_v44 }
 0x219   : > { %v7041_v4 = vadd.f32 %v3541_v28, %v3453_v2  ;;  %v3457_v15 = vpop.f32.mrf.mxu1  ;;  %v4889_v28 = vld [vmem:[#allocation2 + $0x80] sm:$0x1]  ;;  %v7071_v13 = vpack.c.b16 %v2472_v55, %v2472_v55  ;;  %4104 = vmatpush.bf16.msra.mxu1 %v5396_v53  ;;  %v4890_v53 = vld [vmem:[#allocation2 + $0x8c] sm:$0x1] }
 0x21a   : > { %v2133_v52 = vrot.slane %v2131_v0, 1  ;;  %v3458_v23 = vadd.f32 %v6929_v59, %v3457_v15  ;;  %v6157_v0 = vld [vmem:[#allocation2 + $0xb4] sm:$0xe]  ;;  %v2309_v15 = vsel %vm1818_vm9, %v2307_v21, %v2308_v36 }
 0x21b   : > { %7992 = vst [vmem:[#allocation63_spill] sm:$0xff] %v7041_v4 }
 0x21c   : > { %v2134_v61 = vsel %vm1561_vm0, %v2129_v45, %v2133_v52 }
 0x21e   : > { %3879 = vmatmul.bf16.gmra.mxu2 %v2306_v40  ;;  %v2004_v40 = vunpack.c.l.b16 %v4889_v28  ;;  %v5663_v28 = vld [vmem:[#allocation2 + $0x30] sm:$0xff]  }
 0x21f   : > { %v2516_v36 = vshrl.u32 %v5663_v28, 16 }
 0x220   : > { %v2020_v45 = vpack.c.b16 %v2004_v40, %v2004_v40 }
 0x221   : > { %v3544_v1 = vpop.f32.mrf.mxu2  ;;  %v7055_v56 = vpop.f32.mrf.mxu1 }
 0x222   : > { %v7053_v2 = vadd.f32 %v3544_v1, %v3456_v50  ;;  %7995 = vst [vmem:[#allocation66_spill] sm:$0xff] %v7055_v56  ;;  %v2514_v50 = vsel %vm1561_vm0, %v2509_v12, %v2513_v32  ;;  %v2143_v8 = vshll.u32 %v2020_v45, 16  ;;  %v5707_v56 = vld [vmem:[#allocation2 + $0x78] sm:$0xe] }
 0x224   : > { %7994 = vst [vmem:[#allocation65_spill] sm:$0xff] %v7053_v2  ;;  %3577 = vmatmul.bf16.vlgmr.msrb.gmra.mxu3 %v1821_v25  ;;  %3795 = vmatmul.bf16.gmra.mxu1 %v2134_v61  ;;  %v2461_v25 = vunpack.c.l.b16 %v4946_v5  ;;  %v6158_v61 = vor.u32 %v6157_v0, %v6156_v49  ;;  %v2518_v5 = vshll.u32 %v5663_v28, 16  ;;  %v7084_v49 = vld [vmem:[#allocation2 + $0x3c] sm:$0xf0]  ;;  %v2311_v28 = vrot.slane %v2020_v45, 1 }
 0x226   : > { %v7069_v52 = vpack.c.b16 %v2461_v25, %v2461_v25  ;;  %v7080_v25 = vpop.f32.mrf.mxu0  ;;  %v2520_v0 = vrot.slane %v2518_v5, 1 }
 0x227   : > { %v7060_v6 = vpop.f32.mrf.mxu3  ;;  %8000 = vst [vmem:[#allocation71_spill] sm:$0xff] %v7080_v25 }
 0x228   : > { %4027 = vmatmul.bf16.gmra.mxu0 %v2514_v50  ;;  %v2786_v50 = vrot.slane %v6158_v61, 1  ;;  %v2523_v40 = vshll.u32 %v7069_v52, 16  ;;  %v2521_v9 = vor.u32 %v2520_v0, %v2516_v36 }
 0x229   : > { %v3546_v1 = vpop.f32.mrf.mxu2  ;;  %v7073_v12 = vpop.f32.mrf.mxu1 }
 0x22a   : > { %v7067_v33 = vadd.f32 %v3546_v1, %v3458_v23  ;;  %7999 = vst [vmem:[#allocation70_spill] sm:$0xff] %v7073_v12  ;;  %v2787_v23 = vrot.slane %v7071_v13, 1  ;;  %v2145_v1 = vrot.slane %v2143_v8, 1  ;;  %v2525_v55 = vrot.slane %v2523_v40, 1 }
 0x22b   : > { %v2150_v40 = vshll.u32 %v6827_v24, 16 }
 0x22c   : > { %7998 = vst [vmem:[#allocation69_spill] sm:$0xff] %v7067_v33  ;;  %v7087_v21 = vsel %vm1818_vm9, %v2786_v50, %v2787_v23  ;;  %v2146_v25 = vsel %vm1561_vm0, %v6743_v63, %v2145_v1  ;;  %v4947_v33 = vld [vmem:[#allocation2 + $0x44] sm:$0x1]  ;;  %v2526_v5 = vsel %vm1561_vm0, %v2521_v9, %v2525_v55  ;;  %v5673_v50 = vld [vmem:[#allocation2 + $0x18] sm:$0xf0] }
 0x22d   : > { %8002 = vst [vmem:[#allocation73_spill] sm:$0xff] %v7087_v21  ;;  %v2462_v23 = vunpack.c.l.b16 %v4947_v33  ;;  %v2530_v21 = vshll.u32 %v7082_v44, 16  ;;  %v1826_v33 = vrot.slane %v6528_v30, 1  ;;  %v2152_v45 = vrot.slane %v2150_v40, 1  ;;  %v4948_v40 = vld [vmem:[#allocation2 + $0x50] sm:$0x1] }
 0x22e   : > { %3884 = vmatmul.bf16.gmra.mxu2 %v2309_v15  ;;  %v5706_v15 = vld [vmem:[#allocation2 + $0x78] sm:$0xf0]  ;;  %v7098_v0 = vpop.f32.mrf.mxu0 }
 0x22f   : > { %v7076_v32 = vpop.f32.mrf.mxu3  ;;  %v5708_v8 = vor.u32 %v5707_v56, %v5706_v15  ;;  %8004 = vst [vmem:[#allocation75_spill] sm:$0xff] %v7098_v0  ;;  %v7104_v56 = vpack.c.b16 %v2462_v23, %v2462_v23  ;;  %v2532_v15 = vrot.slane %v2530_v21, 1  ;;  %v5933_v0 = vld [vmem:[#allocation2 + $0x84] sm:$0xe]  ;;  %v4891_v23 = vld [vmem:[#allocation2 + $0x98] sm:$0x1] }
 0x231   : > { %v7090_v61 = vpop.f32.mrf.mxu1  ;;  %v2310_v36 = vrot.slane %v5708_v8, 1 }
 0x232   : > { %8003 = vst [vmem:[#allocation74_spill] sm:$0xff] %v7090_v61  ;;  %v5674_v61 = vld [vmem:[#allocation2 + $0x18] sm:$0xe] }
 0x233   : > { %v5675_v1 = vor.u32 %v5674_v61, %v5673_v50  ;;  %v2312_v9 = vsel %vm1818_vm9, %v2310_v36, %v2311_v28  ;;  %v2535_v61 = vshll.u32 %v7104_v56, 16  ;;  %v5379_v36 = vld [vmem:[#allocation8 + $0x1a8] sm:$0xff] }
 0x234   : > { %3582 = vmatmul.bf16.gmra.mxu3 %v6519_v14  ;;  %3800 = vmatmul.bf16.gmra.mxu1 %v2146_v25  ;;  %v2005_v14 = vunpack.c.l.b16 %v4890_v53 }
 0x235   : > { %v1825_v53 = vrot.slane %v5675_v1, 1  ;;  %v5934_v1 = vor.u32 %v5933_v0, %v6829_v39  ;;  %3927 = vmatpush.bf16.msra.mxu3 %v5379_v36  ;;  %v5395_v36 = vld [vmem:[#allocation8 + $0x228] sm:$0xff] }
 0x236   : > { %v2021_v25 = vpack.c.b16 %v2005_v14, %v2005_v14  ;;  %4105 = vmatpush.bf16.msra.mxu1 %v5395_v36  ;;  %v5710_v36 = vld [vmem:[#allocation2 + $0x90] sm:$0xe] }
 0x237   : > { %v7092_v12 = vpop.f32.mrf.mxu3  ;;  %v1827_v14 = vsel %vm1818_vm9, %v1825_v53, %v1826_v33  ;;  %v2006_v33 = vunpack.c.l.b16 %v4891_v23  ;;  %v7134_v23 = vld [vmem:[#allocation2 + $0x54] sm:$0xf0] }
 0x238   : > { %4032 = vmatmul.bf16.gmra.mxu0 %v2526_v5  ;;  %v2148_v5 = vshrl.u32 %v6827_v24, 16  ;;  %v2155_v8 = vshll.u32 %v2021_v25, 16  ;;  %v2537_v24 = vrot.slane %v2535_v61, 1  ;;  %v2314_v53 = vrot.slane %v2021_v25, 1  ;;  %v7132_v25 = vld [vmem:[#allocation2 + $0x54] sm:$0xff]  }
 0x239   : > { %v7101_v63 = vpop.f32.mrf.mxu1  ;;  %8010 = vst [vmem:[#allocation81_spill] sm:$0xff] %v7132_v25 }
 0x23a   : > { %8005 = vst [vmem:[#allocation76_spill] sm:$0xff] %v7101_v63  ;;  %v2528_v63 = vshrl.u32 %v7082_v44, 16  ;;  %v2153_v28 = vor.u32 %v2152_v45, %v2148_v5  ;;  %v2157_v21 = vrot.slane %v2155_v8, 1  ;;  %v2463_v45 = vunpack.c.l.b16 %v4948_v40 }
 0x23b   : > { %v2022_v5 = vpack.c.b16 %v2006_v33, %v2006_v33  ;;  %v4892_v33 = vld [vmem:[#allocation2 + $0xa4] sm:$0x1] }
 0x23c   : > { %v2533_v50 = vor.u32 %v2532_v15, %v2528_v63  ;;  %v2158_v2 = vsel %vm1561_vm0, %v2153_v28, %v2157_v21  ;;  %v2313_v15 = vrot.slane %v5934_v1, 1  ;;  %v7122_v8 = vpack.c.b16 %v2463_v45, %v2463_v45  ;;  %v5709_v45 = vld [vmem:[#allocation2 + $0x90] sm:$0xf0] }
 0x23e   : > { %3889 = vmatmul.bf16.gmra.mxu2 %v2312_v9  ;;  %v7113_v9 = vpop.f32.mrf.mxu0  ;;  %v2538_v63 = vsel %vm1561_vm0, %v2533_v50, %v2537_v24  ;;  %v2315_v39 = vsel %vm1818_vm9, %v2313_v15, %v2314_v53  ;;  %v2547_v50 = vshll.u32 %v7122_v8, 16 }
 0x23f   : > { %v7106_v55 = vpop.f32.mrf.mxu3  ;;  %8006 = vst [vmem:[#allocation77_spill] sm:$0xff] %v7113_v9 }
 0x240   : > { %v2549_v1 = vrot.slane %v2547_v50, 1  ;;  %v5676_v50 = vld [vmem:[#allocation2 + $0x30] sm:$0xf0] }
 0x241   : > { %v7115_v30 = vpop.f32.mrf.mxu1 }
 0x242   : > { %8007 = vst [vmem:[#allocation78_spill] sm:$0xff] %v7115_v30  ;;  %v7143_v30 = vpop.f32.mrf.mxu2 }
 0x243   : > { %8012 = vst [vmem:[#allocation83_spill] sm:$0xff] %v7143_v30 }
 0x244   : > { %3587 = vmatmul.bf16.gmra.mxu3 %v1827_v14  ;;  %3805 = vmatmul.bf16.gmra.mxu1 %v2158_v2  ;;  %v5664_v14 = vld [vmem:[#allocation2 + $0x48] sm:$0xff]   ;;  %v2167_v2 = vshll.u32 %v2022_v5, 16 }
 0x245   : > { %v2542_v0 = vshll.u32 %v5664_v14, 16  ;;  %v2540_v24 = vshrl.u32 %v5664_v14, 16  ;;  %v5711_v14 = vor.u32 %v5710_v36, %v5709_v45  ;;  %v5936_v36 = vld [vmem:[#allocation2 + $0x9c] sm:$0xe] }
 0x246   : > { %v7127_v9 = vpop.f32.mrf.mxu0  ;;  %v2169_v40 = vrot.slane %v2167_v2, 1  ;;  %v2317_v2 = vrot.slane %v2022_v5, 1  ;;  %v1832_v5 = vrot.slane %v6565_v54, 1 }
 0x247   : > { %v7118_v7 = vpop.f32.mrf.mxu3  ;;  %8009 = vst [vmem:[#allocation80_spill] sm:$0xff] %v7127_v9  ;;  %v2544_v21 = vrot.slane %v2542_v0, 1  ;;  %v2007_v9 = vunpack.c.l.b16 %v4892_v33  ;;  %v2316_v44 = vrot.slane %v5711_v14, 1 }
 0x248   : > { %4037 = vmatmul.bf16.gmra.mxu0 %v2538_v63 }
 0x249   : > { %v7124_v61 = vpop.f32.mrf.mxu1  ;;  %v2545_v15 = vor.u32 %v2544_v21, %v2540_v24  ;;  %v2174_v24 = vshll.u32 %v6871_v47, 16 }
 0x24a   : > { %8008 = vst [vmem:[#allocation79_spill] sm:$0xff] %v7124_v61  ;;  %v4949_v61 = vld [vmem:[#allocation2 + $0x5c] sm:$0x1] }
 0x24b   : > { %v2464_v21 = vunpack.c.l.b16 %v4949_v61  ;;  %v2172_v61 = vshrl.u32 %v6871_v47, 16  ;;  %v4893_v47 = vld [vmem:[#allocation2 + $0xb0] sm:$0x1] }
 0x24e   : > { %3894 = vmatmul.bf16.gmra.mxu2 %v2315_v39  ;;  %v2170_v39 = vsel %vm1561_vm0, %v6924_v11, %v2169_v40  ;;  %v7146_v0 = vpop.f32.mrf.mxu0  ;;  %v5677_v11 = vld [vmem:[#allocation2 + $0x30] sm:$0xe]  ;;  %v2554_v40 = vshll.u32 %v7132_v25, 16 }
 0x24f   : > { %v7129_v28 = vpop.f32.mrf.mxu3  ;;  %8013 = vst [vmem:[#allocation84_spill] sm:$0xff] %v7146_v0  ;;  %v5678_v30 = vor.u32 %v5677_v11, %v5676_v50  ;;  %v7159_v0 = vpop.f32.mrf.mxu2  ;;  %v2552_v50 = vshrl.u32 %v7132_v25, 16  ;;  %v5937_v25 = vor.u32 %v5936_v36, %v6873_v31 }
 0x250   : > { %8015 = vst [vmem:[#allocation86_spill] sm:$0xff] %v7159_v0 }
 0x251   : > { %v7137_v63 = vpop.f32.mrf.mxu1  ;;  %v1831_v14 = vrot.slane %v5678_v30, 1  ;;  %v3461_v30 = vadd.f32 %v6929_v59, %v7060_v6 }
 0x252   : > { %8011 = vst [vmem:[#allocation82_spill] sm:$0xff] %v7137_v63  ;;  %v2023_v63 = vpack.c.b16 %v2007_v9, %v2007_v9 }
 0x254   : > { %3592 = vmatmul.bf16.gmra.mxu3 %v6562_v46  ;;  %3810 = vmatmul.bf16.gmra.mxu1 %v2170_v39  ;;  %v2550_v46 = vsel %vm1561_vm0, %v2545_v15, %v2549_v1  ;;  %v2318_v39 = vsel %vm1818_vm9, %v2316_v44, %v2317_v2  ;;  %v7153_v1 = vpack.c.b16 %v2464_v21, %v2464_v21  ;;  %v2176_v15 = vrot.slane %v2174_v24, 1  ;;  %v5378_v24 = vld [vmem:[#allocation8 + $0x1a0] sm:$0xff] }
 0x255   : > { %v2179_v9 = vshll.u32 %v2023_v63, 16  ;;  %v1833_v21 = vsel %vm1818_vm9, %v1831_v14, %v1832_v5  ;;  %3928 = vmatpush.bf16.msra.mxu3 %v5378_v24  ;;  %v2008_v5 = vunpack.c.l.b16 %v4893_v47  ;;  %v2320_v14 = vrot.slane %v2023_v63, 1  ;;  %v5712_v24 = vld [vmem:[#allocation2 + $0xa8] sm:$0xf0] }
 0x256   : > { %v2559_v44 = vshll.u32 %v7153_v1, 16  ;;  %v7163_v2 = vpop.f32.mrf.mxu0  ;;  %v2177_v11 = vor.u32 %v2176_v15, %v2172_v61 }
 0x257   : > { %v7139_v53 = vpop.f32.mrf.mxu3  ;;  %8016 = vst [vmem:[#allocation87_spill] sm:$0xff] %v7163_v2  ;;  %v2024_v6 = vpack.c.b16 %v2008_v5, %v2008_v5 }
 0x258   : > { %4042 = vmatmul.bf16.gmra.mxu0 %v2550_v46  ;;  %v2556_v46 = vrot.slane %v2554_v40, 1  ;;  %v2561_v0 = vrot.slane %v2559_v44, 1  ;;  %v7177_v44 = vpop.f32.mrf.mxu2 }
 0x259   : > { %v7150_v33 = vpop.f32.mrf.mxu1 }
 0x25a   : > { %8014 = vst [vmem:[#allocation85_spill] sm:$0xff] %v7150_v33  ;;  %v2557_v54 = vor.u32 %v2556_v46, %v2552_v50  ;;  %v4950_v33 = vld [vmem:[#allocation2 + $0x68] sm:$0x1]  ;;  %v2319_v46 = vrot.slane %v5937_v25, 1  ;;  %v7175_v50 = vld [vmem:[#allocation2 + $0x60] sm:$0xff]   ;;  %v2191_v25 = vshll.u32 %v2024_v6, 16 }
 0x25c   : > { %v2562_v15 = vsel %vm1561_vm0, %v2557_v54, %v2561_v0  ;;  %v2566_v0 = vshll.u32 %v7175_v50, 16  ;;  %v2193_v47 = vrot.slane %v2191_v25, 1 }
 0x25e   : > { %3899 = vmatmul.bf16.gmra.mxu2 %v2318_v39  ;;  %v2181_v39 = vrot.slane %v2179_v9, 1  ;;  %v2465_v9 = vunpack.c.l.b16 %v4950_v33  ;;  %v7181_v36 = vpop.f32.mrf.mxu0  ;;  %v5394_v33 = vld [vmem:[#allocation8 + $0x220] sm:$0xff]  ;;  %v2568_v54 = vrot.slane %v2566_v0, 1  ;;  %v2194_v25 = vsel %vm1561_vm0, %v6805_v51, %v2193_v47  ;;  %v5680_v47 = vld [vmem:[#allocation2 + $0x48] sm:$0xe] }
 0x25f   : > { %v7155_v45 = vpop.f32.mrf.mxu3  ;;  %8018 = vst [vmem:[#allocation89_spill] sm:$0xff] %v7181_v36  ;;  %4106 = vmatpush.bf16.msra.mxu1 %v5394_v33 }
 0x260   : > { %v2182_v2 = vsel %vm1561_vm0, %v2177_v11, %v2181_v39  ;;  %v7179_v31 = vpack.c.b16 %v2465_v9, %v2465_v9  ;;  %v5900_v9 = vld [vmem:[#allocation2 + $0x6c] sm:$0xff]  }
 0x261   : > { %v7168_v40 = vpop.f32.mrf.mxu1 }
 0x262   : > { %8017 = vst [vmem:[#allocation88_spill] sm:$0xff] %v7168_v40  ;;  %v2571_v39 = vshll.u32 %v7179_v31, 16 }
 0x264   : > { %3597 = vmatmul.bf16.gmra.mxu3 %v1833_v21  ;;  %3815 = vmatmul.bf16.gmra.mxu1 %v2182_v2  ;;  %v2321_v2 = vsel %vm1818_vm9, %v2319_v46, %v2320_v14  ;;  %v2573_v5 = vrot.slane %v2571_v39, 1  ;;  %v2393_v46 = vunpack.c.l.b16 %v5900_v9  ;;  %v3466_v14 = vadd.f32 %v6929_v59, %v7092_v12  ;;  %v5393_v12 = vld [vmem:[#allocation8 + $0x218] sm:$0xff] }
 0x265   : > { %v8021_v9 = vunpack.c.h.b16 %v6878_v41  ;;  %4107 = vmatpush.bf16.msra.mxu1 %v5393_v12  ;;  %v3468_v41 = vadd.f32 %v6929_v59, %v7106_v55 }
 0x266   : > { %v7198_v33 = vpop.f32.mrf.mxu0 }
 0x267   : > { %v3549_v4 = vpop.f32.mrf.mxu3  ;;  %8020 = vst [vmem:[#allocation91_spill] sm:$0xff] %v7198_v33  ;;  %v2198_v33 = vshll.u32 %v6961_v3, 16 }
 0x268   : > { %v7172_v61 = vadd.f32 %v3549_v4, %v3461_v30  ;;  %4047 = vmatmul.bf16.gmra.mxu0 %v2562_v15  ;;  %v3463_v4 = vadd.f32 %v6929_v59, %v7076_v32  ;;  %v5713_v30 = vld [vmem:[#allocation2 + $0xa8] sm:$0xe]  ;;  %v2564_v32 = vshrl.u32 %v7175_v50, 16  ;;  %v4894_v15 = vld [vmem:[#allocation2 + $0xbc] sm:$0x1] }
 0x269   : > { %v7187_v63 = vpop.f32.mrf.mxu1 }
 0x26a   : > { %8019 = vst [vmem:[#allocation90_spill] sm:$0xff] %v7187_v63  ;;  %v7207_v63 = vpack.c.b16 %v8021_v9, %v2393_v46 }
 0x26e   : > { %3904 = vmatmul.bf16.gmra.mxu2 %v2321_v2  ;;  %v2569_v2 = vor.u32 %v2568_v54, %v2564_v32  ;;  %v5679_v32 = vld [vmem:[#allocation2 + $0x48] sm:$0xf0]  ;;  %v7225_v55 = vpop.f32.mrf.mxu0 }
 0x26f   : > { %v3551_v21 = vpop.f32.mrf.mxu3  ;;  %8023 = vst [vmem:[#allocation93_spill] sm:$0xff] %v7225_v55 }
 0x270   : > { %v7189_v11 = vadd.f32 %v3551_v21, %v3463_v4  ;;  %v7196_v4 = vpop.f32.mrf.mxu2  ;;  %v5714_v21 = vor.u32 %v5713_v30, %v5712_v24  ;;  %v2574_v39 = vsel %vm1561_vm0, %v2569_v2, %v2573_v5  ;;  %v2323_v30 = vrot.slane %v2024_v6, 1 }
 0x271   : > { %v7209_v54 = vpop.f32.mrf.mxu1  ;;  %v5681_v5 = vor.u32 %v5680_v47, %v5679_v32  ;;  %v1838_v6 = vrot.slane %v6600_v19, 1  ;;  %v5391_v32 = vld [vmem:[#allocation8 + $0x208] sm:$0xff]  ;;  %v2583_v19 = vshll.u32 %v6895_v29, 16  ;;  %v5942_v29 = vld [vmem:[#allocation2 + $0x54] sm:$0xe] }
 0x272   : > { %8022 = vst [vmem:[#allocation92_spill] sm:$0xff] %v7209_v54  ;;  %v2322_v24 = vrot.slane %v5714_v21, 1  ;;  %v2196_v21 = vshrl.u32 %v6961_v3, 16  ;;  %v5390_v54 = vld [vmem:[#allocation8 + $0x200] sm:$0xff] }
 0x273   : > { %v2585_v55 = vrot.slane %v2583_v19, 1 }
 0x274   : > { %3602 = vmatmul.bf16.gmra.mxu3 %v6608_v34  ;;  %v2009_v34 = vunpack.c.l.b16 %v4894_v15  ;;  %3820 = vmatmul.bf16.gmra.mxu1 %v2194_v25  ;;  %v2578_v15 = vshll.u32 %v7207_v63, 16  ;;  %v2324_v46 = vsel %vm1818_vm9, %v2322_v24, %v2323_v30  ;;  %v1837_v24 = vrot.slane %v5681_v5, 1 }
 0x275   : > { %v2576_v30 = vshrl.u32 %v7207_v63, 16  ;;  %v3471_v5 = vadd.f32 %v6929_v59, %v7118_v7 }
 0x276   : > { %v7212_v51 = vpack.c.b16 %v2009_v34, %v2009_v34  ;;  %v5939_v34 = vld [vmem:[#allocation2 + $0xb4] sm:$0xe]  ;;  %v2580_v12 = vrot.slane %v2578_v15, 1  ;;  %v1839_v3 = vsel %vm1818_vm9, %v1837_v24, %v1838_v6  ;;  %v4952_v15 = vld [vmem:[#allocation2 + $0x80] sm:$0x1] }
 0x277   : > { %v3554_v0 = vpop.f32.mrf.mxu3  ;;  %v5940_v40 = vor.u32 %v5939_v34, %v6963_v27  ;;  %v2210_v27 = vshll.u32 %v7000_v18, 16  ;;  %v7243_v34 = vpop.f32.mrf.mxu0 }
 0x278   : > { %v7202_v36 = vadd.f32 %v3554_v0, %v3466_v14  ;;  %4052 = vmatmul.bf16.gmra.mxu0 %v2574_v39  ;;  %v5392_v14 = vld [vmem:[#allocation8 + $0x210] sm:$0xff]  ;;  %v2200_v0 = vrot.slane %v2198_v33, 1  ;;  %v2203_v25 = vshll.u32 %v7212_v51, 16  ;;  %v7221_v39 = vpop.f32.mrf.mxu2  ;;  %v2326_v7 = vrot.slane %v7212_v51, 1  ;;  %8025 = vst [vmem:[#allocation95_spill] sm:$0xff] %v7243_v34 }
 0x279   : > { %4108 = vmatpush.bf16.msra.mxu1 %v5392_v14  ;;  %v2581_v14 = vor.u32 %v2580_v12, %v2576_v30  ;;  %v2325_v59 = vrot.slane %v5940_v40, 1  ;;  %v5943_v30 = vor.u32 %v5942_v29, %v6625_v60 }
 0x27a   : > { %v2201_v33 = vor.u32 %v2200_v0, %v2196_v21  ;;  %v2205_v47 = vrot.slane %v2203_v25, 1 }
 0x27b   : > { %v2586_v12 = vsel %vm1561_vm0, %v2581_v14, %v2585_v55  ;;  %v7253_v55 = vld [vmem:[%s7903_s4] ss:$0 sm:$0xff]  ;;  %v2208_v14 = vshrl.u32 %v7000_v18, 16 }
 0x27c   : > { %v2206_v21 = vsel %vm1561_vm0, %v2201_v33, %v2205_v47  ;;  %v3473_v40 = vadd.f32 %v7253_v55, %v7129_v28  ;;  %v2327_v33 = vsel %vm1818_vm9, %v2325_v59, %v2326_v7  ;;  %v1841_v47 = vrot.slane %v6633_v17, 1  ;;  %v5716_v17 = vld [vmem:[#allocation2 + $0xc0] sm:$0xe] }
 0x27d   : > { %4109 = vmatpush.bf16.msra.mxu1 %v5391_v32  ;;  %v2467_v32 = vunpack.c.l.b16 %v4952_v15  ;;  %v1840_v15 = vrot.slane %v5943_v30, 1  ;;  %v3476_v30 = vadd.f32 %v7253_v55, %v7139_v53  ;;  %v2602_v53 = vshll.u32 %v6969_v26, 16 }
 0x27e   : > { %3909 = vmatmul.bf16.gmra.mxu2 %v2324_v46  ;;  %v7230_v46 = vpop.f32.mrf.mxu1 }
 0x27f   : > { %v3556_v2 = vpop.f32.mrf.mxu3  ;;  %8024 = vst [vmem:[#allocation94_spill] sm:$0xff] %v7230_v46  ;;  %v4956_v46 = vld [vmem:[#allocation2 + $0xb0] sm:$0x1] }
 0x280   : > { %v7223_v9 = vadd.f32 %v3556_v2, %v3468_v41  ;;  %v4895_v41 = vld [vmem:[#allocation2 + $0xc8] sm:$0x1]  ;;  %v5377_v2 = vld [vmem:[#allocation8 + $0x198] sm:$0xff]  ;;  %v7239_v24 = vpop.f32.mrf.mxu2 }
 0x281   : > { %3929 = vmatpush.bf16.msra.mxu3 %v5377_v2  ;;  %v2010_v0 = vunpack.c.l.b16 %v4895_v41  ;;  %4110 = vmatpush.bf16.msra.mxu1 %v5390_v54  ;;  %v7246_v54 = vld [vmem:[#allocation2 + $0x78] sm:$0xff]   ;;  %v2212_v41 = vrot.slane %v2210_v27, 1  ;;  %v7270_v27 = vpop.f32.mrf.mxu0 }
 0x282   : > { %v2590_v60 = vshll.u32 %v7246_v54, 16  ;;  %v2588_v18 = vshrl.u32 %v7246_v54, 16  ;;  %8028 = vst [vmem:[#allocation98_spill] sm:$0xff] %v7270_v27  ;;  %v5683_v27 = vld [vmem:[#allocation2 + $0x60] sm:$0xe] }
 0x283   : > { %v2026_v19 = vpack.c.b16 %v2010_v0, %v2010_v0  ;;  %v1842_v0 = vsel %vm1818_vm9, %v1840_v15, %v1841_v47 }
 0x284   : > { %3607 = vmatmul.bf16.gmra.mxu3 %v1839_v3  ;;  %3825 = vmatmul.bf16.gmra.mxu1 %v2206_v21  ;;  %v7248_v3 = vpack.c.b16 %v2467_v32, %v2467_v32  ;;  %v2592_v28 = vrot.slane %v2590_v60, 1  ;;  %v2213_v21 = vor.u32 %v2212_v41, %v2208_v14  ;;  %v5715_v32 = vld [vmem:[#allocation2 + $0xc0] sm:$0xf0] }
 0x286   : > { %v7257_v51 = vpop.f32.mrf.mxu1 }
 0x287   : > { %v3559_v6 = vpop.f32.mrf.mxu3  ;;  %8026 = vst [vmem:[#allocation96_spill] sm:$0xff] %v7257_v51  ;;  %v5375_v51 = vld [vmem:[#allocation8 + $0x188] sm:$0xff] }
 0x288   : > { %v7236_v25 = vadd.f32 %v3559_v6, %v3471_v5  ;;  %4057 = vmatmul.bf16.gmra.mxu0 %v2586_v12  ;;  %v2215_v5 = vshll.u32 %v2026_v19, 16  ;;  %v2595_v6 = vshll.u32 %v7248_v3, 16  ;;  %v7267_v59 = vpop.f32.mrf.mxu2 }
 0x289   : > { %8027 = vst [vmem:[#allocation97_spill] sm:$0xff] %v7267_v59 }
 0x28a   : > { %v2217_v12 = vrot.slane %v2215_v5, 1  ;;  %v2597_v7 = vrot.slane %v2595_v6, 1  ;;  %v2329_v5 = vrot.slane %v2026_v19, 1  ;;  %v5682_v6 = vld [vmem:[#allocation2 + $0x60] sm:$0xf0] }
 0x28b   : > { %v8032_v19 = vld [vmem:[#allocation19_spill] sm:$0xff] }
 0x28c   : > { %v2218_v14 = vsel %vm1561_vm0, %v2213_v21, %v2217_v12  ;;  %v3478_v21 = vadd.f32 %v7253_v55, %v7155_v45  ;;  %v2600_v45 = vshrl.u32 %v6969_v26, 16 }
 0x28e   : > { %3914 = vmatmul.bf16.gmra.mxu2 %v2327_v33  ;;  %v5717_v33 = vor.u32 %v5716_v17, %v5715_v32  ;;  %v7275_v47 = vpop.f32.mrf.mxu1  ;;  %v5718_v17 = vld [vmem:[#allocation2 + $0x18] sm:$0xf0] }
 0x28f   : > { %v3561_v2 = vpop.f32.mrf.mxu3  ;;  %8029 = vst [vmem:[#allocation99_spill] sm:$0xff] %v7275_v47 }
 0x290   : > { %v7263_v29 = vadd.f32 %v3561_v2, %v3473_v40  ;;  %v2593_v40 = vor.u32 %v2592_v28, %v2588_v18  ;;  %v2328_v15 = vrot.slane %v5717_v33, 1  ;;  %v5684_v28 = vor.u32 %v5683_v27, %v5682_v6  ;;  %v7283_v12 = vpop.f32.mrf.mxu2  ;;  %v7286_v18 = vpop.f32.mrf.mxu0  ;;  %v5719_v33 = vld [vmem:[#allocation2 + $0x18] sm:$0xe] }
 0x291   : > { %8030 = vst [vmem:[#allocation100_spill] sm:$0xff] %v7283_v12  ;;  %v5720_v27 = vor.u32 %v5719_v33, %v5718_v17  ;;  %v2607_v6 = vshll.u32 %v6977_v42, 16  ;;  %v8034_v17 = vld [vmem:[#allocation18_spill] sm:$0xff]  ;;  %v8047_v12 = vld [vmem:[#allocation28_spill] sm:$0xff] }
 0x292   : > { %v2598_v2 = vsel %vm1561_vm0, %v2593_v40, %v2597_v7  ;;  %v2330_v32 = vsel %vm1818_vm9, %v2328_v15, %v2329_v5  ;;  %8031 = vst [vmem:[#allocation101_spill] sm:$0xff] %v7286_v18  ;;  %v2748_v5 = vrot.slane %v7018_v10, 1  ;;  %v5945_v18 = vld [vmem:[#allocation2 + $0x6c] sm:$0xe]  ;;  %v8036_v10 = vld [vmem:[#allocation22_spill] sm:$0xff] }
 0x294   : > { %3612 = vmatmul.bf16.gmra.mxu3 %v1842_v0  ;;  %3830 = vmatmul.bf16.gmra.mxu1 %v2218_v14  ;;  %v5405_v0 = vld [vmem:[#allocation9 + $0x38] sm:$0xff]  ;;  %v1843_v14 = vrot.slane %v5684_v28, 1 }
 0x295   : > { %4308 = vmatpush.bf16.msra.mxu2 %v5405_v0 }
 0x297   : > { %v3564_v60 = vpop.f32.mrf.mxu3 }
 0x298   : > { %v7277_v41 = vadd.f32 %v3564_v60, %v3476_v30  ;;  %4062 = vmatmul.bf16.gmra.mxu0 %v2598_v2  ;;  %v1844_v30 = vrot.slane %v8032_v19, 1  ;;  %v2604_v60 = vrot.slane %v2602_v53, 1  ;;  %v7291_v2 = vpop.f32.mrf.mxu1  ;;  %v2747_v19 = vrot.slane %v5720_v27, 1  ;;  %v7305_v27 = vld [vmem:[#allocation2 + $0x90] sm:$0xff]  }
 0x299   : > { %8033 = vst [vmem:[#allocation19_spill] sm:$0xff] %v7291_v2  ;;  %v2631_v2 = vshll.u32 %v7016_v43, 16 }
 0x29a   : > { %v1845_v15 = vsel %vm1818_vm9, %v1843_v14, %v1844_v30  ;;  %v2605_v0 = vor.u32 %v2604_v60, %v2600_v45  ;;  %v2749_v28 = vsel %vm1818_vm9, %v2747_v19, %v2748_v5  ;;  %v7302_v14 = vpop.f32.mrf.mxu0  ;;  %v5946_v60 = vor.u32 %v5945_v18, %v8036_v10  ;;  %v8038_v19 = vld [vmem:[#allocation23_spill] sm:$0xff] }
 0x29b   : > { %8035 = vst [vmem:[#allocation18_spill] sm:$0xff] %v7302_v14  ;;  %v8041_v14 = vld [vmem:[#allocation25_spill] sm:$0xff] }
 0x29e   : > { %3919 = vmatmul.bf16.gmra.mxu2 %v2330_v32  ;;  %v5376_v32 = vld [vmem:[#allocation8 + $0x190] sm:$0xff] }
 0x29f   : > { %v3566_v7 = vpop.f32.mrf.mxu3  ;;  %3930 = vmatpush.bf16.msra.mxu3 %v5376_v32  ;;  %v1846_v32 = vrot.slane %v5946_v60, 1  ;;  %v8042_v60 = vld [vmem:[#allocation20_spill] sm:$0xff] }
 0x2a0   : > { %v7289_v40 = vadd.f32 %v3566_v7, %v3478_v21  ;;  %v4954_v21 = vld [vmem:[#allocation2 + $0x98] sm:$0x1]  ;;  %v2609_v7 = vrot.slane %v2607_v6, 1  ;;  %v7307_v45 = vpop.f32.mrf.mxu1 }
 0x2a1   : > { %v2469_v30 = vunpack.c.l.b16 %v4954_v21  ;;  %8037 = vst [vmem:[#allocation22_spill] sm:$0xff] %v7307_v45  ;;  %v5686_v45 = vld [vmem:[#allocation2 + $0x78] sm:$0xe] }
 0x2a2   : > { %v2610_v42 = vsel %vm1561_vm0, %v2605_v0, %v2609_v7  ;;  %v7316_v7 = vpop.f32.mrf.mxu0 }
 0x2a3   : > { %v7309_v6 = vpack.c.b16 %v2469_v30, %v2469_v30  ;;  %8039 = vst [vmem:[#allocation23_spill] sm:$0xff] %v7316_v7  ;;  %v5404_v7 = vld [vmem:[#allocation9 + $0x30] sm:$0xff]  ;;  %3931 = vmatpush.bf16.msra.mxu3 %v5375_v51 }
 0x2a4   : > { %3617 = vmatmul.bf16.gmra.mxu3 %v1845_v15  ;;  %4111 = vmatmul.bf16.vlgmr.msra.gmra.mxu1 %v2749_v28  ;;  %v2614_v15 = vshll.u32 %v7305_v27, 16  ;;  %v2612_v28 = vshrl.u32 %v7305_v27, 16 }
 0x2a5   : > { %v2619_v0 = vshll.u32 %v7309_v6, 16  ;;  %4309 = vmatpush.bf16.msra.mxu2 %v5404_v7 }
 0x2a6   : > { %v2616_v21 = vrot.slane %v2614_v15, 1  ;;  %v5685_v15 = vld [vmem:[#allocation2 + $0x78] sm:$0xf0] }
 0x2a7   : > { %v3578_v53 = vpop.f32.mrf.mxu3 }
 0x2a8   : > { %v7299_v33 = vadd.f32 %v3578_v53, %v8034_v17  ;;  %4067 = vmatmul.bf16.gmra.mxu0 %v2610_v42  ;;  %v1847_v53 = vrot.slane %v8038_v19, 1  ;;  %v2621_v17 = vrot.slane %v2619_v0, 1  ;;  %v7320_v42 = vpop.f32.mrf.mxu1  ;;  %v2617_v30 = vor.u32 %v2616_v21, %v2612_v28  ;;  %v8044_v28 = vld [vmem:[#allocation26_spill] sm:$0xff] }
 0x2a9   : > { %8040 = vst [vmem:[#allocation102_spill] sm:$0xff] %v7320_v42  ;;  %v5687_v0 = vor.u32 %v5686_v45, %v5685_v15  ;;  %v1850_v42 = vrot.slane %v8044_v28, 1  ;;  %v2754_v45 = vrot.slane %v7069_v52, 1  ;;  %v2633_v28 = vrot.slane %v2631_v2, 1  ;;  %v7347_v52 = vld [vmem:[#allocation2 + $0xa8] sm:$0xff]  }
 0x2aa   : > { %v1848_v18 = vsel %vm1818_vm9, %v1846_v32, %v1847_v53  ;;  %v2622_v19 = vsel %vm1561_vm0, %v2617_v30, %v2621_v17  ;;  %v2626_v32 = vshll.u32 %v7006_v48, 16  ;;  %v7328_v53 = vpop.f32.mrf.mxu0  ;;  %v5722_v17 = vld [vmem:[#allocation2 + $0x30] sm:$0xe]  ;;  %v2624_v30 = vshrl.u32 %v7006_v48, 16  ;;  %8048 = vst [vmem:[#allocation26_spill] sm:$0xff] %v7347_v52 }
 0x2ab   : > { %8043 = vst [vmem:[#allocation25_spill] sm:$0xff] %v7328_v53  ;;  %v1849_v47 = vrot.slane %v5687_v0, 1  ;;  %v2638_v51 = vshll.u32 %v7347_v52, 16 }
 0x2ad   : > { %v1851_v53 = vsel %vm1818_vm9, %v1849_v47, %v1850_v42  ;;  %v2471_v42 = vunpack.c.l.b16 %v4956_v46 }
 0x2af   : > { %v7312_v5 = vpop.f32.mrf.mxu3  ;;  %v7351_v0 = vpack.c.b16 %v2471_v42, %v2471_v42  ;;  %v8052_v42 = vld [vmem:[#allocation32_spill] sm:$0xff] }
 0x2b1   : > { %v2643_v46 = vshll.u32 %v7351_v0, 16 }
 0x2b4   : > { %3622 = vmatmul.bf16.gmra.mxu3 %v1848_v18  ;;  %4116 = vmatmul.bf16.gmra.mxu1 %v8042_v60  ;;  %v5721_v18 = vld [vmem:[#allocation2 + $0x30] sm:$0xf0] }
 0x2b5   : > { %v5723_v7 = vor.u32 %v5722_v17, %v5721_v18  ;;  %v8050_v17 = vld [vmem:[#allocation30_spill] sm:$0xff] }
 0x2b7   : > { %v3583_v10 = vpop.f32.mrf.mxu3 }
 0x2b8   : > { %v7323_v34 = vadd.f32 %v3583_v10, %v8041_v14  ;;  %4072 = vmatmul.bf16.gmra.mxu0 %v2622_v19  ;;  %v7331_v14 = vpop.f32.mrf.mxu1  ;;  %v8046_v10 = vld [vmem:[#allocation27_spill] sm:$0xff]  ;;  %v2628_v19 = vrot.slane %v2626_v32, 1 }
 0x2b9   : > { %8045 = vst [vmem:[#allocation20_spill] sm:$0xff] %v7331_v14  ;;  %v2753_v14 = vrot.slane %v5723_v7, 1 }
 0x2ba   : > { %v2629_v15 = vor.u32 %v2628_v19, %v2624_v30  ;;  %v2636_v30 = vshrl.u32 %v7347_v52, 16  ;;  %v2640_v19 = vrot.slane %v2638_v51, 1  ;;  %v5951_v52 = vld [vmem:[#allocation2 + $0x9c] sm:$0xe] }
 0x2bb   : > { %v2755_v32 = vsel %vm1818_vm9, %v2753_v14, %v2754_v45 }
 0x2bc   : > { %v2634_v47 = vsel %vm1561_vm0, %v2629_v15, %v2633_v28  ;;  %v2757_v15 = vrot.slane %v7104_v56, 1  ;;  %v5689_v56 = vld [vmem:[#allocation2 + $0x90] sm:$0xe] }
 0x2bf   : > { %v3585_v21 = vpop.f32.mrf.mxu3 }
 0x2c0   : > { %v7334_v60 = vadd.f32 %v3585_v21, %v8046_v10  ;;  %v7340_v21 = vpop.f32.mrf.mxu0  ;;  %v7349_v2 = vpop.f32.mrf.mxu1 }
 0x2c1   : > { %8049 = vst [vmem:[#allocation27_spill] sm:$0xff] %v7349_v2 }
 0x2c4   : > { %3627 = vmatmul.bf16.gmra.mxu3 %v1851_v53  ;;  %4121 = vmatmul.bf16.gmra.mxu1 %v2755_v32  ;;  %v5948_v53 = vld [vmem:[#allocation2 + $0x3c] sm:$0xe]  ;;  %v2645_v32 = vrot.slane %v2643_v46, 1 }
 0x2c5   : > { %v5949_v14 = vor.u32 %v5948_v53, %v7084_v49 }
 0x2c7   : > { %v3588_v10 = vpop.f32.mrf.mxu3  ;;  %v2756_v45 = vrot.slane %v5949_v14, 1  ;;  %v5403_v14 = vld [vmem:[#allocation9 + $0x28] sm:$0xff] }
 0x2c8   : > { %v7344_v43 = vadd.f32 %v3588_v10, %v8047_v12  ;;  %4077 = vmatmul.bf16.gmra.mxu0 %v2634_v47  ;;  %v7360_v7 = vpop.f32.mrf.mxu0  ;;  %v7363_v28 = vpop.f32.mrf.mxu1  ;;  %v2641_v10 = vor.u32 %v2640_v19, %v2636_v30  ;;  %4310 = vmatpush.bf16.msra.mxu2 %v5403_v14  ;;  %v5724_v19 = vld [vmem:[#allocation2 + $0x48] sm:$0xf0] }
 0x2c9   : > { %8051 = vst [vmem:[#allocation28_spill] sm:$0xff] %v7363_v28  ;;  %v2758_v47 = vsel %vm1818_vm9, %v2756_v45, %v2757_v15  ;;  %v2650_v28 = vshll.u32 %v7063_v22, 16  ;;  %v1856_v45 = vrot.slane %v6892_v62, 1  ;;  %v8054_v15 = vld [vmem:[#allocation34_spill] sm:$0xff] }
 0x2ca   : > { %v2646_v51 = vsel %vm1561_vm0, %v2641_v10, %v2645_v32  ;;  %v5725_v10 = vld [vmem:[#allocation2 + $0x48] sm:$0xe]  ;;  %v2648_v32 = vshrl.u32 %v7063_v22, 16  ;;  %v5374_v62 = vld [vmem:[#allocation8 + $0x180] sm:$0xff] }
 0x2cb   : > { %v5726_v2 = vor.u32 %v5725_v10, %v5724_v19  ;;  %3932 = vmatpush.bf16.msra.mxu3 %v5374_v62  ;;  %v7393_v10 = vld [vmem:[#allocation2 + $0xc0] sm:$0xff]  }
 0x2cc   : > { %8057 = vst [vmem:[#allocation34_spill] sm:$0xff] %v7393_v10 }
 0x2cf   : > { %v3590_v18 = vpop.f32.mrf.mxu3 }
 0x2d0   : > { %v7356_v12 = vadd.f32 %v3590_v18, %v8050_v17  ;;  %v5688_v18 = vld [vmem:[#allocation2 + $0x90] sm:$0xf0]  ;;  %v7371_v17 = vpop.f32.mrf.mxu0  ;;  %v7374_v30 = vpop.f32.mrf.mxu1 }
 0x2d1   : > { %8053 = vst [vmem:[#allocation30_spill] sm:$0xff] %v7374_v30 }
 0x2d4   : > { %3632 = vmatmul.bf16.gmra.mxu3 %v6906_v37  ;;  %4126 = vmatmul.bf16.gmra.mxu1 %v2758_v47  ;;  %v5690_v37 = vor.u32 %v5689_v56, %v5688_v18  ;;  %v2652_v47 = vrot.slane %v2650_v28, 1  ;;  %v2760_v18 = vrot.slane %v7122_v8, 1 }
 0x2d6   : > { %v2653_v56 = vor.u32 %v2652_v47, %v2648_v32  ;;  %v5954_v32 = vld [vmem:[#allocation2 + $0x54] sm:$0xe]  ;;  %v8058_v47 = vld [vmem:[#allocation35_spill] sm:$0xff] }
 0x2d7   : > { %v3593_v49 = vpop.f32.mrf.mxu3 }
 0x2d8   : > { %v7368_v53 = vadd.f32 %v3593_v49, %v8052_v42  ;;  %4082 = vmatmul.bf16.gmra.mxu0 %v2646_v51  ;;  %v2655_v42 = vshll.u32 %v7071_v13, 16  ;;  %v1855_v51 = vrot.slane %v5690_v37, 1  ;;  %v7384_v59 = vpop.f32.mrf.mxu0  ;;  %v7387_v13 = vpop.f32.mrf.mxu1  ;;  %v8056_v37 = vld [vmem:[#allocation37_spill] sm:$0xff] }
 0x2d9   : > { %8055 = vst [vmem:[#allocation32_spill] sm:$0xff] %v7387_v13 }
 0x2da   : > { %v1857_v14 = vsel %vm1818_vm9, %v1855_v51, %v1856_v45  ;;  %v2657_v30 = vrot.slane %v2655_v42, 1  ;;  %v2662_v51 = vshll.u32 %v7393_v10, 16 }
 0x2dc   : > { %v2658_v8 = vsel %vm1561_vm0, %v2653_v56, %v2657_v30  ;;  %v8059_v30 = vld [vmem:[#allocation39_spill] sm:$0xff] }
 0x2df   : > { %v3595_v46 = vpop.f32.mrf.mxu3 }
 0x2e0   : > { %v7378_v49 = vadd.f32 %v3595_v46, %v8054_v15  ;;  %v2759_v46 = vrot.slane %v5726_v2, 1  ;;  %v4958_v15 = vld [vmem:[#allocation2 + $0xc8] sm:$0x1]  ;;  %v5952_v2 = vor.u32 %v5951_v52, %v8058_v47  ;;  %v2763_v47 = vrot.slane %v7153_v1, 1 }
 0x2e1   : > { %v2473_v45 = vunpack.c.l.b16 %v4958_v15  ;;  %v2660_v15 = vshrl.u32 %v7393_v10, 16  ;;  %v5692_v10 = vld [vmem:[#allocation2 + $0xa8] sm:$0xe] }
 0x2e2   : > { %v2761_v28 = vsel %vm1818_vm9, %v2759_v46, %v2760_v18  ;;  %v1858_v62 = vrot.slane %v5952_v2, 1  ;;  %v5955_v46 = vor.u32 %v5954_v32, %v7134_v23  ;;  %v8061_v32 = vld [vmem:[#allocation41_spill] sm:$0xff] }
 0x2e3   : > { %v7396_v42 = vpack.c.b16 %v2473_v45, %v2473_v45 }
 0x2e4   : > { %3637 = vmatmul.bf16.gmra.mxu3 %v1857_v14  ;;  %4131 = vmatmul.bf16.gmra.mxu1 %v2761_v28  ;;  %v7399_v14 = vpop.f32.mrf.mxu0  ;;  %v2664_v28 = vrot.slane %v2662_v51, 1  ;;  %v2762_v45 = vrot.slane %v5955_v46, 1  ;;  %v5727_v46 = vld [vmem:[#allocation2 + $0x60] sm:$0xf0] }
 0x2e5   : > { %v2667_v52 = vshll.u32 %v7396_v42, 16 }
 0x2e6   : > { %v2665_v2 = vor.u32 %v2664_v28, %v2660_v15  ;;  %v2764_v23 = vsel %vm1818_vm9, %v2762_v45, %v2763_v47  ;;  %v5728_v45 = vld [vmem:[#allocation2 + $0x60] sm:$0xe] }
 0x2e7   : > { %v3598_v22 = vpop.f32.mrf.mxu3  ;;  %v5729_v47 = vor.u32 %v5728_v45, %v5727_v46 }
 0x2e8   : > { %v7390_v19 = vadd.f32 %v3598_v22, %v8056_v37  ;;  %4087 = vmatmul.bf16.gmra.mxu0 %v2658_v8  ;;  %v1859_v22 = vrot.slane %v6945_v38, 1  ;;  %v7408_v37 = vpop.f32.mrf.mxu1  ;;  %v2669_v38 = vrot.slane %v2667_v52, 1  ;;  %v1862_v52 = vrot.slane %v6975_v35, 1  ;;  %v8066_v35 = vld [vmem:[#allocation44_spill] sm:$0xff] }
 0x2e9   : > { %8060 = vst [vmem:[#allocation37_spill] sm:$0xff] %v7408_v37 }
 0x2ea   : > { %v1860_v8 = vsel %vm1818_vm9, %v1858_v62, %v1859_v22  ;;  %v2670_v51 = vsel %vm1561_vm0, %v2665_v2, %v2669_v38  ;;  %v5402_v62 = vld [vmem:[#allocation9 + $0x20] sm:$0xff]  ;;  %v2766_v38 = vrot.slane %v7179_v31, 1 }
 0x2eb   : > { %4311 = vmatpush.bf16.msra.mxu2 %v5402_v62  ;;  %v8065_v62 = vld [vmem:[#allocation46_spill] sm:$0xff] }
 0x2ec   : > { %v7417_v37 = vpop.f32.mrf.mxu0 }
 0x2ef   : > { %v3600_v18 = vpop.f32.mrf.mxu3 }
 0x2f0   : > { %v7404_v56 = vadd.f32 %v3600_v18, %v8059_v30  ;;  %v5691_v30 = vld [vmem:[#allocation2 + $0xa8] sm:$0xf0]  ;;  %v7419_v1 = vpop.f32.mrf.mxu1 }
 0x2f1   : > { %v5693_v22 = vor.u32 %v5692_v10, %v5691_v30  ;;  %8062 = vst [vmem:[#allocation35_spill] sm:$0xff] %v7419_v1  ;;  %v2765_v10 = vrot.slane %v5729_v47, 1 }
 0x2f3   : > { %v1861_v28 = vrot.slane %v5693_v22, 1  ;;  %v2767_v30 = vsel %vm1818_vm9, %v2765_v10, %v2766_v38  ;;  %v8069_v10 = vld [vmem:[#allocation48_spill] sm:$0xff] }
 0x2f4   : > { %3642 = vmatmul.bf16.gmra.mxu3 %v1860_v8  ;;  %4136 = vmatmul.bf16.gmra.mxu1 %v2764_v23  ;;  %v5957_v23 = vld [vmem:[#allocation2 + $0xb4] sm:$0xe] }
 0x2f5   : > { %v1863_v2 = vsel %vm1818_vm9, %v1861_v28, %v1862_v52  ;;  %v1865_v28 = vrot.slane %v7003_v20, 1 }
 0x2f7   : > { %v3603_v13 = vpop.f32.mrf.mxu3 }
 0x2f8   : > { %v7414_v18 = vadd.f32 %v3603_v13, %v8061_v32  ;;  %4092 = vmatmul.bf16.gmra.mxu0 %v2670_v51  ;;  %v8063_v13 = vld [vmem:[#allocation43_spill] sm:$0xff]  ;;  %v7427_v32 = vpop.f32.mrf.mxu1 }
 0x2f9   : > { %8064 = vst [vmem:[#allocation39_spill] sm:$0xff] %v7427_v32 }
 0x2ff   : > { %v3605_v15 = vpop.f32.mrf.mxu3 }
 0x300   : > { %v7423_v8 = vadd.f32 %v3605_v15, %v8063_v13  ;;  %v5958_v15 = vor.u32 %v5957_v23, %v8066_v35  ;;  %v7435_v52 = vpop.f32.mrf.mxu1  ;;  %v5401_v23 = vld [vmem:[#allocation9 + $0x18] sm:$0xff] }
 0x301   : > { %8067 = vst [vmem:[#allocation41_spill] sm:$0xff] %v7435_v52  ;;  %4312 = vmatpush.bf16.msra.mxu2 %v5401_v23 }
 0x302   : > { %v1864_v46 = vrot.slane %v5958_v15, 1 }
 0x304   : > { %3647 = vmatmul.bf16.gmra.mxu3 %v1863_v2  ;;  %4141 = vmatmul.bf16.gmra.mxu1 %v2767_v30  ;;  %v1866_v45 = vsel %vm1818_vm9, %v1864_v46, %v1865_v28  ;;  %v8068_v2 = vld [vmem:[#allocation50_spill] sm:$0xff] }
 0x305   : > { %v5730_v30 = vld [vmem:[#allocation2 + $0x78] sm:$0xf0] }
 0x306   : > { %v5902_v28 = vld [vmem:[#allocation2 + $0x18] sm:$0xff]  }
 0x307   : > { %v3608_v51 = vpop.f32.mrf.mxu3 }
 0x308   : > { %v7431_v22 = vadd.f32 %v3608_v51, %v8065_v62  ;;  %v7445_v51 = vpop.f32.mrf.mxu1  ;;  %v8071_v62 = vld [vmem:[#allocation52_spill] sm:$0xff] }
 0x309   : > { %8070 = vst [vmem:[#allocation43_spill] sm:$0xff] %v7445_v51 }
 0x30f   : > { %v3610_v13 = vpop.f32.mrf.mxu3 }
 0x310   : > { %v7438_v31 = vadd.f32 %v3610_v13, %v6910_v16  ;;  %v5731_v16 = vld [vmem:[#allocation2 + $0x78] sm:$0xe]  ;;  %v2772_v13 = vrot.slane %v7248_v3, 1  ;;  %v7451_v46 = vpop.f32.mrf.mxu1 }
 0x311   : > { %v5732_v15 = vor.u32 %v5731_v16, %v5730_v30  ;;  %8072 = vst [vmem:[#allocation46_spill] sm:$0xff] %v7451_v46  ;;  %v8077_v16 = vld [vmem:[#allocation58_spill] sm:$0xff]  ;;  %v5903_v46 = vld [vmem:[#allocation2 + $0x30] sm:$0xff]  }
 0x314   : > { %3652 = vmatmul.bf16.gmra.mxu3 %v1866_v45  ;;  %4146 = vmatmul.bf16.gmra.mxu1 %v8069_v10  ;;  %v2771_v45 = vrot.slane %v5732_v15, 1  ;;  %v8073_v10 = vld [vmem:[#allocation53_spill] sm:$0xff] }
 0x317   : > { %v3613_v47 = vpop.f32.mrf.mxu3 }
 0x318   : > { %v7442_v38 = vadd.f32 %v3613_v47, %v8068_v2  ;;  %v2773_v2 = vsel %vm1818_vm9, %v2771_v45, %v2772_v13  ;;  %v7457_v23 = vpop.f32.mrf.mxu1  ;;  %v5400_v13 = vld [vmem:[#allocation9 + $0x10] sm:$0xff]  ;;  %v5733_v45 = vld [vmem:[#allocation2 + $0x90] sm:$0xf0] }
 0x319   : > { %8074 = vst [vmem:[#allocation44_spill] sm:$0xff] %v7457_v23  ;;  %4313 = vmatpush.bf16.msra.mxu2 %v5400_v13  ;;  %v5734_v23 = vld [vmem:[#allocation2 + $0x90] sm:$0xe] }
 0x31f   : > { %v3615_v20 = vpop.f32.mrf.mxu3 }
 0x320   : > { %v7448_v35 = vadd.f32 %v3615_v20, %v8071_v62  ;;  %v8075_v62 = vld [vmem:[#allocation55_spill] sm:$0xff]  ;;  %v7463_v30 = vpop.f32.mrf.mxu1 }
 0x321   : > { %8076 = vst [vmem:[#allocation50_spill] sm:$0xff] %v7463_v30 }
 0x324   : > { %3933 = vmatmul.bf16.vlgmr.msra.gmra.mxu3 %v5902_v28  ;;  %4151 = vmatmul.bf16.gmra.mxu1 %v2773_v2  ;;  %v8079_v28 = vld [vmem:[#allocation56_spill] sm:$0xff] }
 0x325   : > { %v8080_v2 = vld [vmem:[#allocation60_spill] sm:$0xff] }
 0x327   : > { %v3618_v47 = vpop.f32.mrf.mxu3 }
 0x328   : > { %v7455_v51 = vadd.f32 %v3618_v47, %v8073_v10 }
 0x32f   : > { %v3620_v20 = vpop.f32.mrf.mxu3 }
 0x330   : > { %v7460_v52 = vadd.f32 %v3620_v20, %v8075_v62  ;;  %v5735_v20 = vor.u32 %v5734_v23, %v5733_v45  ;;  %v7472_v62 = vpop.f32.mrf.mxu1  ;;  %v8085_v23 = vld [vmem:[#allocation63_spill] sm:$0xff] }
 0x331   : > { %8082 = vst [vmem:[#allocation53_spill] sm:$0xff] %v7472_v62  ;;  %v8087_v62 = vld [vmem:[#allocation72_spill] sm:$0xff] }
 0x332   : > { %v2777_v30 = vrot.slane %v5735_v20, 1 }
 0x334   : > { %3938 = vmatmul.bf16.gmra.mxu3 %v7037_v58  ;;  %4156 = vmatmul.bf16.gmra.mxu1 %v8079_v28  ;;  %v2778_v58 = vrot.slane %v7309_v6, 1 }
 0x337   : > { %v3623_v3 = vpop.f32.mrf.mxu3 }
 0x338   : > { %v7466_v15 = vadd.f32 %v3623_v3, %v8077_v16  ;;  %v2779_v16 = vsel %vm1818_vm9, %v2777_v30, %v2778_v58  ;;  %v7479_v13 = vpop.f32.mrf.mxu1  ;;  %v8088_v30 = vld [vmem:[#allocation65_spill] sm:$0xff] }
 0x339   : > { %8084 = vst [vmem:[#allocation58_spill] sm:$0xff] %v7479_v13  ;;  %v5737_v13 = vld [vmem:[#allocation2 + $0xa8] sm:$0xe] }
 0x33a   : > { %8078 = vst [vmem:[#allocation48_spill] sm:$0xff] %v7466_v15  ;;  %v2790_v15 = vrot.slane %v7396_v42, 1 }
 0x33f   : > { %v3625_v47 = vpop.f32.mrf.mxu3 }
 0x340   : > { %v7470_v10 = vadd.f32 %v3625_v47, %v8080_v2  ;;  %v7481_v47 = vpop.f32.mrf.mxu2  ;;  %v7487_v6 = vpop.f32.mrf.mxu1 }
 0x342   : > { %8081 = vst [vmem:[#allocation52_spill] sm:$0xff] %v7470_v10  ;;  %v2784_v10 = vrot.slane %v7351_v0, 1  ;;  %v8095_v0 = vld [vmem:[#allocation81_spill] sm:$0xff] }
 0x344   : > { %3943 = vmatmul.bf16.gmra.mxu3 %v5903_v46  ;;  %4161 = vmatmul.bf16.gmra.mxu1 %v2779_v16  ;;  %v5736_v16 = vld [vmem:[#allocation2 + $0xa8] sm:$0xf0] }
 0x345   : > { %v5738_v1 = vor.u32 %v5737_v13, %v5736_v16 }
 0x347   : > { %v3628_v3 = vpop.f32.mrf.mxu3 }
 0x348   : > { %v7477_v28 = vadd.f32 %v3628_v3, %v7029_v57  ;;  %v7489_v20 = vpop.f32.mrf.mxu2  ;;  %v8090_v57 = vld [vmem:[#allocation61_spill] sm:$0xff]  ;;  %v5399_v3 = vld [vmem:[#allocation9 + $0x8] sm:$0xff] }
 0x349   : > { %4314 = vmatpush.bf16.msra.mxu2 %v5399_v3 }
 0x34a   : > { %8083 = vst [vmem:[#allocation55_spill] sm:$0xff] %v7477_v28  ;;  %v2783_v28 = vrot.slane %v5738_v1, 1 }
 0x34f   : > { %v3630_v2 = vpop.f32.mrf.mxu3 }
 0x350   : > { %v7484_v45 = vadd.f32 %v3630_v2, %v8085_v23  ;;  %v7495_v2 = vpop.f32.mrf.mxu1  ;;  %v8091_v23 = vld [vmem:[#allocation69_spill] sm:$0xff] }
 0x352   : > { %8086 = vst [vmem:[#allocation56_spill] sm:$0xff] %v7484_v45  ;;  %v7500_v45 = vpop.f32.mrf.mxu2 }
 0x354   : > { %3948 = vmatmul.bf16.gmra.mxu3 %v8087_v62  ;;  %4166 = vmatmul.bf16.gmra.mxu1 %v8090_v57  ;;  %v2785_v57 = vsel %vm1818_vm9, %v2783_v28, %v2784_v10  ;;  %v5398_v28 = vld [vmem:[#allocation9] sm:$0xff] }
 0x355   : > { %4315 = vmatpush.bf16.msra.mxu2 %v5398_v28 }
 0x357   : > { %v3633_v46 = vpop.f32.mrf.mxu3 }
 0x358   : > { %v7492_v58 = vadd.f32 %v3633_v46, %v8088_v30  ;;  %v5904_v46 = vld [vmem:[#allocation2 + $0x48] sm:$0xff]   ;;  %v7507_v13 = vpop.f32.mrf.mxu1 }
 0x35a   : > { %8089 = vst [vmem:[#allocation60_spill] sm:$0xff] %v7492_v58  ;;  %v7509_v3 = vpop.f32.mrf.mxu2 }
 0x35f   : > { %v3635_v32 = vpop.f32.mrf.mxu3 }
 0x360   : > { %v7498_v62 = vadd.f32 %v3635_v32, %v8091_v23  ;;  %v7514_v1 = vpop.f32.mrf.mxu1 }
 0x362   : > { %8092 = vst [vmem:[#allocation63_spill] sm:$0xff] %v7498_v62  ;;  %v7517_v23 = vpop.f32.mrf.mxu2 }
 0x364   : > { %3953 = vmatmul.bf16.gmra.mxu3 %v5904_v46  ;;  %4171 = vmatmul.bf16.gmra.mxu1 %v2785_v57  ;;  %v5740_v57 = vld [vmem:[#allocation2 + $0xc0] sm:$0xe] }
 0x367   : > { %v3638_v30 = vpop.f32.mrf.mxu3 }
 0x368   : > { %v7505_v58 = vadd.f32 %v3638_v30, %v7172_v61  ;;  %v8097_v61 = vld [vmem:[#allocation73_spill] sm:$0xff]  ;;  %v5739_v30 = vld [vmem:[#allocation2 + $0xc0] sm:$0xf0] }
 0x36a   : > { %8093 = vst [vmem:[#allocation72_spill] sm:$0xff] %v7505_v58  ;;  %v7523_v58 = vpop.f32.mrf.mxu1 }
 0x36f   : > { %v3640_v32 = vpop.f32.mrf.mxu3 }
 0x370   : > { %v7512_v16 = vadd.f32 %v3640_v32, %v7189_v11  ;;  %v5741_v32 = vor.u32 %v5740_v57, %v5739_v30 }
 0x372   : > { %8094 = vst [vmem:[#allocation65_spill] sm:$0xff] %v7512_v16  ;;  %v7525_v16 = vpop.f32.mrf.mxu2  ;;  %v2789_v62 = vrot.slane %v5741_v32, 1 }
 0x374   : > { %3958 = vmatmul.bf16.gmra.mxu3 %v8095_v0  ;;  %4176 = vmatmul.bf16.gmra.mxu1 %v8097_v61  ;;  %v7533_v61 = vpop.f32.mrf.mxu1 }
 0x377   : > { %v3643_v46 = vpop.f32.mrf.mxu3 }
 0x378   : > { %v7520_v10 = vadd.f32 %v3643_v46, %v7202_v36  ;;  %v2791_v46 = vsel %vm1818_vm9, %v2789_v62, %v2790_v15  ;;  %v8102_v15 = vld [vmem:[#allocation21_spill] sm:$0xff] }
 0x379   : > { %v3403_v62 = vadd.f32 %v7253_v55, %v8102_v15 }
 0x37a   : > { %8096 = vst [vmem:[#allocation61_spill] sm:$0xff] %v7520_v10  ;;  %v7538_v30 = vpop.f32.mrf.mxu2 }
 0x37f   : > { %v3645_v11 = vpop.f32.mrf.mxu3 }
 0x380   : > { %v7528_v0 = vadd.f32 %v3645_v11, %v7223_v9 }
 0x382   : > { %8098 = vst [vmem:[#allocation69_spill] sm:$0xff] %v7528_v0  ;;  %v7543_v11 = vpop.f32.mrf.mxu2  ;;  %v8107_v0 = vld [vmem:[#allocation83_spill] sm:$0xff] }
 0x384   : > { %3963 = vmatmul.bf16.gmra.mxu3 %v7175_v50  ;;  %4181 = vmatmul.bf16.gmra.mxu1 %v2791_v46 }
 0x387   : > { %v3648_v36 = vpop.f32.mrf.mxu3 }
 0x388   : > { %v7536_v28 = vadd.f32 %v3648_v36, %v7236_v25  ;;  %v8103_v36 = vld [vmem:[#allocation24_spill] sm:$0xff] }
 0x389   : > { %v3492_v46 = vadd.f32 %v8103_v36, %v3403_v62  ;;  %v7566_v62 = vpop.f32.mrf.mxu0 }
 0x38a   : > { %8099 = vst [vmem:[#allocation81_spill] sm:$0xff] %v7536_v28  ;;  %v7551_v25 = vpop.f32.mrf.mxu2  ;;  %v8104_v28 = vld [vmem:[#allocation29_spill] sm:$0xff] }
 0x38f   : > { %v3650_v57 = vpop.f32.mrf.mxu3 }
 0x390   : > { %v7541_v9 = vadd.f32 %v3650_v57, %v7263_v29  ;;  %v3668_v29 = vadd.f32 %v8104_v28, %v7299_v33  ;;  %v8108_v33 = vld [vmem:[#allocation70_spill] sm:$0xff] }
 0x392   : > { %8100 = vst [vmem:[#allocation73_spill] sm:$0xff] %v7541_v9  ;;  %v7563_v15 = vpop.f32.mrf.mxu2 }
 0x394   : > { %3968 = vmatmul.bf16.gmra.mxu3 %v7207_v63  ;;  %v3581_v63 = vadd.f32 %v7312_v5, %v3492_v46 }
 0x397   : > { %v3653_v50 = vpop.f32.mrf.mxu3 }
 0x398   : > { %v7547_v42 = vadd.f32 %v3653_v50, %v7277_v41  ;;  %v8105_v41 = vld [vmem:[#allocation66_spill] sm:$0xff] }
 0x399   : > { %v3757_v50 = vadd.f32 %v8105_v41, %v3668_v29  ;;  %v8110_v29 = vld [vmem:[#allocation33_spill] sm:$0xff] }
 0x39a   : > { %8101 = vst [vmem:[#allocation103_spill] sm:$0xff] %v7547_v42  ;;  %v8106_v42 = vld [vmem:[#allocation31_spill] sm:$0xff]  ;;  %v7575_v41 = vpop.f32.mrf.mxu2 }
 0x39b   : > { %v3670_v9 = vadd.f32 %v8106_v42, %v3581_v63  ;;  %v3846_v10 = vadd.f32 %v8107_v0, %v3757_v50  ;;  %v3673_v42 = vadd.f32 %v8110_v29, %v7323_v34 }
 0x39d   : > { %v3759_v28 = vadd.f32 %v8108_v33, %v3670_v9  ;;  %v8112_v33 = vld [vmem:[#allocation36_spill] sm:$0xff] }
 0x39e   : > { %v3675_v34 = vadd.f32 %v8112_v33, %v7334_v60 }
 0x39f   : > { %v3655_v32 = vpop.f32.mrf.mxu3 }
 0x3a0   : > { %v7557_v57 = vadd.f32 %v3655_v32, %v7289_v40  ;;  %v7569_v40 = vpop.f32.mrf.mxu1  ;;  %v8109_v32 = vld [vmem:[#allocation86_spill] sm:$0xff] }
 0x3a4   : > { %3973 = vmatmul.bf16.gmra.mxu3 %v7246_v54  ;;  %v3848_v54 = vadd.f32 %v8109_v32, %v3759_v28 }
 0x3a7   : > { %v3934_v55 = vpop.f32.mrf.mxu3 }
 0x3a8   : > { %v3935_v36 = vadd.f32 %v3934_v55, %v3846_v10  ;;  %v7579_v10 = vpop.f32.mrf.mxu0 }
 0x3aa   : > { %v4024_v5 = vadd.f32 %v7340_v21, %v3935_v36  ;;  %v8111_v21 = vld [vmem:[#allocation74_spill] sm:$0xff]  ;;  %v7584_v36 = vpop.f32.mrf.mxu1 }
 0x3ab   : > { %v3762_v55 = vadd.f32 %v8111_v21, %v3673_v42 }
 0x3ac   : > { %v4113_v0 = vadd.f32 %v7487_v6, %v4024_v5  ;;  %v8113_v5 = vld [vmem:[#allocation76_spill] sm:$0xff] }
 0x3ad   : > { %v3851_v6 = vadd.f32 %v7177_v44, %v3762_v55  ;;  %v3764_v29 = vadd.f32 %v8113_v5, %v3675_v34  ;;  %v8115_v34 = vld [vmem:[#allocation78_spill] sm:$0xff] }
 0x3ae   : > { %v4192_v28 = vmax.f32 %v4113_v0, 0.0  ;;  %v8114_v0 = vld [vmem:[#allocation38_spill] sm:$0xff] }
 0x3af   : > { %v3936_v46 = vpop.f32.mrf.mxu3 }
 0x3b0   : > { %v3937_v63 = vadd.f32 %v3936_v46, %v3848_v54 }
 0x3b2   : > { %v4026_v50 = vadd.f32 %v7360_v7, %v3937_v63  ;;  %v3853_v63 = vadd.f32 %v7196_v4, %v3764_v29 }
 0x3b4   : > { %v4115_v9 = vadd.f32 %v7495_v2, %v4026_v50  ;;  %3978 = vmatmul.bf16.gmra.mxu3 %v6969_v26  ;;  %v7590_v2 = vpop.f32.mrf.mxu2  ;;  %v7592_v26 = vpop.f32.mrf.mxu0 }
 0x3b5   : > { %v7596_v50 = vpop.f32.mrf.mxu1 }
 0x3b6   : > { %v4193_v32 = vmax.f32 %v4115_v9, 0.0  ;;  %v3678_v9 = vadd.f32 %v8114_v0, %v7344_v43 }
 0x3b7   : > { %v3939_v54 = vpop.f32.mrf.mxu3 }
 0x3b8   : > { %v4224_v46 = vpack.c.bf16 %v4193_v32, %v4192_v28  ;;  %v3940_v7 = vadd.f32 %v3939_v54, %v3851_v6  ;;  %v3767_v28 = vadd.f32 %v8115_v34, %v3678_v9  ;;  %v8120_v34 = vld [vmem:[#allocation45_spill] sm:$0xff] }
 0x3ba   : > { %4316 = vmatmul.bf16.vlgmr.msra.gmra.mxu2 %v4224_v46  ;;  %v4029_v42 = vadd.f32 %v7371_v17, %v3940_v7  ;;  %v8116_v17 = vld [vmem:[#allocation40_spill] sm:$0xff] }
 0x3bb   : > { %v3680_v4 = vadd.f32 %v8116_v17, %v7356_v12 }
 0x3bc   : > { %v4118_v44 = vadd.f32 %v7507_v13, %v4029_v42  ;;  %v7607_v32 = vpop.f32.mrf.mxu2  ;;  %v7609_v6 = vpop.f32.mrf.mxu0  ;;  %v3856_v13 = vadd.f32 %v7221_v39, %v3767_v28 }
 0x3be   : > { %v4194_v54 = vmax.f32 %v4118_v44, 0.0 }
 0x3bf   : > { %v3941_v60 = vpop.f32.mrf.mxu3 }
 0x3c0   : > { %v3942_v21 = vadd.f32 %v3941_v60, %v3853_v63  ;;  %v8118_v63 = vld [vmem:[#allocation42_spill] sm:$0xff] }
 0x3c1   : > { %v3683_v60 = vadd.f32 %v8118_v63, %v7368_v53  ;;  %v3685_v53 = vadd.f32 %v8120_v34, %v7378_v49 }
 0x3c2   : > { %v4031_v55 = vadd.f32 %v7384_v59, %v3942_v21  ;;  %v4134_v59 = vpop.f32.mrf.mxu1 }
 0x3c4   : > { %v4120_v33 = vadd.f32 %v7514_v1, %v4031_v55  ;;  %3983 = vmatmul.bf16.gmra.mxu3 %v7305_v27  ;;  %v8117_v1 = vld [vmem:[#allocation79_spill] sm:$0xff]  ;;  %v7617_v0 = vpop.f32.mrf.mxu2  ;;  %v7619_v21 = vpop.f32.mrf.mxu0 }
 0x3c5   : > { %v3769_v27 = vadd.f32 %v8117_v1, %v3680_v4  ;;  %v8123_v1 = vld [vmem:[#allocation100_spill] sm:$0xff] }
 0x3c6   : > { %v4195_v46 = vmax.f32 %v4120_v33, 0.0 }
 0x3c7   : > { %v3944_v43 = vpop.f32.mrf.mxu3  ;;  %v3858_v42 = vadd.f32 %v7239_v24, %v3769_v27  ;;  %v8119_v24 = vld [vmem:[#allocation82_spill] sm:$0xff]  ;;  %v8124_v27 = vld [vmem:[#allocation47_spill] sm:$0xff] }
 0x3c8   : > { %v4225_v7 = vpack.c.bf16 %v4195_v46, %v4194_v54  ;;  %v3945_v5 = vadd.f32 %v3944_v43, %v3856_v13  ;;  %v8121_v54 = vld [vmem:[#allocation97_spill] sm:$0xff] }
 0x3c9   : > { %v8122_v13 = vld [vmem:[#allocation85_spill] sm:$0xff] }
 0x3ca   : > { %4321 = vmatmul.bf16.gmra.mxu2 %v4225_v7  ;;  %v4034_v29 = vadd.f32 %v7399_v14, %v3945_v5  ;;  %v7623_v55 = vpop.f32.mrf.mxu1  ;;  %v3772_v14 = vadd.f32 %v8119_v24, %v3683_v60  ;;  %v3774_v7 = vadd.f32 %v8122_v13, %v3685_v53  ;;  %v8126_v24 = vld [vmem:[#allocation26_spill] sm:$0xff] }
 0x3cc   : > { %v4123_v39 = vadd.f32 %v7523_v58, %v4034_v29  ;;  %v3861_v46 = vadd.f32 %v8121_v54, %v3772_v14  ;;  %v7631_v58 = vpop.f32.mrf.mxu2  ;;  %v3863_v49 = vadd.f32 %v8123_v1, %v3774_v7  ;;  %v3688_v29 = vadd.f32 %v8124_v27, %v7390_v19  ;;  %v8127_v14 = vld [vmem:[#allocation49_spill] sm:$0xff]  ;;  %v8128_v54 = vld [vmem:[#allocation90_spill] sm:$0xff]  ;;  %v8129_v7 = vld [vmem:[#allocation51_spill] sm:$0xff] }
 0x3cd   : > { %v3690_v34 = vadd.f32 %v8127_v14, %v7404_v56 }
 0x3ce   : > { %v4196_v28 = vmax.f32 %v4123_v39, 0.0 }
 0x3cf   : > { %v3946_v12 = vpop.f32.mrf.mxu3 }
 0x3d0   : > { %v3947_v9 = vadd.f32 %v3946_v12, %v3858_v42 }
 0x3d2   : > { %v4036_v44 = vadd.f32 %v7417_v37, %v3947_v9  ;;  %v8125_v9 = vld [vmem:[#allocation88_spill] sm:$0xff] }
 0x3d3   : > { %v3777_v39 = vadd.f32 %v8125_v9, %v3688_v29 }
 0x3d4   : > { %v4125_v33 = vadd.f32 %v7533_v61, %v4036_v44  ;;  %3988 = vmatmul.bf16.gmra.mxu3 %v7006_v48  ;;  %v7634_v61 = vpop.f32.mrf.mxu0  ;;  %v7636_v48 = vpop.f32.mrf.mxu1 }
 0x3d5   : > { %v7645_v44 = vpop.f32.mrf.mxu2 }
 0x3d6   : > { %v4197_v17 = vmax.f32 %v4125_v33, 0.0 }
 0x3d7   : > { %v3949_v4 = vpop.f32.mrf.mxu3 }
 0x3d8   : > { %v4226_v43 = vpack.c.bf16 %v4197_v17, %v4196_v28  ;;  %v3950_v37 = vadd.f32 %v3949_v4, %v3861_v46  ;;  %v3779_v46 = vadd.f32 %v8128_v54, %v3690_v34 }
 0x3da   : > { %4326 = vmatmul.bf16.gmra.mxu2 %v4226_v43  ;;  %v4039_v5 = vadd.f32 %v7566_v62, %v3950_v37  ;;  %v3868_v37 = vadd.f32 %v7489_v20, %v3779_v46  ;;  %v8132_v20 = vld [vmem:[#allocation54_spill] sm:$0xff] }
 0x3dc   : > { %v4128_v63 = vadd.f32 %v7569_v40, %v4039_v5  ;;  %v7649_v62 = vpop.f32.mrf.mxu0  ;;  %v7653_v28 = vpop.f32.mrf.mxu1  ;;  %v3866_v40 = vadd.f32 %v7481_v47, %v3777_v39  ;;  %v3693_v5 = vadd.f32 %v8129_v7, %v7414_v18  ;;  %v4942_v39 = vld [vmem:[#allocation2 + $0xcc] sm:$0xff]   ;;  %v4959_v18 = vld [vmem:[#allocation2 + $0xd4] sm:$0x1] }
 0x3dd   : > { %v7658_v43 = vpop.f32.mrf.mxu2  ;;  %v2474_v34 = vunpack.c.l.b16 %v4959_v18  ;;  %v2674_v54 = vshll.u32 %v4942_v39, 16  ;;  %v2672_v46 = vshrl.u32 %v4942_v39, 16  ;;  %v8136_v18 = vld [vmem:[#allocation96_spill] sm:$0xff] }
 0x3de   : > { %v4198_v19 = vmax.f32 %v4128_v63, 0.0 }
 0x3df   : > { %v3951_v42 = vpop.f32.mrf.mxu3  ;;  %v2676_v7 = vrot.slane %v2674_v54, 1 }
 0x3e0   : > { %v3952_v12 = vadd.f32 %v3951_v42, %v3863_v49  ;;  %v8130_v42 = vld [vmem:[#allocation68_spill] sm:$0xff] }
 0x3e2   : > { %v4041_v60 = vadd.f32 %v7579_v10, %v3952_v12 }
 0x3e4   : > { %v4130_v33 = vadd.f32 %v7584_v36, %v4041_v60  ;;  %3993 = vmatmul.bf16.gmra.mxu3 %v8126_v24  ;;  %v7661_v13 = vpop.f32.mrf.mxu0  ;;  %v7665_v47 = vpop.f32.mrf.mxu1  ;;  %v3695_v60 = vadd.f32 %v8132_v20, %v7423_v8  ;;  %v5960_v24 = vld [vmem:[#allocation2 + $0xcc] sm:$0xe] }
 0x3e6   : > { %v4199_v53 = vmax.f32 %v4130_v33, 0.0  ;;  %v5959_v33 = vld [vmem:[#allocation2 + $0xcc] sm:$0xf0] }
 0x3e7   : > { %v3954_v10 = vpop.f32.mrf.mxu3 }
 0x3e8   : > { %v4227_v17 = vpack.c.bf16 %v4199_v53, %v4198_v19  ;;  %v3955_v4 = vadd.f32 %v3954_v10, %v3866_v40  ;;  %v7673_v19 = vpop.f32.mrf.mxu2  ;;  %v2490_v53 = vpack.c.b16 %v2474_v34, %v2474_v34  ;;  %v5961_v40 = vor.u32 %v5960_v24, %v5959_v33  ;;  %v8135_v33 = vld [vmem:[#allocation34_spill] sm:$0xff] }
 0x3ea   : > { %4331 = vmatmul.bf16.gmra.mxu2 %v4227_v17  ;;  %v4044_v36 = vadd.f32 %v7592_v26, %v3955_v4  ;;  %v8131_v26 = vld [vmem:[#allocation92_spill] sm:$0xff]  ;;  %v8133_v17 = vld [vmem:[#allocation94_spill] sm:$0xff] }
 0x3eb   : > { %v3782_v12 = vadd.f32 %v8131_v26, %v3693_v5  ;;  %v3784_v8 = vadd.f32 %v8133_v17, %v3695_v60 }
 0x3ec   : > { %v4133_v49 = vadd.f32 %v7596_v50, %v4044_v36  ;;  %v7679_v4 = vpop.f32.mrf.mxu1  ;;  %v2679_v36 = vshll.u32 %v2490_v53, 16 }
 0x3ed   : > { %v3871_v50 = vadd.f32 %v7500_v45, %v3782_v12 }
 0x3ee   : > { %v4200_v63 = vmax.f32 %v4133_v49, 0.0  ;;  %v2681_v5 = vrot.slane %v2679_v36, 1 }
 0x3ef   : > { %v3956_v56 = vpop.f32.mrf.mxu3 }
 0x3f0   : > { %v3957_v1 = vadd.f32 %v3956_v56, %v3868_v37  ;;  %v2792_v37 = vrot.slane %v5961_v40, 1  ;;  %v2793_v56 = vrot.slane %v2490_v53, 1  ;;  %v7687_v20 = vpop.f32.mrf.mxu2 }
 0x3f2   : > { %v4046_v27 = vadd.f32 %v7609_v6, %v3957_v1  ;;  %v3873_v1 = vadd.f32 %v7509_v3, %v3784_v8  ;;  %v2794_v49 = vsel %vm1818_vm9, %v2792_v37, %v2793_v56 }
 0x3f3   : > { %4186 = vmatmul.bf16.gmra.mxu1 %v2794_v49 }
 0x3f4   : > { %v4135_v29 = vadd.f32 %v4134_v59, %v4046_v27  ;;  %3998 = vmatmul.bf16.gmra.mxu3 %v8130_v42  ;;  %v7676_v59 = vpop.f32.mrf.mxu0  ;;  %v8134_v42 = vld [vmem:[#allocation57_spill] sm:$0xff] }
 0x3f5   : > { %v3698_v26 = vadd.f32 %v8134_v42, %v7431_v22  ;;  %v8137_v22 = vld [vmem:[#allocation59_spill] sm:$0xff] }
 0x3f6   : > { %v4201_v9 = vmax.f32 %v4135_v29, 0.0  ;;  %v2677_v29 = vor.u32 %v2676_v7, %v2672_v46  ;;  %v3700_v34 = vadd.f32 %v8137_v22, %v7438_v31  ;;  %v8139_v31 = vld [vmem:[#allocation62_spill] sm:$0xff] }
 0x3f7   : > { %v3959_v14 = vpop.f32.mrf.mxu3  ;;  %v3787_v24 = vadd.f32 %v8136_v18, %v3698_v26  ;;  %v3703_v56 = vadd.f32 %v8139_v31, %v7442_v38 }
 0x3f8   : > { %v4228_v6 = vpack.c.bf16 %v4201_v9, %v4200_v63  ;;  %v3960_v10 = vadd.f32 %v3959_v14, %v3871_v50  ;;  %v2682_v63 = vsel %vm1561_vm0, %v2677_v29, %v2681_v5  ;;  %v4149_v14 = vpop.f32.mrf.mxu1  ;;  %v7698_v8 = vpop.f32.mrf.mxu2 }
 0x3f9   : > { %4097 = vmatmul.bf16.gmra.mxu0 %v2682_v63  ;;  %v3876_v40 = vadd.f32 %v7517_v23, %v3787_v24 }
 0x3fa   : > { %4336 = vmatmul.bf16.gmra.mxu2 %v4228_v6  ;;  %v4049_v45 = vadd.f32 %v7619_v21, %v3960_v10 }
 0x3fc   : > { %v4138_v60 = vadd.f32 %v7623_v55, %v4049_v45  ;;  %v4060_v21 = vpop.f32.mrf.mxu0 }
 0x3fe   : > { %v4202_v50 = vmax.f32 %v4138_v60, 0.0 }
 0x3ff   : > { %v3961_v27 = vpop.f32.mrf.mxu3 }
 0x400   : > { %v3962_v12 = vadd.f32 %v3961_v27, %v3873_v1  ;;  %v4152_v36 = vpop.f32.mrf.mxu1  ;;  %v8140_v1 = vld [vmem:[#allocation19_spill] sm:$0xff]  ;;  %v7708_v27 = vpop.f32.mrf.mxu2 }
 0x401   : > { %v3792_v49 = vadd.f32 %v8140_v1, %v3703_v56 }
 0x402   : > { %v4051_v9 = vadd.f32 %v7634_v61, %v3962_v12  ;;  %v8138_v61 = vld [vmem:[#allocation99_spill] sm:$0xff] }
 0x403   : > { %v3789_v17 = vadd.f32 %v8138_v61, %v3700_v34  ;;  %v3881_v38 = vadd.f32 %v7538_v30, %v3792_v49 }
 0x404   : > { %v4140_v3 = vadd.f32 %v7636_v48, %v4051_v9  ;;  %4003 = vmatmul.bf16.gmra.mxu3 %v8135_v33  ;;  %v4063_v48 = vpop.f32.mrf.mxu0  ;;  %v8143_v33 = vld [vmem:[#allocation67_spill] sm:$0xff] }
 0x405   : > { %v3878_v46 = vadd.f32 %v7525_v16, %v3789_v17 }
 0x406   : > { %v4203_v6 = vmax.f32 %v4140_v3, 0.0 }
 0x407   : > { %v3964_v53 = vpop.f32.mrf.mxu3 }
 0x408   : > { %v4229_v55 = vpack.c.bf16 %v4203_v6, %v4202_v50  ;;  %v3965_v10 = vadd.f32 %v3964_v53, %v3876_v40  ;;  %v7718_v24 = vpop.f32.mrf.mxu2  ;;  %v8144_v53 = vld [vmem:[#allocation102_spill] sm:$0xff] }
 0x40a   : > { %4341 = vmatmul.bf16.gmra.mxu2 %v4229_v55  ;;  %v4054_v54 = vadd.f32 %v7649_v62, %v3965_v10  ;;  %v8141_v62 = vld [vmem:[#allocation64_spill] sm:$0xff]  ;;  %v8145_v55 = vld [vmem:[#allocation71_spill] sm:$0xff] }
 0x40b   : > { %v3705_v16 = vadd.f32 %v8141_v62, %v7448_v35  ;;  %v3708_v35 = vadd.f32 %v8143_v33, %v7455_v51  ;;  %v8149_v62 = vld [vmem:[#allocation27_spill] sm:$0xff] }
 0x40c   : > { %v4143_v23 = vadd.f32 %v7653_v28, %v4054_v54  ;;  %v4065_v26 = vpop.f32.mrf.mxu0  ;;  %v4154_v28 = vpop.f32.mrf.mxu1  ;;  %v7741_v33 = vld [vmem:[%s7905_s6] ss:$0 sm:$0xff] }
 0x40d   : > { %v3797_v40 = vadd.f32 %v8144_v53, %v3708_v35  ;;  %v8154_v53 = vld [vmem:[#allocation80_spill] sm:$0xff] }
 0x40e   : > { %v4204_v29 = vmax.f32 %v4143_v23, 0.0  ;;  %v8147_v23 = vld [vmem:[#allocation48_spill] sm:$0xff] }
 0x40f   : > { %v3966_v37 = vpop.f32.mrf.mxu3  ;;  %v3886_v17 = vadd.f32 %v7551_v25, %v3797_v40 }
 0x410   : > { %v3967_v7 = vadd.f32 %v3966_v37, %v3878_v46  ;;  %v8146_v46 = vld [vmem:[#allocation20_spill] sm:$0xff]  ;;  %v7726_v31 = vpop.f32.mrf.mxu2 }
 0x412   : > { %v4056_v5 = vadd.f32 %v7661_v13, %v3967_v7  ;;  %v8142_v13 = vld [vmem:[#allocation22_spill] sm:$0xff] }
 0x414   : > { %v4145_v45 = vadd.f32 %v7665_v47, %v4056_v5  ;;  %4008 = vmatmul.bf16.gmra.mxu3 %v4942_v39  ;;  %v3794_v47 = vadd.f32 %v8142_v13, %v3705_v16  ;;  %v4068_v22 = vpop.f32.mrf.mxu0  ;;  %v4157_v50 = vpop.f32.mrf.mxu1 }
 0x416   : > { %v4205_v42 = vmax.f32 %v4145_v45, 0.0  ;;  %v3883_v9 = vadd.f32 %v7543_v11, %v3794_v47 }
 0x417   : > { %v3969_v12 = vpop.f32.mrf.mxu3 }
 0x418   : > { %v4230_v63 = vpack.c.bf16 %v4205_v42, %v4204_v29  ;;  %v3970_v60 = vadd.f32 %v3969_v12, %v3881_v38  ;;  %v7732_v29 = vpop.f32.mrf.mxu2  ;;  %v8150_v12 = vld [vmem:[#allocation52_spill] sm:$0xff]  ;;  %v8151_v38 = vld [vmem:[#allocation77_spill] sm:$0xff] }
 0x41a   : > { %4346 = vmatmul.bf16.gmra.mxu2 %v4230_v63  ;;  %v4059_v39 = vadd.f32 %v7676_v59, %v3970_v60  ;;  %v3710_v59 = vadd.f32 %v8145_v55, %v7460_v52  ;;  %v8148_v52 = vld [vmem:[#allocation75_spill] sm:$0xff]  ;;  %v3715_v63 = vadd.f32 %v8151_v38, %v8150_v12 }
 0x41b   : > { %v3713_v5 = vadd.f32 %v8148_v52, %v8147_v23 }
 0x41c   : > { %v4148_v30 = vadd.f32 %v7679_v4, %v4059_v39  ;;  %v3799_v37 = vadd.f32 %v8146_v46, %v3710_v59  ;;  %v4070_v4 = vpop.f32.mrf.mxu0  ;;  %v8156_v46 = vld [vmem:[#allocation56_spill] sm:$0xff] }
 0x41d   : > { %v3802_v16 = vadd.f32 %v8149_v62, %v3713_v5  ;;  %v8158_v62 = vld [vmem:[#allocation32_spill] sm:$0xff] }
 0x41e   : > { %v4206_v10 = vmax.f32 %v4148_v30, 0.0  ;;  %v3888_v56 = vadd.f32 %v7563_v15, %v3799_v37  ;;  %v5504_v30 = vld [vmem:[%s6364_s22] sm:$0xff]   ;;  %v8157_v37 = vld [vmem:[#allocation84_spill] sm:$0xff] }
 0x41f   : > { %v3971_v3 = vpop.f32.mrf.mxu3  ;;  %v3891_v47 = vadd.f32 %v7575_v41, %v3802_v16 }
 0x420   : > { %v3972_v18 = vadd.f32 %v3971_v3, %v3883_v9 }
 0x422   : > { %v4061_v34 = vadd.f32 %v4060_v21, %v3972_v18  ;;  %v4159_v21 = vpop.f32.mrf.mxu1 }
 0x424   : > { %v4150_v6 = vadd.f32 %v4149_v14, %v4061_v34  ;;  %v4073_v42 = vpop.f32.mrf.mxu0 }
 0x426   : > { %v4207_v11 = vmax.f32 %v4150_v6, 0.0  ;;  %v8153_v6 = vld [vmem:[#allocation55_spill] sm:$0xff] }
 0x427   : > { %v3974_v61 = vpop.f32.mrf.mxu3  ;;  %v3718_v41 = vadd.f32 %v8154_v53, %v8153_v6  ;;  %v8161_v53 = vld [vmem:[#allocation37_spill] sm:$0xff] }
 0x428   : > { %v4231_v51 = vpack.c.bf16 %v4207_v11, %v4206_v10  ;;  %v3975_v54 = vadd.f32 %v3974_v61, %v3886_v17  ;;  %v5505_v11 = vunpack.c.l.bf16 %v5504_v30  ;;  %v5506_v17 = vunpack.c.h.bf16 %v5504_v30 }
 0x42a   : > { %4351 = vmatmul.bf16.gmra.mxu2 %v4231_v51  ;;  %v4064_v14 = vadd.f32 %v4063_v48, %v3975_v54  ;;  %v4162_v15 = vpop.f32.mrf.mxu1  ;;  %v8155_v51 = vld [vmem:[#allocation30_spill] sm:$0xff] }
 0x42b   : > { %v3807_v54 = vadd.f32 %v8155_v51, %v3718_v41 }
 0x42c   : > { %v4153_v1 = vadd.f32 %v4152_v36, %v4064_v14  ;;  %v8152_v36 = vld [vmem:[#allocation28_spill] sm:$0xff]  ;;  %v4075_v18 = vpop.f32.mrf.mxu0 }
 0x42e   : > { %v4208_v48 = vmax.f32 %v4153_v1, 0.0 }
 0x42f   : > { %v3976_v7 = vpop.f32.mrf.mxu3 }
 0x430   : > { %v3977_v45 = vadd.f32 %v3976_v7, %v3888_v56 }
 0x432   : > { %v4066_v49 = vadd.f32 %v4065_v26, %v3977_v45  ;;  %v3804_v26 = vadd.f32 %v8152_v36, %v3715_v63  ;;  %v4164_v55 = vpop.f32.mrf.mxu1  ;;  %v3896_v45 = vadd.f32 %v7607_v32, %v3807_v54  ;;  %v5742_v32 = vld [vmem:[%s6364_s22 + $0x8] sm:$0xff]  }
 0x433   : > { %v5510_v6 = vunpack.c.h.bf16 %v5742_v32 }
 0x434   : > { %v4155_v25 = vadd.f32 %v4154_v28, %v4066_v49  ;;  %v3893_v35 = vadd.f32 %v7590_v2, %v3804_v26  ;;  %v3720_v2 = vadd.f32 %v8157_v37, %v8156_v46 }
 0x436   : > { %v4209_v60 = vmax.f32 %v4155_v25, 0.0  ;;  %v3809_v16 = vadd.f32 %v8158_v62, %v3720_v2  ;;  %v8164_v2 = vld [vmem:[#allocation35_spill] sm:$0xff] }
 0x437   : > { %v3979_v13 = vpop.f32.mrf.mxu3 }
 0x438   : > { %v4232_v39 = vpack.c.bf16 %v4209_v60, %v4208_v48  ;;  %v3980_v9 = vadd.f32 %v3979_v13, %v3891_v47  ;;  %v3898_v60 = vadd.f32 %v7617_v0, %v3809_v16  ;;  %v8159_v47 = vld [vmem:[#allocation60_spill] sm:$0xff] }
 0x43a   : > { %4356 = vmatmul.bf16.gmra.mxu2 %v4232_v39  ;;  %v4069_v3 = vadd.f32 %v4068_v22, %v3980_v9  ;;  %v4167_v12 = vpop.f32.mrf.mxu1  ;;  %v8160_v39 = vld [vmem:[#allocation87_spill] sm:$0xff] }
 0x43b   : > { %v3723_v9 = vadd.f32 %v8160_v39, %v8159_v47  ;;  %v8168_v47 = vld [vmem:[#allocation65_spill] sm:$0xff] }
 0x43c   : > { %v4158_v59 = vadd.f32 %v4157_v50, %v4069_v3  ;;  %v5509_v3 = vunpack.c.l.bf16 %v5742_v32  ;;  %v8167_v32 = vld [vmem:[#allocation39_spill] sm:$0xff] }
 0x43d   : > { %v4317_v28 = vpop.f32.mrf.mxu2  ;;  %v3812_v41 = vadd.f32 %v8161_v53, %v3723_v9 }
 0x43e   : > { %v4318_v10 = vadd.f32 %v7741_v33, %v4317_v28  ;;  %v4210_v56 = vmax.f32 %v4158_v59, 0.0 }
 0x43f   : > { %v3981_v34 = vpop.f32.mrf.mxu3 }
 0x440   : > { %v3982_v40 = vadd.f32 %v3981_v34, %v3893_v35  ;;  %v4464_v7 = vadd.f32 %v5505_v11, %v4318_v10 }
 0x442   : > { %v4071_v22 = vadd.f32 %v4070_v4, %v3982_v40  ;;  %v4496_v1 = vmax.f32 %v4464_v7, 0.0  ;;  %v8162_v40 = vld [vmem:[#allocation63_spill] sm:$0xff]  ;;  %v4169_v0 = vpop.f32.mrf.mxu1 }
 0x444   : > { %v4160_v61 = vadd.f32 %v4159_v21, %v4071_v22  ;;  %v4078_v21 = vpop.f32.mrf.mxu0 }
 0x445   : > { %v4319_v14 = vpop.f32.mrf.mxu2 }
 0x446   : > { %v4211_v23 = vmax.f32 %v4160_v61, 0.0  ;;  %v4320_v52 = vadd.f32 %v7741_v33, %v4319_v14 }
 0x447   : > { %v3984_v5 = vpop.f32.mrf.mxu3 }
 0x448   : > { %v4465_v50 = vadd.f32 %v5506_v17, %v4320_v52  ;;  %v4233_v4 = vpack.c.bf16 %v4211_v23, %v4210_v56  ;;  %v3985_v25 = vadd.f32 %v3984_v5, %v3896_v45  ;;  %v5743_v45 = vld [vmem:[%s6364_s22 + $0x10] sm:$0xff]  }
 0x44a   : > { %v4497_v49 = vmax.f32 %v4465_v50, 0.0  ;;  %4361 = vmatmul.bf16.gmra.mxu2 %v4233_v4  ;;  %v4074_v48 = vadd.f32 %v4073_v42, %v3985_v25  ;;  %v8163_v42 = vld [vmem:[#allocation89_spill] sm:$0xff]  ;;  %v4172_v50 = vpop.f32.mrf.mxu1 }
 0x44b   : > { %v3725_v59 = vadd.f32 %v8163_v42, %v8162_v40  ;;  %v8170_v42 = vld [vmem:[#allocation41_spill] sm:$0xff] }
 0x44c   : > { %v5570_v38 = vpack.c.bf16 %v4497_v49, %v4496_v1  ;;  %v4163_v26 = vadd.f32 %v4162_v15, %v4074_v48  ;;  %v4080_v30 = vpop.f32.mrf.mxu0  ;;  %v8165_v1 = vld [vmem:[#allocation72_spill] sm:$0xff]  ;;  %v8166_v49 = vld [vmem:[#allocation91_spill] sm:$0xff] }
 0x44d   : > { %v4322_v63 = vpop.f32.mrf.mxu2  ;;  %v3814_v14 = vadd.f32 %v8164_v2, %v3725_v59 }
 0x44e   : > { %5571 = vst [vmem:[%s7756_s21] sm:$0xff] %v5570_v38   ;;  %v4323_v28 = vadd.f32 %v7741_v33, %v4322_v63  ;;  %v4212_v11 = vmax.f32 %v4163_v26, 0.0  ;;  %v5513_v38 = vunpack.c.l.bf16 %v5743_v45 }
 0x44f   : > { %v3986_v13 = vpop.f32.mrf.mxu3  ;;  %v3903_v5 = vadd.f32 %v7645_v44, %v3814_v14 }
 0x450   : > { %v3987_v36 = vadd.f32 %v3986_v13, %v3898_v60  ;;  %v4466_v22 = vadd.f32 %v5509_v3, %v4323_v28  ;;  %v5514_v60 = vunpack.c.h.bf16 %v5743_v45  ;;  %v8175_v45 = vld [vmem:[#allocation98_spill] sm:$0xff] }
 0x452   : > { %v4076_v35 = vadd.f32 %v4075_v18, %v3987_v36  ;;  %v3901_v18 = vadd.f32 %v7631_v58, %v3812_v41  ;;  %v4498_v54 = vmax.f32 %v4466_v22, 0.0  ;;  %v3728_v58 = vadd.f32 %v8166_v49, %v8165_v1 }
 0x454   : > { %v4165_v34 = vadd.f32 %v4164_v55, %v4076_v35  ;;  %v4083_v7 = vpop.f32.mrf.mxu0  ;;  %v3817_v13 = vadd.f32 %v8167_v32, %v3728_v58  ;;  %v8176_v32 = vld [vmem:[#allocation46_spill] sm:$0xff] }
 0x455   : > { %v4324_v10 = vpop.f32.mrf.mxu2 }
 0x456   : > { %v4213_v61 = vmax.f32 %v4165_v34, 0.0  ;;  %v4325_v15 = vadd.f32 %v7741_v33, %v4324_v10 }
 0x457   : > { %v3989_v17 = vpop.f32.mrf.mxu3 }
 0x458   : > { %v4467_v51 = vadd.f32 %v5510_v6, %v4325_v15  ;;  %v4234_v55 = vpack.c.bf16 %v4213_v61, %v4212_v11  ;;  %v3990_v37 = vadd.f32 %v3989_v17, %v3901_v18  ;;  %v4174_v6 = vpop.f32.mrf.mxu1  ;;  %v5744_v61 = vld [vmem:[%s6364_s22 + $0x18] sm:$0xff]  }
 0x459   : > { %v8171_v17 = vld [vmem:[#allocation61_spill] sm:$0xff] }
 0x45a   : > { %v4499_v46 = vmax.f32 %v4467_v51, 0.0  ;;  %4366 = vmatmul.bf16.gmra.mxu2 %v4234_v55  ;;  %v4079_v52 = vadd.f32 %v4078_v21, %v3990_v37  ;;  %v8169_v21 = vld [vmem:[#allocation93_spill] sm:$0xff]  ;;  %v8172_v51 = vld [vmem:[#allocation95_spill] sm:$0xff]  ;;  %v5517_v37 = vunpack.c.l.bf16 %v5744_v61 }
 0x45b   : > { %v3730_v39 = vadd.f32 %v8169_v21, %v8168_v47  ;;  %v3733_v18 = vadd.f32 %v8172_v51, %v8171_v17 }
 0x45c   : > { %v5575_v56 = vpack.c.bf16 %v4499_v46, %v4498_v54  ;;  %v4168_v62 = vadd.f32 %v4167_v12, %v4079_v52  ;;  %v4085_v3 = vpop.f32.mrf.mxu0  ;;  %v8173_v52 = vld [vmem:[#allocation43_spill] sm:$0xff] }
 0x45d   : > { %v4327_v23 = vpop.f32.mrf.mxu2  ;;  %v3819_v59 = vadd.f32 %v8170_v42, %v3730_v39  ;;  %v8179_v42 = vld [vmem:[#allocation44_spill] sm:$0xff] }
 0x45e   : > { %5757 = vst [vmem:[%s7756_s21 + $0x8] sm:$0xff] %v5575_v56   ;;  %v4328_v16 = vadd.f32 %v7741_v33, %v4327_v23  ;;  %v4214_v9 = vmax.f32 %v4168_v62, 0.0  ;;  %v5518_v23 = vunpack.c.h.bf16 %v5744_v61 }
 0x45f   : > { %v3991_v4 = vpop.f32.mrf.mxu3  ;;  %v3908_v22 = vadd.f32 %v7673_v19, %v3819_v59 }
 0x460   : > { %v3992_v25 = vadd.f32 %v3991_v4, %v3903_v5  ;;  %v4468_v36 = vadd.f32 %v5513_v38, %v4328_v16  ;;  %v4177_v14 = vpop.f32.mrf.mxu1  ;;  %v3822_v5 = vadd.f32 %v8173_v52, %v3733_v18 }
 0x462   : > { %v4081_v63 = vadd.f32 %v4080_v30, %v3992_v25  ;;  %v3906_v30 = vadd.f32 %v7658_v43, %v3817_v13  ;;  %v4500_v53 = vmax.f32 %v4468_v36, 0.0  ;;  %v3911_v16 = vadd.f32 %v7687_v20, %v3822_v5 }
 0x464   : > { %v4170_v48 = vadd.f32 %v4169_v0, %v4081_v63  ;;  %v4088_v55 = vpop.f32.mrf.mxu0 }
 0x465   : > { %v4329_v44 = vpop.f32.mrf.mxu2 }
 0x466   : > { %v4215_v26 = vmax.f32 %v4170_v48, 0.0  ;;  %v4330_v28 = vadd.f32 %v7741_v33, %v4329_v44 }
 0x467   : > { %v3994_v12 = vpop.f32.mrf.mxu3 }
 0x468   : > { %v4469_v35 = vadd.f32 %v5514_v60, %v4330_v28  ;;  %v4235_v34 = vpack.c.bf16 %v4215_v26, %v4214_v9  ;;  %v3995_v40 = vadd.f32 %v3994_v12, %v3906_v30  ;;  %v4179_v39 = vpop.f32.mrf.mxu1  ;;  %v5745_v26 = vld [vmem:[%s6364_s22 + $0x20] sm:$0xff]   ;;  %v8178_v12 = vld [vmem:[#allocation101_spill] sm:$0xff] }
 0x46a   : > { %v4501_v41 = vmax.f32 %v4469_v35, 0.0  ;;  %4371 = vmatmul.bf16.gmra.mxu2 %v4235_v34  ;;  %v4084_v11 = vadd.f32 %v4083_v7, %v3995_v40  ;;  %v8174_v7 = vld [vmem:[#allocation69_spill] sm:$0xff]  ;;  %v5522_v40 = vunpack.c.h.bf16 %v5745_v26 }
 0x46b   : > { %v3735_v19 = vadd.f32 %v8175_v45, %v8174_v7 }
 0x46c   : > { %v5580_v0 = vpack.c.bf16 %v4501_v41, %v4500_v53  ;;  %v4173_v54 = vadd.f32 %v4172_v50, %v4084_v11  ;;  %v4090_v47 = vpop.f32.mrf.mxu0  ;;  %v8181_v11 = vld [vmem:[#allocation18_spill] sm:$0xff] }
 0x46d   : > { %v4332_v10 = vpop.f32.mrf.mxu2  ;;  %v3824_v13 = vadd.f32 %v8176_v32, %v3735_v19  ;;  %v8185_v32 = vld [vmem:[#allocation53_spill] sm:$0xff] }
 0x46e   : > { %5758 = vst [vmem:[%s7756_s21 + $0x10] sm:$0xff] %v5580_v0   ;;  %v4333_v46 = vadd.f32 %v7741_v33, %v4332_v10  ;;  %v4216_v1 = vmax.f32 %v4173_v54, 0.0  ;;  %v8180_v10 = vld [vmem:[#allocation73_spill] sm:$0xff] }
 0x46f   : > { %v3996_v15 = vpop.f32.mrf.mxu3  ;;  %v3913_v36 = vadd.f32 %v7698_v8, %v3824_v13 }
 0x470   : > { %v3997_v43 = vadd.f32 %v3996_v15, %v3908_v22  ;;  %v4470_v49 = vadd.f32 %v5517_v37, %v4333_v46  ;;  %v3740_v22 = vadd.f32 %v8181_v11, %v8180_v10  ;;  %v4182_v18 = vpop.f32.mrf.mxu1 }
 0x472   : > { %v4086_v2 = vadd.f32 %v4085_v3, %v3997_v43  ;;  %v4502_v63 = vmax.f32 %v4470_v49, 0.0  ;;  %v8177_v3 = vld [vmem:[#allocation81_spill] sm:$0xff]  ;;  %v8183_v49 = vld [vmem:[#allocation103_spill] sm:$0xff] }
 0x473   : > { %v3738_v20 = vadd.f32 %v8178_v12, %v8177_v3 }
 0x474   : > { %v4175_v56 = vadd.f32 %v4174_v6, %v4086_v2  ;;  %v5521_v6 = vunpack.c.l.bf16 %v5745_v26  ;;  %v4093_v0 = vpop.f32.mrf.mxu0 }
 0x475   : > { %v4334_v4 = vpop.f32.mrf.mxu2  ;;  %v3827_v59 = vadd.f32 %v8179_v42, %v3738_v20 }
 0x476   : > { %v4217_v58 = vmax.f32 %v4175_v56, 0.0  ;;  %v4335_v25 = vadd.f32 %v7741_v33, %v4334_v4  ;;  %v8182_v56 = vld [vmem:[#allocation50_spill] sm:$0xff]  ;;  %v5746_v4 = vld [vmem:[%s6364_s22 + $0x28] sm:$0xff]  }
 0x477   : > { %v3999_v50 = vpop.f32.mrf.mxu3  ;;  %v3916_v54 = vadd.f32 %v7708_v27, %v3827_v59 }
 0x478   : > { %v4471_v62 = vadd.f32 %v5518_v23, %v4335_v25  ;;  %v4236_v38 = vpack.c.bf16 %v4217_v58, %v4216_v1  ;;  %v4000_v60 = vadd.f32 %v3999_v50, %v3911_v16  ;;  %v3829_v23 = vadd.f32 %v8182_v56, %v3740_v22  ;;  %v8184_v58 = vld [vmem:[#allocation23_spill] sm:$0xff]  ;;  %v4184_v50 = vpop.f32.mrf.mxu1 }
 0x479   : > { %v3743_v25 = vadd.f32 %v8184_v58, %v8183_v49 }
 0x47a   : > { %v4503_v48 = vmax.f32 %v4471_v62, 0.0  ;;  %4376 = vmatmul.bf16.gmra.mxu2 %v4236_v38  ;;  %v4089_v9 = vadd.f32 %v4088_v55, %v4000_v60  ;;  %v3918_v45 = vadd.f32 %v7718_v24, %v3829_v23  ;;  %v5525_v38 = vunpack.c.l.bf16 %v5746_v4 }
 0x47b   : > { %v5526_v60 = vunpack.c.h.bf16 %v5746_v4  ;;  %v3832_v13 = vadd.f32 %v8185_v32, %v3743_v25 }
 0x47c   : > { %v5585_v21 = vpack.c.bf16 %v4503_v48, %v4502_v63  ;;  %v4178_v30 = vadd.f32 %v4177_v14, %v4089_v9  ;;  %v4095_v19 = vpop.f32.mrf.mxu0 }
 0x47d   : > { %v4337_v44 = vpop.f32.mrf.mxu2  ;;  %v3921_v12 = vadd.f32 %v7726_v31, %v3832_v13 }
 0x47e   : > { %5759 = vst [vmem:[%s7756_s21 + $0x18] sm:$0xff] %v5585_v21   ;;  %v4338_v34 = vadd.f32 %v7741_v33, %v4337_v44  ;;  %v4218_v61 = vmax.f32 %v4178_v30, 0.0 }
 0x47f   : > { %v4001_v28 = vpop.f32.mrf.mxu3 }
 0x480   : > { %v4002_v35 = vadd.f32 %v4001_v28, %v3913_v36  ;;  %v4472_v15 = vadd.f32 %v5521_v6, %v4338_v34 }
 0x482   : > { %v4091_v53 = vadd.f32 %v4090_v47, %v4002_v35  ;;  %v4504_v37 = vmax.f32 %v4472_v15, 0.0  ;;  %v8186_v47 = vld [vmem:[#allocation25_spill] sm:$0xff]  ;;  %v4187_v35 = vpop.f32.mrf.mxu1 }
 0x483   : > { %v3745_v24 = vadd.f32 %v8186_v47, %v7557_v57  ;;  %v8187_v57 = vld [vmem:[#allocation58_spill] sm:$0xff] }
 0x484   : > { %v4180_v41 = vadd.f32 %v4179_v39, %v4091_v53  ;;  %v4098_v26 = vpop.f32.mrf.mxu0 }
 0x485   : > { %v4339_v8 = vpop.f32.mrf.mxu2  ;;  %v3834_v53 = vadd.f32 %v8187_v57, %v3745_v24 }
 0x486   : > { %v4219_v17 = vmax.f32 %v4180_v41, 0.0  ;;  %v4340_v51 = vadd.f32 %v7741_v33, %v4339_v8 }
 0x487   : > { %v4004_v43 = vpop.f32.mrf.mxu3  ;;  %v3923_v59 = vadd.f32 %v7732_v29, %v3834_v53  ;;  %v5751_v53 = vld [vmem:[%s6364_s22 + $0x50] sm:$0xff]  }
 0x488   : > { %v4473_v55 = vadd.f32 %v5522_v40, %v4340_v51  ;;  %v4237_v46 = vpack.c.bf16 %v4219_v17, %v4218_v61  ;;  %v4005_v14 = vadd.f32 %v4004_v43, %v3916_v54 }
 0x48a   : > { %v4505_v2 = vmax.f32 %v4473_v55, 0.0  ;;  %4381 = vmatmul.bf16.gmra.mxu2 %v4237_v46  ;;  %v4094_v7 = vadd.f32 %v4093_v0, %v4005_v14  ;;  %v5747_v0 = vld [vmem:[%s6364_s22 + $0x30] sm:$0xff]   ;;  %v4189_v17 = vpop.f32.mrf.mxu1 }
 0x48b   : > { %v5529_v61 = vunpack.c.l.bf16 %v5747_v0 }
 0x48c   : > { %v5590_v52 = vpack.c.bf16 %v4505_v2, %v4504_v37  ;;  %v4183_v62 = vadd.f32 %v4182_v18, %v4094_v7  ;;  %v4100_v22 = vpop.f32.mrf.mxu0  ;;  %v5530_v18 = vunpack.c.h.bf16 %v5747_v0 }
 0x48d   : > { %v4342_v5 = vpop.f32.mrf.mxu2 }
 0x48e   : > { %5760 = vst [vmem:[%s7756_s21 + $0x20] sm:$0xff] %v5590_v52   ;;  %v4343_v16 = vadd.f32 %v7741_v33, %v4342_v5  ;;  %v4220_v39 = vmax.f32 %v4183_v62, 0.0  ;;  %v5748_v5 = vld [vmem:[%s6364_s22 + $0x38] sm:$0xff]  }
 0x48f   : > { %v4006_v1 = vpop.f32.mrf.mxu3 }
 0x490   : > { %v4007_v27 = vadd.f32 %v4006_v1, %v3918_v45  ;;  %v4474_v44 = vadd.f32 %v5525_v38, %v4343_v16  ;;  %v5533_v45 = vunpack.c.l.bf16 %v5748_v5  ;;  %v5749_v16 = vld [vmem:[%s6364_s22 + $0x40] sm:$0xff]  }
 0x492   : > { %v4096_v63 = vadd.f32 %v4095_v19, %v4007_v27  ;;  %v4506_v30 = vmax.f32 %v4474_v44, 0.0  ;;  %v5534_v19 = vunpack.c.h.bf16 %v5748_v5 }
 0x494   : > { %v4185_v48 = vadd.f32 %v4184_v50, %v4096_v63  ;;  %v5537_v63 = vunpack.c.l.bf16 %v5749_v16 }
 0x495   : > { %v4344_v21 = vpop.f32.mrf.mxu2 }
 0x496   : > { %v4221_v9 = vmax.f32 %v4185_v48, 0.0  ;;  %v4345_v36 = vadd.f32 %v7741_v33, %v4344_v21  ;;  %v5538_v48 = vunpack.c.h.bf16 %v5749_v16 }
 0x497   : > { %v4009_v28 = vpop.f32.mrf.mxu3 }
 0x498   : > { %v4475_v3 = vadd.f32 %v5526_v60, %v4345_v36  ;;  %v4238_v20 = vpack.c.bf16 %v4221_v9, %v4220_v39  ;;  %v4010_v6 = vadd.f32 %v4009_v28, %v3921_v12  ;;  %v5750_v9 = vld [vmem:[%s6364_s22 + $0x48] sm:$0xff]  }
 0x499   : > { %v5542_v28 = vunpack.c.h.bf16 %v5750_v9 }
 0x49a   : > { %v4507_v34 = vmax.f32 %v4475_v3, 0.0  ;;  %4386 = vmatmul.bf16.gmra.mxu2 %v4238_v20  ;;  %v4099_v42 = vadd.f32 %v4098_v26, %v4010_v6  ;;  %v5541_v26 = vunpack.c.l.bf16 %v5750_v9 }
 0x49c   : > { %v5595_v41 = vpack.c.bf16 %v4507_v34, %v4506_v30  ;;  %v4188_v8 = vadd.f32 %v4187_v35, %v4099_v42  ;;  %v5546_v42 = vunpack.c.h.bf16 %v5751_v53 }
 0x49d   : > { %v4347_v40 = vpop.f32.mrf.mxu2 }
 0x49e   : > { %5761 = vst [vmem:[%s7756_s21 + $0x28] sm:$0xff] %v5595_v41   ;;  %v4348_v31 = vadd.f32 %v7741_v33, %v4347_v40  ;;  %v4222_v55 = vmax.f32 %v4188_v8, 0.0  ;;  %v5545_v40 = vunpack.c.l.bf16 %v5751_v53 }
 0x49f   : > { %v4011_v10 = vpop.f32.mrf.mxu3 }
 0x4a0   : > { %v4012_v11 = vadd.f32 %v4011_v10, %v3923_v59  ;;  %v4476_v54 = vadd.f32 %v5529_v61, %v4348_v31 }
 0x4a2   : > { %v4101_v15 = vadd.f32 %v4100_v22, %v4012_v11  ;;  %v4508_v14 = vmax.f32 %v4476_v54, 0.0 }
 0x4a4   : > { %v4190_v51 = vadd.f32 %v4189_v17, %v4101_v15  ;;  %v5752_v15 = vld [vmem:[%s6364_s22 + $0x58] sm:$0xff]  }
 0x4a5   : > { %v4349_v43 = vpop.f32.mrf.mxu2 }
 0x4a6   : > { %v4223_v46 = vmax.f32 %v4190_v51, 0.0  ;;  %v4350_v29 = vadd.f32 %v7741_v33, %v4349_v43  ;;  %v5549_v51 = vunpack.c.l.bf16 %v5752_v15 }
 0x4a8   : > { %v4477_v37 = vadd.f32 %v5530_v18, %v4350_v29  ;;  %v4239_v2 = vpack.c.bf16 %v4223_v46, %v4222_v55  ;;  %v5550_v18 = vunpack.c.h.bf16 %v5752_v15 }
 0x4aa   : > { %v4509_v56 = vmax.f32 %v4477_v37, 0.0  ;;  %4391 = vmatmul.bf16.gmra.mxu2 %v4239_v2 }
 0x4ac   : > { %v5600_v23 = vpack.c.bf16 %v4509_v56, %v4508_v14  ;;  %v5753_v56 = vld [vmem:[%s6364_s22 + $0x60] sm:$0xff]  }
 0x4ad   : > { %v4352_v52 = vpop.f32.mrf.mxu2  ;;  %v5554_v5 = vunpack.c.h.bf16 %v5753_v56 }
 0x4ae   : > { %5762 = vst [vmem:[%s7756_s21 + $0x30] sm:$0xff] %v5600_v23   ;;  %v4353_v7 = vadd.f32 %v7741_v33, %v4352_v52  ;;  %v5553_v52 = vunpack.c.l.bf16 %v5753_v56 }
 0x4b0   : > { %v4478_v1 = vadd.f32 %v5533_v45, %v4353_v7 }
 0x4b2   : > { %v4510_v25 = vmax.f32 %v4478_v1, 0.0 }
 0x4b5   : > { %v4354_v4 = vpop.f32.mrf.mxu2 }
 0x4b6   : > { %v4355_v49 = vadd.f32 %v7741_v33, %v4354_v4 }
 0x4b8   : > { %v4479_v58 = vadd.f32 %v5534_v19, %v4355_v49 }
 0x4ba   : > { %v4511_v27 = vmax.f32 %v4479_v58, 0.0 }
 0x4bc   : > { %v5605_v50 = vpack.c.bf16 %v4511_v27, %v4510_v25  ;;  %v5754_v27 = vld [vmem:[%s6364_s22 + $0x68] sm:$0xff]  }
 0x4bd   : > { %v4357_v62 = vpop.f32.mrf.mxu2  ;;  %v5558_v16 = vunpack.c.h.bf16 %v5754_v27 }
 0x4be   : > { %5763 = vst [vmem:[%s7756_s21 + $0x38] sm:$0xff] %v5605_v50   ;;  %v4358_v38 = vadd.f32 %v7741_v33, %v4357_v62  ;;  %v5557_v62 = vunpack.c.l.bf16 %v5754_v27 }
 0x4c0   : > { %v4480_v32 = vadd.f32 %v5537_v63, %v4358_v38 }
 0x4c2   : > { %v4512_v24 = vmax.f32 %v4480_v32, 0.0 }
 0x4c5   : > { %v4359_v60 = vpop.f32.mrf.mxu2 }
 0x4c6   : > { %v4360_v13 = vadd.f32 %v7741_v33, %v4359_v60 }
 0x4c8   : > { %v4481_v47 = vadd.f32 %v5538_v48, %v4360_v13 }
 0x4ca   : > { %v4513_v21 = vmax.f32 %v4481_v47, 0.0 }
 0x4cc   : > { %v5610_v39 = vpack.c.bf16 %v4513_v21, %v4512_v24  ;;  %v5755_v21 = vld [vmem:[%s6364_s22 + $0x70] sm:$0xff]  }
 0x4cd   : > { %v4362_v44 = vpop.f32.mrf.mxu2  ;;  %v5562_v9 = vunpack.c.h.bf16 %v5755_v21 }
 0x4ce   : > { %5764 = vst [vmem:[%s7756_s21 + $0x40] sm:$0xff] %v5610_v39   ;;  %v4363_v36 = vadd.f32 %v7741_v33, %v4362_v44  ;;  %v5561_v44 = vunpack.c.l.bf16 %v5755_v21 }
 0x4d0   : > { %v4482_v12 = vadd.f32 %v5541_v26, %v4363_v36 }
 0x4d2   : > { %v4514_v30 = vmax.f32 %v4482_v12, 0.0 }
 0x4d5   : > { %v4364_v3 = vpop.f32.mrf.mxu2 }
 0x4d6   : > { %v4365_v20 = vadd.f32 %v7741_v33, %v4364_v3 }
 0x4d8   : > { %v4483_v35 = vadd.f32 %v5542_v28, %v4365_v20 }
 0x4da   : > { %v4515_v34 = vmax.f32 %v4483_v35, 0.0 }
 0x4dc   : > { %v5615_v6 = vpack.c.bf16 %v4515_v34, %v4514_v30  ;;  %v5756_v34 = vld [vmem:[%s6364_s22 + $0x78] sm:$0xff]   ;;  %s6096_s22 = sshra.s32 %s4611_s29, 4  ;;  %s6097_s22 = int_to_ptr.hbm [resolvable:$true] %s6096_s22 }
 0x4dd   : > { %v4367_v57 = vpop.f32.mrf.mxu2  ;;  %v5566_v53 = vunpack.c.h.bf16 %v5756_v34  ;;  %s6098_s9 = scalar_lea.hbm %s6097_s22, 128  ;;  %p6103_p10 = scmp.lt.s32.totalorder %s6097_s22, %s7906_s7 }
 0x4de   : > { %5765 = vst [vmem:[%s7756_s21 + $0x48] sm:$0xff] %v5615_v6   ;;  %v4368_v41 = vadd.f32 %v7741_v33, %v4367_v57  ;;  %v5565_v57 = vunpack.c.l.bf16 %v5756_v34  ;;  %p6099_p1 = scmp.ne.s32.totalorder %s6097_s22, %s6098_s9  ;;  %p6104_p12 = scmp.lt.s32.totalorder %s6102_s15, %s6098_s9 }
 0x4e0   : > { %v4484_v0 = vadd.f32 %v5545_v40, %v4368_v41  ;;  %p6100_p4 = pnand %p6099_p1, %p6335_p5  ;;  %p6105_p13 = por %p6104_p12, %p6103_p10 }
 0x4e2   : > { %v4516_v22 = vmax.f32 %v4484_v0, 0.0  ;;  %p6101_p8 = pneg %p6100_p4 }
 0x4e4   : > { %p6106_p0 = pnand %p6105_p13, %p6101_p8 }
 0x4e5   : > { %v4369_v59 = vpop.f32.mrf.mxu2 }
 0x4e6   : > { %v4370_v10 = vadd.f32 %v7741_v33, %v4369_v59 }
 0x4e8   : > { %v4485_v11 = vadd.f32 %v5546_v42, %v4370_v10 }
 0x4ea   : > { %v4517_v8 = vmax.f32 %v4485_v11, 0.0 }
 0x4ec   : > { %v5620_v31 = vpack.c.bf16 %v4517_v8, %v4516_v22 }
 0x4ed   : > { %v4372_v61 = vpop.f32.mrf.mxu2 }
 0x4ee   : > { %5766 = vst [vmem:[%s7756_s21 + $0x50] sm:$0xff] %v5620_v31   ;;  %v4373_v17 = vadd.f32 %v7741_v33, %v4372_v61 }
 0x4f0   : > { %v4486_v55 = vadd.f32 %v5549_v51, %v4373_v17 }
 0x4f2   : > { %v4518_v29 = vmax.f32 %v4486_v55, 0.0 }
 0x4f5   : > { %v4374_v43 = vpop.f32.mrf.mxu2 }
 0x4f6   : > { %v4375_v54 = vadd.f32 %v7741_v33, %v4374_v43 }
 0x4f8   : > { %v4487_v46 = vadd.f32 %v5550_v18, %v4375_v54 }
 0x4fa   : > { %v4519_v37 = vmax.f32 %v4487_v46, 0.0 }
 0x4fc   : > { %v5625_v2 = vpack.c.bf16 %v4519_v37, %v4518_v29 }
 0x4fd   : > { %v4377_v14 = vpop.f32.mrf.mxu2 }
 0x4fe   : > { %5767 = vst [vmem:[%s7756_s21 + $0x58] sm:$0xff] %v5625_v2   ;;  %v4378_v23 = vadd.f32 %v7741_v33, %v4377_v14 }
 0x500   : > { %v4488_v45 = vadd.f32 %v5553_v52, %v4378_v23 }
 0x502   : > { %v4520_v1 = vmax.f32 %v4488_v45, 0.0 }
 0x505   : > { %v4379_v7 = vpop.f32.mrf.mxu2 }
 0x506   : > { %v4380_v19 = vadd.f32 %v7741_v33, %v4379_v7 }
 0x508   : > { %v4489_v4 = vadd.f32 %v5554_v5, %v4380_v19 }
 0x50a   : > { %v4521_v49 = vmax.f32 %v4489_v4, 0.0 }
 0x50c   : > { %v5630_v58 = vpack.c.bf16 %v4521_v49, %v4520_v1 }
 0x50d   : > { %v4382_v25 = vpop.f32.mrf.mxu2 }
 0x50e   : > { %5768 = vst [vmem:[%s7756_s21 + $0x60] sm:$0xff] %v5630_v58   ;;  %v4383_v50 = vadd.f32 %v7741_v33, %v4382_v25 }
 0x510   : > { %v4490_v63 = vadd.f32 %v5557_v62, %v4383_v50 }
 0x512   : > { %v4522_v32 = vmax.f32 %v4490_v63, 0.0 }
 0x515   : > { %v4384_v38 = vpop.f32.mrf.mxu2 }
 0x516   : > { %v4385_v48 = vadd.f32 %v7741_v33, %v4384_v38 }
 0x518   : > { %v4491_v60 = vadd.f32 %v5558_v16, %v4385_v48 }
 0x51a   : > { %v4523_v13 = vmax.f32 %v4491_v60, 0.0 }
 0x51c   : > { %v5635_v47 = vpack.c.bf16 %v4523_v13, %v4522_v32 }
 0x51d   : > { %v4387_v24 = vpop.f32.mrf.mxu2 }
 0x51e   : > { %5769 = vst [vmem:[%s7756_s21 + $0x68] sm:$0xff] %v5635_v47   ;;  %v4388_v39 = vadd.f32 %v7741_v33, %v4387_v24 }
 0x520   : > { %v4492_v26 = vadd.f32 %v5561_v44, %v4388_v39 }
 0x522   : > { %v4524_v12 = vmax.f32 %v4492_v26, 0.0 }
 0x525   : > { %v4389_v36 = vpop.f32.mrf.mxu2 }
 0x526   : > { %v4390_v28 = vadd.f32 %v7741_v33, %v4389_v36 }
 0x528   : > { %v4493_v3 = vadd.f32 %v5562_v9, %v4390_v28 }
 0x52a   : > { %v4525_v20 = vmax.f32 %v4493_v3, 0.0 }
 0x52c   : > { %v5640_v35 = vpack.c.bf16 %v4525_v20, %v4524_v12 }
 0x52d   : > { %v4392_v30 = vpop.f32.mrf.mxu2 }
 0x52e   : > { %5770 = vst [vmem:[%s7756_s21 + $0x70] sm:$0xff] %v5640_v35   ;;  %v4393_v6 = vadd.f32 %v7741_v33, %v4392_v30 }
 0x530   : > { %v4494_v40 = vadd.f32 %v5565_v57, %v4393_v6 }
 0x532   : > { %v4526_v0 = vmax.f32 %v4494_v40, 0.0 }
 0x535   : > { %v4394_v41 = vpop.f32.mrf.mxu2 }
 0x536   : > { %v4395_v42 = vadd.f32 %v7741_v33, %v4394_v41 }
 0x538   : > { %v4495_v59 = vadd.f32 %v5566_v53, %v4395_v42 }
 0x53a   : > { %v4527_v10 = vmax.f32 %v4495_v59, 0.0 }
 0x53c   : > { %v5645_v11 = vpack.c.bf16 %v4527_v10, %v4526_v0 }
 0x53e   : > { %5771 = vst [vmem:[%s7756_s21 + $0x78] sm:$0xff] %v5645_v11  }
 0x53f   : > { %6109 = shalt.err (!%p6106_p0)
}
 0x540   : > { %s6189_s18 = smov 64   ;;  %s6190_s13 = smov 4  }
 0x541   : > { %5810 = dma.vmem_to_hbm [thread:$0]  (%p6335_p5), %s4609_s5, 2048, %s4611_s29, %s4593_s27, %s6189_s18, %s6189_s18, %s6190_s13  }
 0x542 PF: > { %s8188_s17 = sld [smem:[#allocation16_spill]]  ;;  %s4625_s20 = sand.u32 1, %s6161_s24  }
 0x543   : > { %p5827_p3 = pnand %p4742_p11, %p6280_p6  ;;  %s4626_s21 = scalar_lea.sflag [#allocation5], %s4625_s20 }
 0x545   : > { %p5828_p7 = pneg %p5827_p3 }
 0x547   : > { %6147 = dma.done.wait (%p5828_p7), %s4626_s21, 2048  }
 0x548   : > { %6149 = vsyncadd (%p5828_p7), %s4626_s21, 4294965248  ;;  %s25_s29 = sadd.s32 1, %s8188_s17   ;;  %s8189_s19 = sld [smem:[#allocation17_spill]] }
 0x549   : > { %p22_p9 = scmp.ge.s32.totalorder %s25_s29, 4   ;;  %s8190_s24 = smov %s6165_s25 }
 0x54a   : > { %s8191_s25 = smov %s6169_s26  ;;  %s8192_s26 = smov %s6344_s14 }
 0x54b   : > { %s8193_s27 = smov %s6177_s28  ;;  %24 = sbr.rel (!%p22_p9) target bundleno = 12 (0xc), region = 114 }
 0x54e   : > { %s8194_s28 = smov %s8189_s19 }
 0x550   :  { %4632 = vsyncpa [#allocation4], 1 }
 0x551   :  { %4634 = vsyncpa [#allocation4 + $0x1], 1 }
 0x552   :  { %4635 = vsyncpa [#allocation7], 1 }
 0x553   :  { %4636 = vsyncpa [#allocation10], 1 }
 0x554   :  { %4637 = vsyncpa [#allocation5], 1 }
 0x555   :  { %4639 = vsyncpa [#allocation5 + $0x1], 1 }

</bundles_post_ra>
